<compile_context>
chip_gen: v7x
topology: tpu7x:2x2x1
jax: 0.10.0
libtpu: 0.0.40
codegen_flags: <defaults>
</compile_context>

<pallas_src>
import functools

import jax
import jax.numpy as jnp
from jax import lax
from jax.experimental import pallas as pl
from jax.experimental.pallas import tpu as pltpu


# ----------------------------------------------------------------------------
# Fused kernel: ReLU -> 1x1 conv (MXU) -> BN stats -> BN affine, one pass.
#   x_ref:     (N, Cin, L)  f32   (lane = spatial, sublane = channels)
#   w_ref:     (Cout, Cin)  f32 or bf16
#   gamma_ref: (1, Cout, 1) f32
#   beta_ref:  (1, Cout, 1) f32
#   o_ref:     (N, Cout, L) f32
#   y_ref:     (N, Cout, L) f32  VMEM scratch (conv output kept resident)
# ----------------------------------------------------------------------------
def fused_relu_conv_bn_kernel(x_ref, w_ref, gamma_ref, beta_ref, o_ref, y_ref,
                              *, eps, inv_count, use_bf16):
    w = w_ref[...]                                   # (Cout, Cin)
    n_imgs = x_ref.shape[0]

    # ReLU (f32 on VPU) + 1x1 conv as an MXU matmul, per image (static loop).
    for n in range(n_imgs):
        xb = jnp.maximum(x_ref[n], 0.0)              # (Cin, L)
        if use_bf16:
            xb = xb.astype(jnp.bfloat16)
        y_ref[n] = jnp.dot(w, xb, preferred_element_type=jnp.float32)

    y = y_ref[...]                                   # (N, Cout, L) f32

    # BatchNorm training-mode statistics over batch + spatial (per channel).
    # Two-pass (centered) variance: y is VMEM-resident so this is cheap and
    # numerically robust (no E[y^2]-mean^2 cancellation, var >= 0 by
    # construction).
    mean = jnp.sum(jnp.sum(y, axis=2, keepdims=True), axis=0, keepdims=True)
    mean = mean * inv_count                          # (1, Cout, 1)
    d = y - mean                                     # (N, Cout, L)
    var = jnp.sum(jnp.sum(d * d, axis=2, keepdims=True), axis=0, keepdims=True)
    var = var * inv_count                            # (1, Cout, 1)

    scale = gamma_ref[...] * lax.rsqrt(var + eps)    # (1, Cout, 1)  (EUP rsqrt)
    o_ref[...] = (d * scale + beta_ref[...]).astype(o_ref.dtype)


# ----------------------------------------------------------------------------
# Wrapper
# ----------------------------------------------------------------------------
@functools.partial(jax.jit, static_argnames=("eps", "use_bf16_matmul"))
def model_forward(x_nchw, conv_w, gamma, beta, *, eps=1e-5, use_bf16_matmul=False):
    N, C, H, W = x_nchw.shape
    Cout, Cin, kh, kw = conv_w.shape
    assert (kh, kw) == (1, 1) and Cin == C

    L = H * W
    # Free views -- no transpose, no pad, no extra HBM pass.
    x3d = x_nchw.reshape(N, Cin, L).astype(jnp.float32)          # (N, Cin, L)
    w_dtype = jnp.bfloat16 if use_bf16_matmul else jnp.float32
    w2 = conv_w.reshape(Cout, Cin).astype(w_dtype)               # (Cout, Cin)
    gamma3 = gamma.astype(jnp.float32).reshape(1, Cout, 1)
    beta3 = beta.astype(jnp.float32).reshape(1, Cout, 1)

    kernel = functools.partial(
        fused_relu_conv_bn_kernel,
        eps=float(eps),
        inv_count=1.0 / float(N * L),
        use_bf16=use_bf16_matmul,
    )

    # Single fused grid step; everything (x, y, out, w) fits comfortably in
    # VMEM on all generations at this size (~2.2 MB resident; v7x scoped
    # default is 32 MiB).  Full-extent blocks (= array dims) are always legal.
    out3d = pl.pallas_call(
        kernel,
        out_shape=jax.ShapeDtypeStruct((N, Cout, L), jnp.float32),
        grid_spec=pltpu.PrefetchScalarGridSpec(
            num_scalar_prefetch=0,
            grid=(1,),
            in_specs=[
                pl.BlockSpec((N, Cin, L), lambda i: (0, 0, 0)),
                pl.BlockSpec((Cout, Cin), lambda i: (0, 0)),
                pl.BlockSpec((1, Cout, 1), lambda i: (0, 0, 0)),
                pl.BlockSpec((1, Cout, 1), lambda i: (0, 0, 0)),
            ],
            out_specs=pl.BlockSpec((N, Cout, L), lambda i: (0, 0, 0)),
            scratch_shapes=[pltpu.VMEM((N, Cout, L), jnp.float32)],
        ),
        compiler_params=pltpu.CompilerParams(
            dimension_semantics=("arbitrary",)),
    )(x3d, w2, gamma3, beta3)

    # (N, Cout, L) -> NCHW  (free view, no transpose)
    return out3d.reshape(N, Cout, H, W)


def reference_forward(x, conv_w, gamma, beta, eps=1e-5):
    """Pure-JAX reference with identical semantics (sanity check)."""
    r = jnp.maximum(x, 0.0)
    w2 = conv_w.reshape(conv_w.shape[0], conv_w.shape[1])
    z = jnp.einsum("nchw,oc->nohw", r, w2, precision=lax.Precision.HIGHEST)
    mean = jnp.mean(z, axis=(0, 2, 3), keepdims=True)
    var = jnp.mean((z - mean) ** 2, axis=(0, 2, 3), keepdims=True)
    zn = (z - mean) * lax.rsqrt(var + eps)
    return zn * gamma.reshape(1, -1, 1, 1) + beta.reshape(1, -1, 1, 1)


if __name__ == "__main__":
    # Exact input shape from the PyTorch module: [1, 216, 28, 28].
    N, C, H, W = 1, 216, 28, 28

    key = jax.random.PRNGKey(0)
    kx, kw, kg, kb = jax.random.split(key, 4)

    x = jax.random.normal(kx, (N, C, H, W), dtype=jnp.float32)
    conv_w = jax.random.normal(kw, (C, C, 1, 1), dtype=jnp.float32) * (1.0 / jnp.sqrt(C))
    gamma = 1.0 + 0.1 * jax.random.normal(kg, (C,), dtype=jnp.float32)
    beta = 0.1 * jax.random.normal(kb, (C,), dtype=jnp.float32)

    out = model_forward(x, conv_w, gamma, beta, eps=1e-5)
    out = jax.block_until_ready(out)

    ref = reference_forward(x, conv_w, gamma, beta, eps=1e-5)
    assert out.shape == (N, C, H, W)
    max_err = float(jnp.max(jnp.abs(out - ref)))
    assert max_err < 5e-3, f"mismatch vs reference (max err {max_err})"

    print("KERNEL_OK")
</pallas_src>

<mosaic_0001>
module attributes {stable_mosaic.version = 11 : i64} {
  func.func @fused_relu_conv_bn_kernel(%arg0: i32, %arg1: memref<1x216x784xf32, #tpu.memory_space<vmem>>, %arg2: memref<216x216xf32, #tpu.memory_space<vmem>>, %arg3: memref<1x216x1xf32, #tpu.memory_space<vmem>>, %arg4: memref<1x216x1xf32, #tpu.memory_space<vmem>>, %arg5: memref<1x216x784xf32, #tpu.memory_space<vmem>>, %arg6: memref<1x216x784xf32, #tpu.memory_space<vmem>>) attributes {dimension_semantics = [#tpu.dimension_semantics<arbitrary>], iteration_bounds = array<i64: 1>, scalar_prefetch = 0 : i64, scratch_operands = 1 : i64, tpu.core_type = #tpu.core_type<tc>, window_params = [{pipeline_mode = #tpu.pipeline_mode<synchronous>, transform_indices = @transform_0, window_bounds = array<i64: 1, 216, 784>}, {pipeline_mode = #tpu.pipeline_mode<synchronous>, transform_indices = @transform_1, window_bounds = array<i64: 216, 216>}, {pipeline_mode = #tpu.pipeline_mode<synchronous>, transform_indices = @transform_2, window_bounds = array<i64: 1, 216, 1>}, {pipeline_mode = #tpu.pipeline_mode<synchronous>, transform_indices = @transform_3, window_bounds = array<i64: 1, 216, 1>}, {pipeline_mode = #tpu.pipeline_mode<synchronous>, transform_indices = @transform_4, window_bounds = array<i64: 1, 216, 784>}]} {
    %c0 = arith.constant 0 : index
    %c0_0 = arith.constant 0 : index
    %0 = vector.load %arg2[%c0, %c0_0] : memref<216x216xf32, #tpu.memory_space<vmem>>, vector<216x216xf32>
    %c0_1 = arith.constant 0 : index
    %c0_2 = arith.constant 0 : index
    %c0_3 = arith.constant 0 : index
    %1 = vector.load %arg1[%c0_1, %c0_2, %c0_3] : memref<1x216x784xf32, #tpu.memory_space<vmem>>, vector<1x216x784xf32>
    %2 = vector.shape_cast %1 : vector<1x216x784xf32> to vector<216x784xf32>
    %cst = arith.constant 0.000000e+00 : f32
    %3 = vector.broadcast %cst : f32 to vector<216x784xf32>
    %4 = arith.maximumf %2, %3 : vector<216x784xf32>
    %cst_4 = arith.constant dense<0.000000e+00> : vector<216x784xf32>
    %5 = tpu.matmul %0, %4, %cst_4 {dimension_numbers = #tpu.dot_dimension_numbers<[1], [0], [0], [1], [0, 0, 1, 1], [], []>} : vector<216x216xf32>, vector<216x784xf32>, vector<216x784xf32> -> vector<216x784xf32>
    %c0_5 = arith.constant 0 : index
    %c0_6 = arith.constant 0 : index
    %c0_7 = arith.constant 0 : index
    %6 = vector.load %arg6[%c0_5, %c0_6, %c0_7] : memref<1x216x784xf32, #tpu.memory_space<vmem>>, vector<1x216x784xf32>
    %7 = vector.shape_cast %6 : vector<1x216x784xf32> to vector<216x784xf32>
    %8 = vector.shape_cast %5 : vector<216x784xf32> to vector<1x216x784xf32>
    tpu.vector_store %arg6[%c0_5, %c0_6, %c0_7], %8 {strides = array<i32>} : memref<1x216x784xf32, #tpu.memory_space<vmem>>, vector<1x216x784xf32>,
    %c0_8 = arith.constant 0 : index
    %c0_9 = arith.constant 0 : index
    %c0_10 = arith.constant 0 : index
    %9 = vector.load %arg6[%c0_8, %c0_9, %c0_10] : memref<1x216x784xf32, #tpu.memory_space<vmem>>, vector<1x216x784xf32>
    %cst_11 = arith.constant dense<0.000000e+00> : vector<1x216xf32>
    %10 = vector.multi_reduction <add>, %9, %cst_11 [2] : vector<1x216x784xf32> to vector<1x216xf32>
    %11 = vector.shape_cast %10 : vector<1x216xf32> to vector<1x216x1xf32>
    %cst_12 = arith.constant dense<0.000000e+00> : vector<216x1xf32>
    %12 = vector.multi_reduction <add>, %11, %cst_12 [0] : vector<1x216x1xf32> to vector<216x1xf32>
    %13 = vector.shape_cast %12 : vector<216x1xf32> to vector<1x216x1xf32>
    %cst_13 = arith.constant 0.00127551018 : f32
    %14 = vector.broadcast %cst_13 : f32 to vector<1x216x1xf32>
    %15 = arith.mulf %13, %14 : vector<1x216x1xf32>
    %16 = vector.broadcast %15 : vector<1x216x1xf32> to vector<1x216x784xf32>
    %17 = arith.subf %9, %16 : vector<1x216x784xf32>
    %18 = arith.mulf %17, %17 : vector<1x216x784xf32>
    %cst_14 = arith.constant dense<0.000000e+00> : vector<1x216xf32>
    %19 = vector.multi_reduction <add>, %18, %cst_14 [2] : vector<1x216x784xf32> to vector<1x216xf32>
    %20 = vector.shape_cast %19 : vector<1x216xf32> to vector<1x216x1xf32>
    %cst_15 = arith.constant dense<0.000000e+00> : vector<216x1xf32>
    %21 = vector.multi_reduction <add>, %20, %cst_15 [0] : vector<1x216x1xf32> to vector<216x1xf32>
    %22 = vector.shape_cast %21 : vector<216x1xf32> to vector<1x216x1xf32>
    %cst_16 = arith.constant 0.00127551018 : f32
    %23 = vector.broadcast %cst_16 : f32 to vector<1x216x1xf32>
    %24 = arith.mulf %22, %23 : vector<1x216x1xf32>
    %c0_17 = arith.constant 0 : index
    %c0_18 = arith.constant 0 : index
    %c0_19 = arith.constant 0 : index
    %25 = vector.load %arg3[%c0_17, %c0_18, %c0_19] : memref<1x216x1xf32, #tpu.memory_space<vmem>>, vector<1x216x1xf32>
    %cst_20 = arith.constant 9.99999974E-6 : f32
    %26 = vector.broadcast %cst_20 : f32 to vector<1x216x1xf32>
    %27 = arith.addf %24, %26 : vector<1x216x1xf32>
    %28 = math.rsqrt %27 : vector<1x216x1xf32>
    %29 = arith.mulf %25, %28 : vector<1x216x1xf32>
    %30 = vector.broadcast %29 : vector<1x216x1xf32> to vector<1x216x784xf32>
    %31 = arith.mulf %17, %30 : vector<1x216x784xf32>
    %c0_21 = arith.constant 0 : index
    %c0_22 = arith.constant 0 : index
    %c0_23 = arith.constant 0 : index
    %32 = vector.load %arg4[%c0_21, %c0_22, %c0_23] : memref<1x216x1xf32, #tpu.memory_space<vmem>>, vector<1x216x1xf32>
    %33 = vector.broadcast %32 : vector<1x216x1xf32> to vector<1x216x784xf32>
    %34 = arith.addf %31, %33 : vector<1x216x784xf32>
    %c0_24 = arith.constant 0 : index
    %c0_25 = arith.constant 0 : index
    %c0_26 = arith.constant 0 : index
    %35 = vector.load %arg5[%c0_24, %c0_25, %c0_26] : memref<1x216x784xf32, #tpu.memory_space<vmem>>, vector<1x216x784xf32>
    tpu.vector_store %arg5[%c0_24, %c0_25, %c0_26], %34 {strides = array<i32>} : memref<1x216x784xf32, #tpu.memory_space<vmem>>, vector<1x216x784xf32>,
    return
  }
  func.func @transform_0(%arg0: i32) -> (i32, i32, i32) {
    %c0_i32 = arith.constant 0 : i32
    %c0_i32_0 = arith.constant 0 : i32
    %c0_i32_1 = arith.constant 0 : i32
    %c0_i32_2 = arith.constant 0 : i32
    return %c0_i32, %c0_i32_0, %c0_i32_1 : i32, i32, i32
  }
  func.func @transform_1(%arg0: i32) -> (i32, i32) {
    %c0_i32 = arith.constant 0 : i32
    %c0_i32_0 = arith.constant 0 : i32
    %c0_i32_1 = arith.constant 0 : i32
    return %c0_i32, %c0_i32_0 : i32, i32
  }
  func.func @transform_2(%arg0: i32) -> (i32, i32, i32) {
    %c0_i32 = arith.constant 0 : i32
    %c0_i32_0 = arith.constant 0 : i32
    %c0_i32_1 = arith.constant 0 : i32
    %c0_i32_2 = arith.constant 0 : i32
    return %c0_i32, %c0_i32_0, %c0_i32_1 : i32, i32, i32
  }
  func.func @transform_3(%arg0: i32) -> (i32, i32, i32) {
    %c0_i32 = arith.constant 0 : i32
    %c0_i32_0 = arith.constant 0 : i32
    %c0_i32_1 = arith.constant 0 : i32
    %c0_i32_2 = arith.constant 0 : i32
    return %c0_i32, %c0_i32_0, %c0_i32_1 : i32, i32, i32
  }
  func.func @transform_4(%arg0: i32) -> (i32, i32, i32) {
    %c0_i32 = arith.constant 0 : i32
    %c0_i32_0 = arith.constant 0 : i32
    %c0_i32_1 = arith.constant 0 : i32
    %c0_i32_2 = arith.constant 0 : i32
    return %c0_i32, %c0_i32_0, %c0_i32_1 : i32, i32, i32
  }
}

</mosaic_0001>

<bundles_post_ra>
// kernel: model_forward.1
= control target key start
LH: loop header
LB: loop body
LE: loop exit
PB: predicated region body
PF: predicated region fallthrough
CT: control target
= control target key end

     0   :  { %vm449_vm0 = vcmask 719872   ;;  %vm1418_vm1 = vcmask 130048   ;;  %s7833_s0 = inlined_call_operand.vmem [shape: f32[1,216,784], index: 0, kind: input, shape index: {}]   ;;  %s7834_s1 = inlined_call_operand.vmem [shape: f32[216,216], index: 1, kind: input, shape index: {}]   ;;  %s7835_s3 = inlined_call_operand.vmem [shape: f32[1,216,1], index: 3, kind: input, shape index: {}]   ;;  %s7836_s2 = inlined_call_operand.vmem [shape: f32[1,216,1], index: 2, kind: input, shape index: {}]   ;;  %s7837_s4 = inlined_call_operand.vmem [shape: f32[1,216,784], index: 4, kind: output, shape index: {}]  }
   0x1   :  { %v72_v0 = vld [vmem:[%s7833_s0 + $0x8] sm:$0xff]  ;;  %v79_v1 = vld [vmem:[%s7833_s0 + $0x40] sm:$0xff]  ;;  %v78_v5 = vld [vmem:[%s7833_s0 + $0x38] sm:$0xff] }
   0x2   :  { %v71_v2 = vld [vmem:[%s7833_s0] sm:$0xff]  ;;  %v261_v3 = vmax.f32 %v72_v0, 0.0  ;;  %v268_v4 = vmax.f32 %v79_v1, 0.0  ;;  %v74_v7 = vld [vmem:[%s7833_s0 + $0x18] sm:$0xff]  ;;  %v81_v8 = vld [vmem:[%s7833_s0 + $0x50] sm:$0xff]  ;;  %v267_v9 = vmax.f32 %v78_v5, 0.0 }
   0x3   :  { %v260_v6 = vmax.f32 %v71_v2, 0.0  ;;  %v263_v10 = vmax.f32 %v74_v7, 0.0  ;;  %v270_v11 = vmax.f32 %v81_v8, 0.0  ;;  %v86_v12 = vld [vmem:[%s7833_s0 + $0x78] sm:$0xff]  ;;  %v93_v13 = vld [vmem:[%s7833_s0 + $0xb0] sm:$0xff]  ;;  %v80_v18 = vld [vmem:[%s7833_s0 + $0x48] sm:$0xff] }
   0x4   :  { %v73_v14 = vld [vmem:[%s7833_s0 + $0x10] sm:$0xff]  ;;  %v3847_v15 = vpack.c.bf16 %v268_v4, %v261_v3  ;;  %v275_v16 = vmax.f32 %v86_v12, 0.0  ;;  %v282_v17 = vmax.f32 %v93_v13, 0.0  ;;  %v92_v21 = vld [vmem:[%s7833_s0 + $0xa8] sm:$0xff]  ;;  %v269_v24 = vmax.f32 %v80_v18, 0.0  ;;  %v95_v27 = vld [vmem:[%s7833_s0 + $0xc0] sm:$0xff] }
   0x5   :  { %v262_v19 = vmax.f32 %v73_v14, 0.0  ;;  %v85_v20 = vld [vmem:[%s7833_s0 + $0x70] sm:$0xff]  ;;  %v3849_v22 = vpack.c.bf16 %v267_v9, %v260_v6  ;;  %v3899_v23 = vpack.c.bf16 %v270_v11, %v263_v10  ;;  %v88_v26 = vld [vmem:[%s7833_s0 + $0x88] sm:$0xff]  ;;  %v281_v30 = vmax.f32 %v92_v21, 0.0  ;;  %v107_v33 = vld [vmem:[%s7833_s0 + $0x120] sm:$0xff] }
   0x6   :  { %v274_v25 = vmax.f32 %v85_v20, 0.0  ;;  %v100_v28 = vld [vmem:[%s7833_s0 + $0xe8] sm:$0xff]  ;;  %3848 = vmatprep.subr.bf16.mxu0 %v3847_v15  ;;  %v3851_v29 = vpack.c.bf16 %v282_v17, %v275_v16  ;;  %v277_v31 = vmax.f32 %v88_v26, 0.0  ;;  %v284_v32 = vmax.f32 %v95_v27, 0.0  ;;  %v87_v34 = vld [vmem:[%s7833_s0 + $0x80] sm:$0xff]  ;;  %v94_v35 = vld [vmem:[%s7833_s0 + $0xb8] sm:$0xff] }
   0x7   :  { %3850 = vmatpush1.bf16.msra.mxu0 %v3849_v22  ;;  %3900 = vmatprep.subr.bf16.mxu1 %v3899_v23  ;;  %v3901_v36 = vpack.c.bf16 %v269_v24, %v262_v19  ;;  %v289_v37 = vmax.f32 %v100_v28, 0.0  ;;  %v296_v38 = vmax.f32 %v107_v33, 0.0  ;;  %v276_v39 = vmax.f32 %v87_v34, 0.0  ;;  %v99_v40 = vld [vmem:[%s7833_s0 + $0xe0] sm:$0xff]  ;;  %v106_v41 = vld [vmem:[%s7833_s0 + $0x118] sm:$0xff]  ;;  %v109_v47 = vld [vmem:[%s7833_s0 + $0x130] sm:$0xff] }
   0x8   :  { %v102_v42 = vld [vmem:[%s7833_s0 + $0xf8] sm:$0xff]  ;;  %3852 = vmatprep.subr.bf16.mxu0 %v3851_v29  ;;  %v3853_v43 = vpack.c.bf16 %v281_v30, %v274_v25  ;;  %v3903_v44 = vpack.c.bf16 %v284_v32, %v277_v31  ;;  %v283_v45 = vmax.f32 %v94_v35, 0.0  ;;  %v288_v46 = vmax.f32 %v99_v40, 0.0  ;;  %v121_v49 = vld [vmem:[%s7833_s0 + $0x190] sm:$0xff]  ;;  %v108_v55 = vld [vmem:[%s7833_s0 + $0x128] sm:$0xff] }
   0x9   :  { %v114_v48 = vld [vmem:[%s7833_s0 + $0x158] sm:$0xff]  ;;  %3902 = vmatpush1.bf16.msra.mxu1 %v3901_v36  ;;  %v3855_v50 = vpack.c.bf16 %v296_v38, %v289_v37  ;;  %v295_v51 = vmax.f32 %v106_v41, 0.0  ;;  %v291_v52 = vmax.f32 %v102_v42, 0.0  ;;  %v298_v53 = vmax.f32 %v109_v47, 0.0  ;;  %v101_v54 = vld [vmem:[%s7833_s0 + $0xf0] sm:$0xff]  ;;  %v120_v61 = vld [vmem:[%s7833_s0 + $0x188] sm:$0xff] }
   0xa   :  { %v113_v56 = vld [vmem:[%s7833_s0 + $0x150] sm:$0xff]  ;;  %3904 = vmatprep.subr.bf16.mxu1 %v3903_v44  ;;  %v3905_v57 = vpack.c.bf16 %v283_v45, %v276_v39  ;;  %v303_v58 = vmax.f32 %v114_v48, 0.0  ;;  %v310_v59 = vmax.f32 %v121_v49, 0.0  ;;  %v290_v60 = vmax.f32 %v101_v54, 0.0  ;;  %v116_v62 = vld [vmem:[%s7833_s0 + $0x168] sm:$0xff]  ;;  %v123_v63 = vld [vmem:[%s7833_s0 + $0x1a0] sm:$0xff] }
   0xb   :  { %3854 = vmatpush1.bf16.msra.mxu0 %v3853_v43  ;;  %v3857_v0 = vpack.c.bf16 %v295_v51, %v288_v46  ;;  %v3907_v1 = vpack.c.bf16 %v298_v53, %v291_v52  ;;  %v297_v2 = vmax.f32 %v108_v55, 0.0  ;;  %v302_v3 = vmax.f32 %v113_v56, 0.0  ;;  %v128_v4 = vld [vmem:[%s7833_s0 + $0x1c8] sm:$0xff]  ;;  %v135_v5 = vld [vmem:[%s7833_s0 + $0x200] sm:$0xff]  ;;  %v122_v11 = vld [vmem:[%s7833_s0 + $0x198] sm:$0xff] }
   0xc   :  { %v115_v6 = vld [vmem:[%s7833_s0 + $0x160] sm:$0xff]  ;;  %3856 = vmatprep.subr.bf16.mxu0 %v3855_v50  ;;  %v3859_v7 = vpack.c.bf16 %v310_v59, %v303_v58  ;;  %v309_v8 = vmax.f32 %v120_v61, 0.0  ;;  %v305_v9 = vmax.f32 %v116_v62, 0.0  ;;  %v312_v10 = vmax.f32 %v123_v63, 0.0  ;;  %v134_v13 = vld [vmem:[%s7833_s0 + $0x1f8] sm:$0xff]  ;;  %v137_v19 = vld [vmem:[%s7833_s0 + $0x210] sm:$0xff] }
   0xd   :  { %v127_v12 = vld [vmem:[%s7833_s0 + $0x1c0] sm:$0xff]  ;;  %3906 = vmatpush1.bf16.msra.mxu1 %v3905_v57  ;;  %v3909_v14 = vpack.c.bf16 %v297_v2, %v290_v60  ;;  %v317_v15 = vmax.f32 %v128_v4, 0.0  ;;  %v324_v16 = vmax.f32 %v135_v5, 0.0  ;;  %v304_v17 = vmax.f32 %v115_v6, 0.0  ;;  %v130_v18 = vld [vmem:[%s7833_s0 + $0x1d8] sm:$0xff]  ;;  %v149_v24 = vld [vmem:[%s7833_s0 + $0x270] sm:$0xff] }
   0xe   :  { %v142_v20 = vld [vmem:[%s7833_s0 + $0x238] sm:$0xff]  ;;  %3908 = vmatprep.subr.bf16.mxu1 %v3907_v1  ;;  %v3861_v21 = vpack.c.bf16 %v309_v8, %v302_v3  ;;  %v3911_v22 = vpack.c.bf16 %v312_v10, %v305_v9  ;;  %v311_v23 = vmax.f32 %v122_v11, 0.0  ;;  %v129_v25 = vld [vmem:[%s7833_s0 + $0x1d0] sm:$0xff]  ;;  %v136_v26 = vld [vmem:[%s7833_s0 + $0x208] sm:$0xff]  ;;  %v316_v27 = vmax.f32 %v127_v12, 0.0 }
   0xf   :  { %3858 = vmatpush1.bf16.msra.mxu0 %v3857_v0  ;;  %v323_v28 = vmax.f32 %v134_v13, 0.0  ;;  %v319_v29 = vmax.f32 %v130_v18, 0.0  ;;  %v326_v30 = vmax.f32 %v137_v19, 0.0  ;;  %v144_v31 = vld [vmem:[%s7833_s0 + $0x248] sm:$0xff]  ;;  %v3863_v32 = vpack.c.bf16 %v324_v16, %v317_v15  ;;  %v141_v35 = vld [vmem:[%s7833_s0 + $0x230] sm:$0xff]  ;;  %v151_v37 = vld [vmem:[%s7833_s0 + $0x280] sm:$0xff] }
  0x10   :  { %3860 = vmatprep.subr.bf16.mxu0 %v3859_v7  ;;  %v331_v33 = vmax.f32 %v142_v20, 0.0  ;;  %v338_v34 = vmax.f32 %v149_v24, 0.0  ;;  %v148_v36 = vld [vmem:[%s7833_s0 + $0x268] sm:$0xff]  ;;  %v3913_v38 = vpack.c.bf16 %v311_v23, %v304_v17  ;;  %v318_v39 = vmax.f32 %v129_v25, 0.0  ;;  %v163_v42 = vld [vmem:[%s7833_s0 + $0x2e0] sm:$0xff]  ;;  %v150_v47 = vld [vmem:[%s7833_s0 + $0x278] sm:$0xff] }
  0x11   :  { %3910 = vmatpush1.bf16.msra.mxu1 %v3909_v14  ;;  %v325_v40 = vmax.f32 %v136_v26, 0.0  ;;  %v156_v41 = vld [vmem:[%s7833_s0 + $0x2a8] sm:$0xff]  ;;  %v3915_v43 = vpack.c.bf16 %v326_v30, %v319_v29  ;;  %v333_v44 = vmax.f32 %v144_v31, 0.0  ;;  %v340_v45 = vmax.f32 %v151_v37, 0.0  ;;  %v143_v46 = vld [vmem:[%s7833_s0 + $0x240] sm:$0xff]  ;;  %v158_v51 = vld [vmem:[%s7833_s0 + $0x2b8] sm:$0xff] }
  0x12   :  { %3912 = vmatprep.subr.bf16.mxu1 %v3911_v22  ;;  %v3865_v48 = vpack.c.bf16 %v323_v28, %v316_v27  ;;  %v330_v49 = vmax.f32 %v141_v35, 0.0  ;;  %v337_v50 = vmax.f32 %v148_v36, 0.0  ;;  %v165_v52 = vld [vmem:[%s7833_s0 + $0x2f0] sm:$0xff]  ;;  %v3867_v53 = vpack.c.bf16 %v338_v34, %v331_v33  ;;  %v155_v56 = vld [vmem:[%s7833_s0 + $0x2a0] sm:$0xff]  ;;  %v162_v57 = vld [vmem:[%s7833_s0 + $0x2d8] sm:$0xff] }
  0x13   :  { %3862 = vmatpush1.bf16.msra.mxu0 %v3861_v21  ;;  %v345_v54 = vmax.f32 %v156_v41, 0.0  ;;  %v352_v55 = vmax.f32 %v163_v42, 0.0  ;;  %v3917_v58 = vpack.c.bf16 %v325_v40, %v318_v39  ;;  %v332_v59 = vmax.f32 %v143_v46, 0.0  ;;  %v170_v61 = vld [vmem:[%s7833_s0 + $0x318] sm:$0xff]  ;;  %v177_v62 = vld [vmem:[%s7833_s0 + $0x350] sm:$0xff]  ;;  %v164_v3 = vld [vmem:[%s7833_s0 + $0x2e8] sm:$0xff] }
  0x14   :  { %3864 = vmatprep.subr.bf16.mxu0 %v3863_v32  ;;  %v339_v60 = vmax.f32 %v150_v47, 0.0  ;;  %v3919_v63 = vpack.c.bf16 %v340_v45, %v333_v44  ;;  %v347_v0 = vmax.f32 %v158_v51, 0.0  ;;  %v354_v1 = vmax.f32 %v165_v52, 0.0  ;;  %v157_v2 = vld [vmem:[%s7833_s0 + $0x2b0] sm:$0xff]  ;;  %v172_v7 = vld [vmem:[%s7833_s0 + $0x328] sm:$0xff]  ;;  %v179_v8 = vld [vmem:[%s7833_s0 + $0x360] sm:$0xff] }
  0x15   :  { %3914 = vmatpush1.bf16.msra.mxu1 %v3913_v38  ;;  %v3869_v4 = vpack.c.bf16 %v337_v50, %v330_v49  ;;  %v344_v5 = vmax.f32 %v155_v56, 0.0  ;;  %v351_v6 = vmax.f32 %v162_v57, 0.0  ;;  %v3871_v9 = vpack.c.bf16 %v352_v55, %v345_v54  ;;  %v169_v12 = vld [vmem:[%s7833_s0 + $0x310] sm:$0xff]  ;;  %v176_v13 = vld [vmem:[%s7833_s0 + $0x348] sm:$0xff]  ;;  %v191_v18 = vld [vmem:[%s7833_s0 + $0x3c0] sm:$0xff] }
  0x16   :  { %3916 = vmatprep.subr.bf16.mxu1 %v3915_v43  ;;  %v359_v10 = vmax.f32 %v170_v61, 0.0  ;;  %v366_v11 = vmax.f32 %v177_v62, 0.0  ;;  %v3921_v14 = vpack.c.bf16 %v339_v60, %v332_v59  ;;  %v346_v15 = vmax.f32 %v157_v2, 0.0  ;;  %v184_v17 = vld [vmem:[%s7833_s0 + $0x388] sm:$0xff]  ;;  %v171_v22 = vld [vmem:[%s7833_s0 + $0x320] sm:$0xff]  ;;  %v178_v23 = vld [vmem:[%s7833_s0 + $0x358] sm:$0xff] }
  0x17   :  { %3866 = vmatpush1.bf16.msra.mxu0 %v3865_v48  ;;  %v353_v16 = vmax.f32 %v164_v3, 0.0  ;;  %v3923_v19 = vpack.c.bf16 %v354_v1, %v347_v0  ;;  %v361_v20 = vmax.f32 %v172_v7, 0.0  ;;  %v368_v21 = vmax.f32 %v179_v8, 0.0  ;;  %v186_v27 = vld [vmem:[%s7833_s0 + $0x398] sm:$0xff]  ;;  %v193_v28 = vld [vmem:[%s7833_s0 + $0x3d0] sm:$0xff]  ;;  %v183_v32 = vld [vmem:[%s7833_s0 + $0x380] sm:$0xff] }
  0x18   :  { %3868 = vmatprep.subr.bf16.mxu0 %v3867_v53  ;;  %v3873_v24 = vpack.c.bf16 %v351_v6, %v344_v5  ;;  %v358_v25 = vmax.f32 %v169_v12, 0.0  ;;  %v365_v26 = vmax.f32 %v176_v13, 0.0  ;;  %v3875_v29 = vpack.c.bf16 %v366_v11, %v359_v10  ;;  %v190_v33 = vld [vmem:[%s7833_s0 + $0x3b8] sm:$0xff]  ;;  %v205_v38 = vld [vmem:[%s7833_s0 + $0x430] sm:$0xff]  ;;  %v192_v43 = vld [vmem:[%s7833_s0 + $0x3c8] sm:$0xff] }
  0x19   :  { %3918 = vmatpush1.bf16.msra.mxu1 %v3917_v58  ;;  %v373_v30 = vmax.f32 %v184_v17, 0.0  ;;  %v380_v31 = vmax.f32 %v191_v18, 0.0  ;;  %v3925_v34 = vpack.c.bf16 %v353_v16, %v346_v15  ;;  %v360_v35 = vmax.f32 %v171_v22, 0.0  ;;  %v198_v37 = vld [vmem:[%s7833_s0 + $0x3f8] sm:$0xff]  ;;  %v185_v42 = vld [vmem:[%s7833_s0 + $0x390] sm:$0xff]  ;;  %v200_v47 = vld [vmem:[%s7833_s0 + $0x408] sm:$0xff] }
  0x1a   :  { %3920 = vmatprep.subr.bf16.mxu1 %v3919_v63  ;;  %v367_v36 = vmax.f32 %v178_v23, 0.0  ;;  %v3927_v39 = vpack.c.bf16 %v368_v21, %v361_v20  ;;  %v375_v40 = vmax.f32 %v186_v27, 0.0  ;;  %v382_v41 = vmax.f32 %v193_v28, 0.0  ;;  %v207_v48 = vld [vmem:[%s7833_s0 + $0x440] sm:$0xff]  ;;  %v197_v52 = vld [vmem:[%s7833_s0 + $0x3f0] sm:$0xff]  ;;  %v204_v53 = vld [vmem:[%s7833_s0 + $0x428] sm:$0xff] }
  0x1b   :  { %3870 = vmatpush1.bf16.msra.mxu0 %v3869_v4  ;;  %v3877_v44 = vpack.c.bf16 %v365_v26, %v358_v25  ;;  %v372_v45 = vmax.f32 %v183_v32, 0.0  ;;  %v379_v46 = vmax.f32 %v190_v33, 0.0  ;;  %v3879_v49 = vpack.c.bf16 %v380_v31, %v373_v30  ;;  %v212_v57 = vld [vmem:[%s7833_s0 + $0x468] sm:$0xff]  ;;  %v219_v58 = vld [vmem:[%s7833_s0 + $0x4a0] sm:$0xff]  ;;  %v206_v63 = vld [vmem:[%s7833_s0 + $0x438] sm:$0xff] }
  0x1c   :  { %3872 = vmatprep.subr.bf16.mxu0 %v3871_v9  ;;  %v387_v50 = vmax.f32 %v198_v37, 0.0  ;;  %v394_v51 = vmax.f32 %v205_v38, 0.0  ;;  %v3929_v54 = vpack.c.bf16 %v367_v36, %v360_v35  ;;  %v374_v55 = vmax.f32 %v185_v42, 0.0  ;;  %v199_v62 = vld [vmem:[%s7833_s0 + $0x400] sm:$0xff]  ;;  %v214_v3 = vld [vmem:[%s7833_s0 + $0x478] sm:$0xff]  ;;  %v221_v4 = vld [vmem:[%s7833_s0 + $0x4b0] sm:$0xff] }
  0x1d   :  { %3922 = vmatpush1.bf16.msra.mxu1 %v3921_v14  ;;  %v381_v56 = vmax.f32 %v192_v43, 0.0  ;;  %v3931_v59 = vpack.c.bf16 %v382_v41, %v375_v40  ;;  %v389_v60 = vmax.f32 %v200_v47, 0.0  ;;  %v396_v61 = vmax.f32 %v207_v48, 0.0  ;;  %v211_v8 = vld [vmem:[%s7833_s0 + $0x460] sm:$0xff]  ;;  %v218_v9 = vld [vmem:[%s7833_s0 + $0x498] sm:$0xff]  ;;  %v4558_v10 = vld [vmem:[%s7834_s1 + $0x8] sm:$0xff] }
  0x1e   :  { %3924 = vmatprep.subr.bf16.mxu1 %v3923_v19  ;;  %v3881_v0 = vpack.c.bf16 %v379_v46, %v372_v45  ;;  %v386_v1 = vmax.f32 %v197_v52, 0.0  ;;  %v393_v2 = vmax.f32 %v204_v53, 0.0  ;;  %v3883_v5 = vpack.c.bf16 %v394_v51, %v387_v50  ;;  %v226_v14 = vld [vmem:[%s7833_s0 + $0x4d8] sm:$0xff]  ;;  %v233_v15 = vld [vmem:[%s7833_s0 + $0x510] sm:$0xff]  ;;  %3739 = vmatprep.mubr.msk.f32.mxu0 %vm449_vm0, %v4558_v10  ;;  %v220_v20 = vld [vmem:[%s7833_s0 + $0x4a8] sm:$0xff] }
  0x1f   :  { %3874 = vmatpush1.bf16.msra.mxu0 %v3873_v24  ;;  %v401_v6 = vmax.f32 %v212_v57, 0.0  ;;  %v408_v7 = vmax.f32 %v219_v58, 0.0  ;;  %v3933_v11 = vpack.c.bf16 %v381_v56, %v374_v55  ;;  %v388_v12 = vmax.f32 %v199_v62, 0.0  ;;  %v213_v19 = vld [vmem:[%s7833_s0 + $0x470] sm:$0xff]  ;;  %3766 = vmatprep.mubr.msk.f32.mxu1 %vm449_vm0, %v4558_v10  ;;  %v228_v24 = vld [vmem:[%s7833_s0 + $0x4e8] sm:$0xff]  ;;  %v235_v25 = vld [vmem:[%s7833_s0 + $0x520] sm:$0xff] }
  0x20   :  { %3876 = vmatprep.subr.bf16.mxu0 %v3875_v29  ;;  %v395_v13 = vmax.f32 %v206_v63, 0.0  ;;  %v3935_v16 = vpack.c.bf16 %v396_v61, %v389_v60  ;;  %v403_v17 = vmax.f32 %v214_v3, 0.0  ;;  %v410_v18 = vmax.f32 %v221_v4, 0.0  ;;  %v225_v29 = vld [vmem:[%s7833_s0 + $0x4d0] sm:$0xff]  ;;  %v232_v30 = vld [vmem:[%s7833_s0 + $0x508] sm:$0xff]  ;;  %v247_v35 = vld [vmem:[%s7833_s0 + $0x580] sm:$0xff] }
  0x21   :  { %3926 = vmatpush1.bf16.msra.mxu1 %v3925_v34  ;;  %v3885_v21 = vpack.c.bf16 %v393_v2, %v386_v1  ;;  %v400_v22 = vmax.f32 %v211_v8, 0.0  ;;  %v407_v23 = vmax.f32 %v218_v9, 0.0  ;;  %v3887_v26 = vpack.c.bf16 %v408_v7, %v401_v6  ;;  %v240_v34 = vld [vmem:[%s7833_s0 + $0x548] sm:$0xff]  ;;  %v234_v40 = vld [vmem:[%s7833_s0 + $0x518] sm:$0xff]  ;;  %v249_v45 = vld [vmem:[%s7833_s0 + $0x590] sm:$0xff] }
  0x22   :  { %3928 = vmatprep.subr.bf16.mxu1 %v3927_v39  ;;  %v415_v27 = vmax.f32 %v226_v14, 0.0  ;;  %v422_v28 = vmax.f32 %v233_v15, 0.0  ;;  %v3937_v31 = vpack.c.bf16 %v395_v13, %v388_v12  ;;  %v402_v32 = vmax.f32 %v213_v19, 0.0  ;;  %v227_v39 = vld [vmem:[%s7833_s0 + $0x4e0] sm:$0xff]  ;;  %v246_v50 = vld [vmem:[%s7833_s0 + $0x578] sm:$0xff]  ;;  %v241_v57 = vld [vmem:[%s7833_s0 + $0x550] sm:$0xff] }
  0x23   :  { %3878 = vmatpush1.bf16.msra.mxu0 %v3877_v44  ;;  %v409_v33 = vmax.f32 %v220_v20, 0.0  ;;  %v3939_v36 = vpack.c.bf16 %v410_v18, %v403_v17  ;;  %v417_v37 = vmax.f32 %v228_v24, 0.0  ;;  %v424_v38 = vmax.f32 %v235_v25, 0.0  ;;  %v242_v44 = vld [vmem:[%s7833_s0 + $0x558] sm:$0xff]  ;;  %v248_v58 = vld [vmem:[%s7833_s0 + $0x588] sm:$0xff]  ;;  %v83_v4 = vld [vmem:[%s7833_s0 + $0x60] sm:$0xff] }
  0x24   :  { %3880 = vmatprep.subr.bf16.mxu0 %v3879_v49  ;;  %v3889_v41 = vpack.c.bf16 %v407_v23, %v400_v22  ;;  %v414_v42 = vmax.f32 %v225_v29, 0.0  ;;  %v421_v43 = vmax.f32 %v232_v30, 0.0  ;;  %v3891_v46 = vpack.c.bf16 %v422_v28, %v415_v27  ;;  %v239_v49 = vld [vmem:[%s7833_s0 + $0x540] sm:$0xff]  ;;  %v76_v3 = vld [vmem:[%s7833_s0 + $0x28] sm:$0xff]  ;;  %v82_v7 = vld [vmem:[%s7833_s0 + $0x58] sm:$0xff] }
  0x25   :  { %3930 = vmatpush1.bf16.msra.mxu1 %v3929_v54  ;;  %v429_v47 = vmax.f32 %v240_v34, 0.0  ;;  %v436_v48 = vmax.f32 %v247_v35, 0.0  ;;  %v3941_v51 = vpack.c.bf16 %v409_v33, %v402_v32  ;;  %v416_v52 = vmax.f32 %v227_v39, 0.0  ;;  %v75_v6 = vld [vmem:[%s7833_s0 + $0x20] sm:$0xff]  ;;  %v256_v9 = vld [vmem:[%s7833_s0 + $0x5c8] sm:$0xff]  ;;  %v253_v12 = vld [vmem:[%s7833_s0 + $0x5b0] sm:$0xff] }
  0x26   :  { %3932 = vmatprep.subr.bf16.mxu1 %v3931_v59  ;;  %v423_v53 = vmax.f32 %v234_v40, 0.0  ;;  %v3943_v54 = vpack.c.bf16 %v424_v38, %v417_v37  ;;  %v431_v55 = vmax.f32 %v242_v44, 0.0  ;;  %v438_v56 = vmax.f32 %v249_v45, 0.0  ;;  %v77_v18 = vld [vmem:[%s7833_s0 + $0x30] sm:$0xff]  ;;  %v84_v19 = vld [vmem:[%s7833_s0 + $0x68] sm:$0xff]  ;;  %v90_v22 = vld [vmem:[%s7833_s0 + $0x98] sm:$0xff] }
  0x27   :  { %3882 = vmatpush1.bf16.msra.mxu0 %v3881_v0  ;;  %v3893_v59 = vpack.c.bf16 %v421_v43, %v414_v42  ;;  %v428_v60 = vmax.f32 %v239_v49, 0.0  ;;  %v435_v61 = vmax.f32 %v246_v50, 0.0  ;;  %v3895_v62 = vpack.c.bf16 %v436_v48, %v429_v47  ;;  %v254_v0 = vld [vmem:[%s7833_s0 + $0x5b8] sm:$0xff]  ;;  %v97_v23 = vld [vmem:[%s7833_s0 + $0xd0] sm:$0xff]  ;;  %v4663_v30 = vld [vmem:[%s7834_s1] sm:$0xff] }
  0x28   :  { %3884 = vmatprep.subr.bf16.mxu0 %v3883_v5  ;;  %v3945_v63 = vpack.c.bf16 %v423_v53, %v416_v52  ;;  %v430_v1 = vmax.f32 %v241_v57, 0.0  ;;  %v437_v2 = vmax.f32 %v248_v58, 0.0  ;;  %v3947_v5 = vpack.c.bf16 %v438_v56, %v431_v55  ;;  %v89_v25 = vld [vmem:[%s7833_s0 + $0x90] sm:$0xff]  ;;  %v91_v35 = vld [vmem:[%s7833_s0 + $0xa0] sm:$0xff]  ;;  %v104_v39 = vld [vmem:[%s7833_s0 + $0x108] sm:$0xff] }
  0x29   :  { %3934 = vmatpush1.bf16.msra.mxu1 %v3933_v11  ;;  %v3897_v8 = vpack.c.bf16 %v435_v61, %v428_v60  ;;  %v443_v11 = vmax.f32 %v254_v0, 0.0  ;;  %v265_v13 = vmax.f32 %v76_v3, 0.0  ;;  %v272_v14 = vmax.f32 %v83_v4, 0.0  ;;  %v111_v40 = vld [vmem:[%s7833_s0 + $0x140] sm:$0xff]  ;;  %v110_v43 = vld [vmem:[%s7833_s0 + $0x138] sm:$0xff]  ;;  %v4692_v47 = vld [vmem:[%s7834_s1 + $0x10] sm:$0xff] }
  0x2a   :  { %3936 = vmatprep.subr.bf16.mxu1 %v3935_v16  ;;  %v3949_v15 = vpack.c.bf16 %v437_v2, %v430_v1  ;;  %v264_v16 = vmax.f32 %v75_v6, 0.0  ;;  %v271_v17 = vmax.f32 %v82_v7, 0.0  ;;  %v445_v20 = vmax.f32 %v256_v9, 0.0  ;;  %v103_v42 = vld [vmem:[%s7833_s0 + $0x100] sm:$0xff]  ;;  %v112_v52 = vld [vmem:[%s7833_s0 + $0x148] sm:$0xff]  ;;  %v118_v57 = vld [vmem:[%s7833_s0 + $0x178] sm:$0xff] }
  0x2b   :  { %3886 = vmatpush1.bf16.msra.mxu0 %v3885_v21  ;;  %v255_v21 = vld [vmem:[%s7833_s0 + $0x5c0] sm:$0xff]  ;;  %v442_v24 = vmax.f32 %v253_v12, 0.0  ;;  %v3951_v27 = vpack.c.bf16 %v272_v14, %v265_v13  ;;  %v266_v28 = vmax.f32 %v77_v18, 0.0  ;;  %v273_v29 = vmax.f32 %v84_v19, 0.0  ;;  %v4706_v53 = vld [vmem:[%s7834_s1 + $0x28] sm:$0xff]  ;;  %v125_v58 = vld [vmem:[%s7833_s0 + $0x1b0] sm:$0xff] }
  0x2c   :  { %3888 = vmatprep.subr.bf16.mxu0 %v3887_v26  ;;  %v96_v26 = vld [vmem:[%s7833_s0 + $0xc8] sm:$0xff]  ;;  %v444_v32 = vmax.f32 %v255_v21, 0.0  ;;  %v279_v33 = vmax.f32 %v90_v22, 0.0  ;;  %v286_v34 = vmax.f32 %v97_v23, 0.0  ;;  %v278_v37 = vmax.f32 %v89_v25, 0.0  ;;  %v117_v60 = vld [vmem:[%s7833_s0 + $0x170] sm:$0xff] }
  0x2d   :  { %3938 = vmatpush1.bf16.msra.mxu1 %v3937_v31  ;;  %v3953_v31 = vpack.c.bf16 %v271_v17, %v264_v16  ;;  %v285_v38 = vmax.f32 %v96_v26, 0.0  ;;  %v4004_v44 = vpack.c.bf16 %v273_v29, %v266_v28  ;;  %v280_v45 = vmax.f32 %v91_v35, 0.0  ;;  %v124_v61 = vld [vmem:[%s7833_s0 + $0x1a8] sm:$0xff]  ;;  %v4729_v1 = vld [vmem:[%s7834_s1 + $0x20] sm:$0xff]  ;;  %v126_v6 = vld [vmem:[%s7833_s0 + $0x1b8] sm:$0xff] }
  0x2e   :  { %3940 = vmatprep.subr.bf16.mxu1 %v3939_v36  ;;  %v98_v36 = vld [vmem:[%s7833_s0 + $0xd8] sm:$0xff]  ;;  %v3955_v48 = vpack.c.bf16 %v286_v34, %v279_v33  ;;  %v293_v49 = vmax.f32 %v104_v39, 0.0  ;;  %v300_v50 = vmax.f32 %v111_v40, 0.0  ;;  %v292_v55 = vmax.f32 %v103_v42, 0.0  ;;  %v132_v12 = vld [vmem:[%s7833_s0 + $0x1e8] sm:$0xff]  ;;  %v139_v13 = vld [vmem:[%s7833_s0 + $0x220] sm:$0xff] }
  0x2f   :  { %3890 = vmatpush1.bf16.msra.mxu0 %v3889_v41  ;;  %v4680_v41 = vld [vmem:[%s7834_s1 + $0x18] sm:$0xff]  ;;  %v299_v56 = vmax.f32 %v110_v43, 0.0  ;;  %v301_v0 = vmax.f32 %v112_v52, 0.0  ;;  %v307_v3 = vmax.f32 %v118_v57, 0.0  ;;  %v314_v4 = vmax.f32 %v125_v58, 0.0  ;;  %v131_v14 = vld [vmem:[%s7833_s0 + $0x1e0] sm:$0xff] }
  0x30   :  { %3892 = vmatprep.subr.bf16.mxu0 %v3891_v46  ;;  %v287_v46 = vmax.f32 %v98_v36, 0.0  ;;  %v3959_v2 = vpack.c.bf16 %v300_v50, %v293_v49  ;;  %v4741_v7 = vld [vmem:[%s7834_s1 + $0x38] sm:$0xff]  ;;  %v306_v9 = vmax.f32 %v117_v60, 0.0  ;;  %v315_v18 = vmax.f32 %v126_v6, 0.0  ;;  %v4764_v19 = vld [vmem:[%s7834_s1 + $0x30] sm:$0xff]  ;;  %v4776_v25 = vld [vmem:[%s7834_s1 + $0x48] sm:$0xff] }
  0x31   :  { %3942 = vmatpush1.bf16.msra.mxu1 %v3941_v51  ;;  %v105_v51 = vld [vmem:[%s7833_s0 + $0x110] sm:$0xff]  ;;  %v321_v21 = vmax.f32 %v132_v12, 0.0  ;;  %v328_v22 = vmax.f32 %v139_v13, 0.0  ;;  %v146_v29 = vld [vmem:[%s7833_s0 + $0x258] sm:$0xff]  ;;  %v152_v33 = vld [vmem:[%s7833_s0 + $0x288] sm:$0xff] }
  0x32   :  { %3944 = vmatprep.subr.bf16.mxu1 %v3943_v54  ;;  %v3957_v54 = vpack.c.bf16 %v285_v38, %v278_v37  ;;  %v133_v23 = vld [vmem:[%s7833_s0 + $0x1f0] sm:$0xff]  ;;  %v4799_v37 = vld [vmem:[%s7834_s1 + $0x40] sm:$0xff]  ;;  %v335_v39 = vmax.f32 %v146_v29, 0.0  ;;  %v154_v43 = vld [vmem:[%s7833_s0 + $0x298] sm:$0xff] }
  0x33   :  { %3894 = vmatpush1.bf16.msra.mxu0 %v3893_v59  ;;  %v4269_v59 = vmov 0.0|0.0   ;;  %v322_v35 = vmax.f32 %v133_v23, 0.0  ;;  %v3967_v38 = vpack.c.bf16 %v328_v22, %v321_v21  ;;  %v147_v42 = vld [vmem:[%s7833_s0 + $0x260] sm:$0xff]  ;;  %v160_v49 = vld [vmem:[%s7833_s0 + $0x2c8] sm:$0xff]  ;;  %v166_v52 = vld [vmem:[%s7833_s0 + $0x2f8] sm:$0xff] }
  0x34   :  { %3896 = vmatprep.subr.bf16.mxu0 %v3895_v62  ;;  %v4007_v62 = vpack.c.bf16 %v287_v46, %v280_v45  ;;  %v167_v50 = vld [vmem:[%s7833_s0 + $0x300] sm:$0xff]  ;;  %v4834_v57 = vld [vmem:[%s7834_s1 + $0x50] sm:$0xff]  ;;  %v349_v60 = vmax.f32 %v160_v49, 0.0  ;;  %v4881_v21 = vld [vmem:[%s7834_s1 + $0x78] sm:$0xff] }
  0x35   :  { %3946 = vmatpush1.bf16.msra.mxu1 %v3945_v63  ;;  %v294_v63 = vmax.f32 %v105_v51, 0.0  ;;  %v159_v51 = vld [vmem:[%s7833_s0 + $0x2c0] sm:$0xff]  ;;  %v181_v6 = vld [vmem:[%s7833_s0 + $0x370] sm:$0xff]  ;;  %v194_v29 = vld [vmem:[%s7833_s0 + $0x3d8] sm:$0xff] }
  0x36   :  { %3948 = vmatprep.subr.bf16.mxu1 %v3947_v5  ;;  %v119_v5 = vld [vmem:[%s7833_s0 + $0x180] sm:$0xff]  ;;  %v209_v49 = vld [vmem:[%s7833_s0 + $0x450] sm:$0xff] }
  0x37   :  { %3898 = vmatpush1.bf16.msra.mxu0 %v3897_v8  ;;  %v3961_v8 = vpack.c.bf16 %v299_v56, %v292_v55  ;;  %v4010_v16 = vpack.c.bf16 %v301_v0, %v294_v63  ;;  %v308_v17 = vmax.f32 %v119_v5, 0.0  ;;  %v336_v55 = vmax.f32 %v147_v42, 0.0  ;;  %v168_v63 = vld [vmem:[%s7833_s0 + $0x308] sm:$0xff]  ;;  %v174_v5 = vld [vmem:[%s7833_s0 + $0x338] sm:$0xff] }
  0x38   :  { %583 = vmatprep.subr.mxu0 %v443_v11  ;;  %v313_v11 = vmax.f32 %v124_v61, 0.0  ;;  %v343_v56 = vmax.f32 %v154_v43, 0.0  ;;  %v356_v61 = vmax.f32 %v167_v50, 0.0  ;;  %v4846_v0 = vld [vmem:[%s7834_s1 + $0x68] sm:$0xff]  ;;  %v357_v13 = vmax.f32 %v168_v63, 0.0  ;;  %v201_v50 = vld [vmem:[%s7833_s0 + $0x410] sm:$0xff] }
  0x39   :  { %3950 = vmatpush1.bf16.msra.mxu1 %v3949_v15  ;;  %v138_v15 = vld [vmem:[%s7833_s0 + $0x218] sm:$0xff]  ;;  %v4013_v34 = vpack.c.bf16 %v315_v18, %v308_v17  ;;  %v370_v17 = vmax.f32 %v181_v6, 0.0  ;;  %v175_v18 = vld [vmem:[%s7833_s0 + $0x340] sm:$0xff]  ;;  %v4916_v42 = vld [vmem:[%s7834_s1 + $0x88] sm:$0xff] }
  0x3a   :  { %810 = vmatprep.subr.mxu1 %v445_v20  ;;  %v3963_v20 = vpack.c.bf16 %v314_v4, %v307_v3  ;;  %v3965_v26 = vpack.c.bf16 %v313_v11, %v306_v9  ;;  %v327_v28 = vmax.f32 %v138_v15, 0.0  ;;  %v348_v3 = vmax.f32 %v159_v51, 0.0  ;;  %v180_v9 = vld [vmem:[%s7833_s0 + $0x368] sm:$0xff]  ;;  %v210_v63 = vld [vmem:[%s7833_s0 + $0x458] sm:$0xff] }
  0x3b   :  { %584 = vmatpush1.msra.mxu0 %v442_v24  ;;  %v140_v24 = vld [vmem:[%s7833_s0 + $0x228] sm:$0xff]  ;;  %v355_v4 = vmax.f32 %v166_v52, 0.0  ;;  %v4019_v11 = vpack.c.bf16 %v343_v56, %v336_v55  ;;  %v3975_v15 = vpack.c.bf16 %v356_v61, %v349_v60  ;;  %v4939_v56 = vld [vmem:[%s7834_s1 + $0x80] sm:$0xff]  ;;  %v398_v61 = vmax.f32 %v209_v49, 0.0  ;;  %v5021_v49 = vld [vmem:[%s7834_s1 + $0xb8] sm:$0xff] }
  0x3c   :  { %596 = vmatmul.mubr.f32.vlgmr.msra.gmra.mrb[0].mxu0 %v4663_v30  ;;  %3952 = vmatprep.subr.bf16.mxu0 %v3951_v27  ;;  %v320_v27 = vmax.f32 %v131_v14, 0.0  ;;  %v329_v36 = vmax.f32 %v140_v24, 0.0  ;;  %v4869_v14 = vld [vmem:[%s7834_s1 + $0x60] sm:$0xff]  ;;  %v369_v24 = vmax.f32 %v180_v9, 0.0  ;;  %v208_v51 = vld [vmem:[%s7833_s0 + $0x448] sm:$0xff] }
  0x3d   :  { %3954 = vmatpush1.bf16.msra.mxu0 %v3953_v31  ;;  %811 = vmatpush1.msra.mxu1 %v444_v32  ;;  %v153_v31 = vld [vmem:[%s7833_s0 + $0x290] sm:$0xff]  ;;  %v3977_v22 = vpack.c.bf16 %v355_v4, %v348_v3  ;;  %v390_v4 = vmax.f32 %v201_v50, 0.0  ;;  %v216_v6 = vld [vmem:[%s7833_s0 + $0x488] sm:$0xff]  ;;  %v215_v9 = vld [vmem:[%s7833_s0 + $0x480] sm:$0xff] }
  0x3e   :  { %3740 = vmatprep.mubr.msk.f32.mxu0 %vm449_vm0, %v4680_v41  ;;  %823 = vmatmul.mubr.f32.vlgmr.msra.gmra.mrb[0].mxu1 %v4663_v30  ;;  %v145_v32 = vld [vmem:[%s7833_s0 + $0x250] sm:$0xff]  ;;  %v342_v40 = vmax.f32 %v153_v31, 0.0  ;;  %v3969_v45 = vpack.c.bf16 %v327_v28, %v320_v27  ;;  %v195_v27 = vld [vmem:[%s7833_s0 + $0x3e0] sm:$0xff] }
  0x3f   :  { %4003 = vmatprep.subr.bf16.mxu1 %v4269_v59  ;;  %3767 = vmatprep.mubr.msk.f32.mxu1 %vm449_vm0, %v4680_v41  ;;  %v334_v46 = vmax.f32 %v145_v32, 0.0  ;;  %v187_v28 = vld [vmem:[%s7833_s0 + $0x3a0] sm:$0xff]  ;;  %v364_v32 = vmax.f32 %v175_v18, 0.0  ;;  %v405_v18 = vmax.f32 %v216_v6, 0.0 }
  0x40   :  { %602 = vmatmul.mubr.f32.gmra.mrb[2].mxu0 %v4692_v47  ;;  %4005 = vmatpush1.bf16.msra.mxu1 %v4004_v44  ;;  %v4811_v44 = vld [vmem:[%s7834_s1 + $0x58] sm:$0xff]  ;;  %v3971_v58 = vpack.c.bf16 %v342_v40, %v335_v39  ;;  %v189_v39 = vld [vmem:[%s7833_s0 + $0x3b0] sm:$0xff]  ;;  %v196_v40 = vld [vmem:[%s7833_s0 + $0x3e8] sm:$0xff] }
  0x41   :  { %3741 = vmatprep.mubr.msk.f32.mxu0 %vm449_vm0, %v4706_v53  ;;  %3956 = vmatprep.subr.bf16.mxu0 %v3955_v48  ;;  %v341_v48 = vmax.f32 %v152_v33, 0.0  ;;  %v385_v55 = vmax.f32 %v196_v40, 0.0 }
  0x42   :  { %829 = vmatmul.mubr.f32.gmra.mrb[2].mxu1 %v4692_v47  ;;  %3958 = vmatpush1.bf16.msra.mxu0 %v3957_v54  ;;  %v4016_v54 = vpack.c.bf16 %v329_v36, %v322_v35 }
  0x43   :  { %3768 = vmatprep.mubr.msk.f32.mxu1 %vm449_vm0, %v4706_v53  ;;  %4006 = vmatprep.subr.bf16.mxu1 %v4269_v59 }
  0x44   :  { %608 = vmatmul.mubr.f32.gmra.mrb[4].mxu0 %v4729_v1  ;;  %4008 = vmatpush1.bf16.msra.mxu1 %v4007_v62  ;;  %v161_v62 = vld [vmem:[%s7833_s0 + $0x2d0] sm:$0xff] }
  0x45   :  { %3742 = vmatprep.mubr.msk.f32.mxu0 %vm449_vm0, %v4741_v7  ;;  %3960 = vmatprep.subr.bf16.mxu0 %v3959_v2  ;;  %v3973_v2 = vpack.c.bf16 %v341_v48, %v334_v46  ;;  %v350_v12 = vmax.f32 %v161_v62, 0.0  ;;  %v383_v46 = vmax.f32 %v194_v29, 0.0  ;;  %v202_v48 = vld [vmem:[%s7833_s0 + $0x418] sm:$0xff]  ;;  %v203_v62 = vld [vmem:[%s7833_s0 + $0x420] sm:$0xff] }
  0x46   :  { %835 = vmatmul.mubr.f32.gmra.mrb[4].mxu1 %v4729_v1  ;;  %3962 = vmatpush1.bf16.msra.mxu0 %v3961_v8  ;;  %v173_v8 = vld [vmem:[%s7833_s0 + $0x330] sm:$0xff]  ;;  %v391_v60 = vmax.f32 %v202_v48, 0.0  ;;  %v230_v29 = vld [vmem:[%s7833_s0 + $0x4f8] sm:$0xff] }
  0x47   :  { %3769 = vmatprep.mubr.msk.f32.mxu1 %vm449_vm0, %v4741_v7  ;;  %4009 = vmatprep.subr.bf16.mxu1 %v4269_v59  ;;  %v362_v23 = vmax.f32 %v173_v8, 0.0  ;;  %v4022_v31 = vpack.c.bf16 %v357_v13, %v350_v12  ;;  %v223_v8 = vld [vmem:[%s7833_s0 + $0x4c0] sm:$0xff]  ;;  %v392_v13 = vmax.f32 %v203_v62, 0.0  ;;  %v238_v48 = vld [vmem:[%s7833_s0 + $0x538] sm:$0xff] }
  0x48   :  { %614 = vmatmul.mubr.f32.gmra.mrb[6].mxu0 %v4764_v19  ;;  %4011 = vmatpush1.bf16.msra.mxu1 %v4010_v16  ;;  %v363_v16 = vmax.f32 %v174_v5, 0.0  ;;  %v397_v5 = vmax.f32 %v208_v51, 0.0 }
  0x49   :  { %3743 = vmatprep.mubr.msk.f32.mxu0 %vm449_vm0, %v4776_v25  ;;  %3964 = vmatprep.subr.bf16.mxu0 %v3963_v20  ;;  %v182_v20 = vld [vmem:[%s7833_s0 + $0x378] sm:$0xff]  ;;  %v3981_v43 = vpack.c.bf16 %v369_v24, %v362_v23  ;;  %v224_v23 = vld [vmem:[%s7833_s0 + $0x4c8] sm:$0xff] }
  0x4a   :  { %841 = vmatmul.mubr.f32.gmra.mrb[6].mxu1 %v4764_v19  ;;  %3966 = vmatpush1.bf16.msra.mxu0 %v3965_v26  ;;  %v188_v26 = vld [vmem:[%s7833_s0 + $0x3a8] sm:$0xff]  ;;  %v371_v33 = vmax.f32 %v182_v20, 0.0  ;;  %v3979_v35 = vpack.c.bf16 %v370_v17, %v363_v16  ;;  %v4974_v16 = vld [vmem:[%s7834_s1 + $0x90] sm:$0xff]  ;;  %v3987_v17 = vpack.c.bf16 %v398_v61, %v391_v60  ;;  %v412_v20 = vmax.f32 %v223_v8, 0.0  ;;  %v250_v60 = vld [vmem:[%s7833_s0 + $0x598] sm:$0xff] }
  0x4b   :  { %3770 = vmatprep.mubr.msk.f32.mxu1 %vm449_vm0, %v4776_v25  ;;  %4012 = vmatprep.subr.bf16.mxu1 %v4269_v59  ;;  %v377_v36 = vmax.f32 %v188_v26, 0.0  ;;  %v4986_v24 = vld [vmem:[%s7834_s1 + $0xa8] sm:$0xff]  ;;  %v3989_v26 = vpack.c.bf16 %v397_v5, %v390_v4  ;;  %v245_v8 = vld [vmem:[%s7833_s0 + $0x570] sm:$0xff] }
  0x4c   :  { %620 = vmatmul.mubr.f32.gmra.mrb[8].mxu0 %v4799_v37  ;;  %4014 = vmatpush1.bf16.msra.mxu1 %v4013_v34  ;;  %v4904_v34 = vld [vmem:[%s7834_s1 + $0x70] sm:$0xff]  ;;  %v4025_v52 = vpack.c.bf16 %v371_v33, %v364_v32  ;;  %v236_v33 = vld [vmem:[%s7833_s0 + $0x528] sm:$0xff]  ;;  %v3991_v40 = vpack.c.bf16 %v412_v20, %v405_v18  ;;  %v434_v18 = vmax.f32 %v245_v8, 0.0  ;;  %v5244_v8 = vld [vmem:[%s7834_s1 + $0x178] sm:$0xff] }
  0x4d   :  { %3744 = vmatprep.mubr.msk.f32.mxu0 %vm449_vm0, %v4811_v44  ;;  %3968 = vmatprep.subr.bf16.mxu0 %v3967_v38  ;;  %v384_v38 = vmax.f32 %v195_v27, 0.0  ;;  %v404_v27 = vmax.f32 %v215_v9, 0.0  ;;  %v229_v32 = vld [vmem:[%s7833_s0 + $0x4f0] sm:$0xff]  ;;  %v252_v9 = vld [vmem:[%s7833_s0 + $0x5a8] sm:$0xff] }
  0x4e   :  { %847 = vmatmul.mubr.f32.gmra.mrb[8].mxu1 %v4799_v37  ;;  %3970 = vmatpush1.bf16.msra.mxu0 %v3969_v45  ;;  %v376_v45 = vmax.f32 %v187_v28, 0.0  ;;  %v418_v51 = vmax.f32 %v229_v32, 0.0  ;;  %v441_v20 = vmax.f32 %v252_v9, 0.0  ;;  %v5090_v32 = vld [vmem:[%s7834_s1 + $0xd0] sm:$0xff] }
  0x4f   :  { %3771 = vmatprep.mubr.msk.f32.mxu1 %vm449_vm0, %v4811_v44  ;;  %4015 = vmatprep.subr.bf16.mxu1 %v4269_v59  ;;  %v5254_v9 = vld [vmem:[%s7834_s1 + $0x170] sm:$0xff] }
  0x50   :  { %626 = vmatmul.mubr.f32.gmra.mrb[10].mxu0 %v4834_v57  ;;  %4017 = vmatpush1.bf16.msra.mxu1 %v4016_v54  ;;  %v378_v54 = vmax.f32 %v189_v39, 0.0  ;;  %v3985_v3 = vpack.c.bf16 %v383_v46, %v376_v45  ;;  %v5009_v39 = vld [vmem:[%s7834_s1 + $0xa0] sm:$0xff] }
  0x51   :  { %3745 = vmatprep.mubr.msk.f32.mxu0 %vm449_vm0, %v4846_v0  ;;  %3972 = vmatprep.subr.bf16.mxu0 %v3971_v58  ;;  %v3983_v58 = vpack.c.bf16 %v384_v38, %v377_v36  ;;  %v413_v38 = vmax.f32 %v224_v23, 0.0  ;;  %v231_v46 = vld [vmem:[%s7833_s0 + $0x500] sm:$0xff] }
  0x52   :  { %853 = vmatmul.mubr.f32.gmra.mrb[10].mxu1 %v4834_v57  ;;  %3974 = vmatpush1.bf16.msra.mxu0 %v3973_v2  ;;  %v4951_v2 = vld [vmem:[%s7834_s1 + $0x98] sm:$0xff]  ;;  %v4028_v12 = vpack.c.bf16 %v385_v55, %v378_v54  ;;  %v244_v54 = vld [vmem:[%s7833_s0 + $0x568] sm:$0xff]  ;;  %v251_v55 = vld [vmem:[%s7833_s0 + $0x5a0] sm:$0xff]  ;;  %v420_v62 = vmax.f32 %v231_v46, 0.0 }
  0x53   :  { %3772 = vmatprep.mubr.msk.f32.mxu1 %vm449_vm0, %v4846_v0  ;;  %4018 = vmatprep.subr.bf16.mxu1 %v4269_v59  ;;  %v433_v5 = vmax.f32 %v244_v54, 0.0  ;;  %v440_v6 = vmax.f32 %v251_v55, 0.0  ;;  %v5126_v46 = vld [vmem:[%s7834_s1 + $0xf0] sm:$0xff]  ;;  %v5164_v54 = vld [vmem:[%s7834_s1 + $0x128] sm:$0xff]  ;;  %v5174_v55 = vld [vmem:[%s7834_s1 + $0x120] sm:$0xff] }
  0x54   :  { %632 = vmatmul.mubr.f32.gmra.mrb[12].mxu0 %v4869_v14  ;;  %4020 = vmatpush1.bf16.msra.mxu1 %v4019_v11  ;;  %v222_v11 = vld [vmem:[%s7833_s0 + $0x4b8] sm:$0xff] }
  0x55   :  { %3746 = vmatprep.mubr.msk.f32.mxu0 %vm449_vm0, %v4881_v21  ;;  %3976 = vmatprep.subr.bf16.mxu0 %v3975_v15  ;;  %v399_v15 = vmax.f32 %v210_v63, 0.0  ;;  %v411_v28 = vmax.f32 %v222_v11, 0.0  ;;  %v427_v63 = vmax.f32 %v238_v48, 0.0  ;;  %v5056_v11 = vld [vmem:[%s7834_s1 + $0xc8] sm:$0xff]  ;;  %v3999_v23 = vpack.c.bf16 %v440_v6, %v433_v5  ;;  %v5238_v6 = vld [vmem:[%s7834_s1 + $0x160] sm:$0xff] }
  0x56   :  { %859 = vmatmul.mubr.f32.gmra.mrb[12].mxu1 %v4869_v14  ;;  %3978 = vmatpush1.bf16.msra.mxu0 %v3977_v22  ;;  %v217_v22 = vld [vmem:[%s7833_s0 + $0x490] sm:$0xff]  ;;  %v5132_v48 = vld [vmem:[%s7834_s1 + $0x108] sm:$0xff] }
  0x57   :  { %3773 = vmatprep.mubr.msk.f32.mxu1 %vm449_vm0, %v4881_v21  ;;  %4021 = vmatprep.subr.bf16.mxu1 %v4269_v59  ;;  %v406_v36 = vmax.f32 %v217_v22, 0.0  ;;  %v3993_v50 = vpack.c.bf16 %v411_v28, %v404_v27  ;;  %v5067_v22 = vld [vmem:[%s7834_s1 + $0xc0] sm:$0xff]  ;;  %v258_v28 = vld [vmem:[%s7833_s0 + $0x5d8] sm:$0xff]  ;;  %v5228_v5 = vld [vmem:[%s7834_s1 + $0x168] sm:$0xff] }
  0x58   :  { %638 = vmatmul.mubr.f32.gmra.mrb[14].mxu0 %v4904_v34  ;;  %4023 = vmatpush1.bf16.msra.mxu1 %v4022_v31  ;;  %v237_v31 = vld [vmem:[%s7833_s0 + $0x530] sm:$0xff] }
  0x59   :  { %3747 = vmatprep.mubr.msk.f32.mxu0 %vm449_vm0, %v4916_v42  ;;  %3980 = vmatprep.subr.bf16.mxu0 %v3979_v35  ;;  %v4031_v35 = vpack.c.bf16 %v399_v15, %v392_v13  ;;  %v426_v45 = vmax.f32 %v237_v31, 0.0  ;;  %v4034_v61 = vpack.c.bf16 %v413_v38, %v406_v36  ;;  %v439_v15 = vmax.f32 %v250_v60, 0.0  ;;  %v5099_v36 = vld [vmem:[%s7834_s1 + $0xe8] sm:$0xff]  ;;  %v5190_v60 = vld [vmem:[%s7834_s1 + $0x130] sm:$0xff] }
  0x5a   :  { %865 = vmatmul.mubr.f32.gmra.mrb[14].mxu1 %v4904_v34  ;;  %3982 = vmatpush1.bf16.msra.mxu0 %v3981_v43  ;;  %v419_v43 = vmax.f32 %v230_v29, 0.0  ;;  %v257_v29 = vld [vmem:[%s7833_s0 + $0x5d0] sm:$0xff]  ;;  %v4040_v31 = vpack.c.bf16 %v441_v20, %v434_v18  ;;  %v5292_v18 = vld [vmem:[%s7834_s1 + $0x1a8] sm:$0xff]  ;;  %v5302_v20 = vld [vmem:[%s7834_s1 + $0x1a0] sm:$0xff] }
  0x5b   :  { %3774 = vmatprep.mubr.msk.f32.mxu1 %vm449_vm0, %v4916_v42  ;;  %4024 = vmatprep.subr.bf16.mxu1 %v4269_v59  ;;  %v446_v38 = vmax.f32 %v257_v29, 0.0 }
  0x5c   :  { %644 = vmatmul.mubr.f32.gmra.mrb[16].mxu0 %v4939_v56  ;;  %4026 = vmatpush1.bf16.msra.mxu1 %v4025_v52  ;;  %v425_v52 = vmax.f32 %v236_v33, 0.0  ;;  %v3995_v4 = vpack.c.bf16 %v426_v45, %v419_v43  ;;  %v447_v33 = vmax.f32 %v258_v28, 0.0  ;;  %v5110_v43 = vld [vmem:[%s7834_s1 + $0xe0] sm:$0xff]  ;;  %v5116_v45 = vld [vmem:[%s7834_s1 + $0xf8] sm:$0xff] }
  0x5d   :  { %3748 = vmatprep.mubr.msk.f32.mxu0 %vm449_vm0, %v4951_v2  ;;  %3984 = vmatprep.subr.bf16.mxu0 %v3983_v58  ;;  %v243_v58 = vld [vmem:[%s7833_s0 + $0x560] sm:$0xff] }
  0x5e   :  { %871 = vmatmul.mubr.f32.gmra.mrb[16].mxu1 %v4939_v56  ;;  %3986 = vmatpush1.bf16.msra.mxu0 %v3985_v3  ;;  %v5044_v3 = vld [vmem:[%s7834_s1 + $0xb0] sm:$0xff]  ;;  %v432_v13 = vmax.f32 %v243_v58, 0.0  ;;  %v5180_v58 = vld [vmem:[%s7834_s1 + $0x138] sm:$0xff] }
  0x5f   :  { %3775 = vmatprep.mubr.msk.f32.mxu1 %vm449_vm0, %v4951_v2  ;;  %4027 = vmatprep.subr.bf16.mxu1 %v4269_v59 }
  0x60   :  { %650 = vmatmul.mubr.f32.gmra.mrb[18].mxu0 %v4974_v16  ;;  %4029 = vmatpush1.bf16.msra.mxu1 %v4028_v12  ;;  %v3997_v12 = vpack.c.bf16 %v425_v52, %v418_v51  ;;  %v4001_v27 = vpack.c.bf16 %v439_v15, %v432_v13  ;;  %v5148_v51 = vld [vmem:[%s7834_s1 + $0x118] sm:$0xff]  ;;  %v5158_v52 = vld [vmem:[%s7834_s1 + $0x110] sm:$0xff]  ;;  %v5270_v13 = vld [vmem:[%s7834_s1 + $0x180] sm:$0xff] }
  0x61   :  { %3749 = vmatprep.mubr.msk.f32.mxu0 %vm449_vm0, %v4986_v24  ;;  %3988 = vmatprep.subr.bf16.mxu0 %v3987_v17  ;;  %v4037_v17 = vpack.c.bf16 %v427_v63, %v420_v62  ;;  %v5206_v62 = vld [vmem:[%s7834_s1 + $0x140] sm:$0xff]  ;;  %v5212_v63 = vld [vmem:[%s7834_s1 + $0x158] sm:$0xff] }
  0x62   :  { %877 = vmatmul.mubr.f32.gmra.mrb[18].mxu1 %v4974_v16  ;;  %3990 = vmatpush1.bf16.msra.mxu0 %v3989_v26  ;;  %v5073_v26 = vld [vmem:[%s7834_s1 + $0xd8] sm:$0xff] }
  0x63   :  { %3776 = vmatprep.mubr.msk.f32.mxu1 %vm449_vm0, %v4986_v24  ;;  %4030 = vmatprep.subr.bf16.mxu1 %v4269_v59  ;;  %v5276_v15 = vld [vmem:[%s7834_s1 + $0x198] sm:$0xff] }
  0x64   :  { %656 = vmatmul.mubr.f32.gmra.mrb[20].mxu0 %v5009_v39  ;;  %4032 = vmatpush1.bf16.msra.mxu1 %v4031_v35  ;;  %v259_v35 = vld [vmem:[%s7833_s0 + $0x5e0] sm:$0xff] }
  0x65   :  { %3750 = vmatprep.mubr.msk.f32.mxu0 %vm449_vm0, %v5021_v49  ;;  %3992 = vmatprep.subr.bf16.mxu0 %v3991_v40  ;;  %v448_v40 = vmax.f32 %v259_v35, 0.0 }
  0x66   :  { %883 = vmatmul.mubr.f32.gmra.mrb[20].mxu1 %v5009_v39  ;;  %3994 = vmatpush1.bf16.msra.mxu0 %v3993_v50  ;;  %v5142_v50 = vld [vmem:[%s7834_s1 + $0x100] sm:$0xff] }
  0x67   :  { %3777 = vmatprep.mubr.msk.f32.mxu1 %vm449_vm0, %v5021_v49  ;;  %4033 = vmatprep.subr.bf16.mxu1 %v4269_v59 }
  0x68   :  { %662 = vmatmul.mubr.f32.gmra.mrb[22].mxu0 %v5044_v3  ;;  %4035 = vmatpush1.bf16.msra.mxu1 %v4034_v61  ;;  %v5196_v61 = vld [vmem:[%s7834_s1 + $0x148] sm:$0xff] }
  0x69   :  { %3751 = vmatprep.mubr.msk.f32.mxu0 %vm449_vm0, %v5056_v11  ;;  %3996 = vmatprep.subr.bf16.mxu0 %v3995_v4  ;;  %v5222_v4 = vld [vmem:[%s7834_s1 + $0x150] sm:$0xff] }
  0x6a   :  { %889 = vmatmul.mubr.f32.gmra.mrb[22].mxu1 %v5044_v3  ;;  %3998 = vmatpush1.bf16.msra.mxu0 %v3997_v12  ;;  %v5260_v12 = vld [vmem:[%s7834_s1 + $0x188] sm:$0xff] }
  0x6b   :  { %3778 = vmatprep.mubr.msk.f32.mxu1 %vm449_vm0, %v5056_v11  ;;  %4036 = vmatprep.subr.bf16.mxu1 %v4269_v59 }
  0x6c   :  { %668 = vmatmul.mubr.f32.gmra.mrb[24].mxu0 %v5067_v22  ;;  %4038 = vmatpush1.bf16.msra.mxu1 %v4037_v17  ;;  %v5286_v17 = vld [vmem:[%s7834_s1 + $0x190] sm:$0xff] }
  0x6d   :  { %3752 = vmatprep.mubr.msk.f32.mxu0 %vm449_vm0, %v5073_v26  ;;  %4000 = vmatprep.subr.bf16.mxu0 %v3999_v23  ;;  %v4101_v23 = vld [vmem:[%s7834_s1 + $0x8] sm:$0xff] }
  0x6e   :  { %895 = vmatmul.mubr.f32.gmra.mrb[24].mxu1 %v5067_v22  ;;  %4002 = vmatpush1.bf16.msra.mxu0 %v4001_v27 }
  0x6f   :  { %3779 = vmatprep.mubr.msk.f32.mxu1 %vm449_vm0, %v5073_v26  ;;  %4039 = vmatprep.subr.bf16.mxu1 %v4269_v59  ;;  %v4270_v59 = vmov 0.0  }
  0x70   :  { %674 = vmatmul.mubr.f32.gmra.mrb[26].mxu0 %v5090_v32  ;;  %4041 = vmatpush1.bf16.msra.mxu1 %v4040_v31 }
  0x71   :  { %3753 = vmatprep.mubr.msk.f32.mxu0 %vm449_vm0, %v5099_v36  ;;  %1037 = vmatprep.subr.mxu0 %v447_v33 }
  0x72   :  { %901 = vmatmul.mubr.f32.gmra.mrb[26].mxu1 %v5090_v32  ;;  %1038 = vmatpush1.msra.mxu0 %v446_v38 }
  0x73   :  { %3780 = vmatprep.mubr.msk.f32.mxu1 %vm449_vm0, %v5099_v36  ;;  %1264 = vmatprep.subr.mxu1 %v4270_v59 }
  0x74   :  { %680 = vmatmul.mubr.f32.gmra.mrb[28].mxu0 %v5110_v43  ;;  %1265 = vmatpush1.msra.mxu1 %v448_v40 }
  0x75   :  { %3754 = vmatprep.mubr.msk.f32.mxu0 %vm449_vm0, %v5116_v45 }
  0x76   :  { %907 = vmatmul.mubr.f32.gmra.mrb[28].mxu1 %v5110_v43 }
  0x77   :  { %3781 = vmatprep.mubr.msk.f32.mxu1 %vm449_vm0, %v5116_v45 }
  0x78   :  { %686 = vmatmul.mubr.f32.gmra.mrb[30].mxu0 %v5126_v46 }
  0x79   :  { %3755 = vmatprep.mubr.msk.f32.mxu0 %vm449_vm0, %v5132_v48 }
  0x7a   :  { %913 = vmatmul.mubr.f32.gmra.mrb[30].mxu1 %v5126_v46 }
  0x7b   :  { %3782 = vmatprep.mubr.msk.f32.mxu1 %vm449_vm0, %v5132_v48 }
  0x7c   :  { %692 = vmatmul.mubr.f32.gmra.mrb[32].mxu0 %v5142_v50 }
  0x7d   :  { %3756 = vmatprep.mubr.msk.f32.mxu0 %vm449_vm0, %v5148_v51 }
  0x7e   :  { %919 = vmatmul.mubr.f32.gmra.mrb[32].mxu1 %v5142_v50 }
  0x7f   :  { %3783 = vmatprep.mubr.msk.f32.mxu1 %vm449_vm0, %v5148_v51 }
  0x80   :  { %698 = vmatmul.mubr.f32.gmra.mrb[34].mxu0 %v5158_v52 }
  0x81   :  { %3757 = vmatprep.mubr.msk.f32.mxu0 %vm449_vm0, %v5164_v54 }
  0x82   :  { %925 = vmatmul.mubr.f32.gmra.mrb[34].mxu1 %v5158_v52 }
  0x83   :  { %3784 = vmatprep.mubr.msk.f32.mxu1 %vm449_vm0, %v5164_v54 }
  0x84   :  { %704 = vmatmul.mubr.f32.gmra.mrb[36].mxu0 %v5174_v55 }
  0x85   :  { %3758 = vmatprep.mubr.msk.f32.mxu0 %vm449_vm0, %v5180_v58 }
  0x86   :  { %931 = vmatmul.mubr.f32.gmra.mrb[36].mxu1 %v5174_v55 }
  0x87   :  { %3785 = vmatprep.mubr.msk.f32.mxu1 %vm449_vm0, %v5180_v58 }
  0x88   :  { %710 = vmatmul.mubr.f32.gmra.mrb[38].mxu0 %v5190_v60 }
  0x89   :  { %3759 = vmatprep.mubr.msk.f32.mxu0 %vm449_vm0, %v5196_v61 }
  0x8a   :  { %937 = vmatmul.mubr.f32.gmra.mrb[38].mxu1 %v5190_v60 }
  0x8b   :  { %3786 = vmatprep.mubr.msk.f32.mxu1 %vm449_vm0, %v5196_v61 }
  0x8c   :  { %716 = vmatmul.mubr.f32.gmra.mrb[40].mxu0 %v5206_v62 }
  0x8d   :  { %3760 = vmatprep.mubr.msk.f32.mxu0 %vm449_vm0, %v5212_v63 }
  0x8e   :  { %943 = vmatmul.mubr.f32.gmra.mrb[40].mxu1 %v5206_v62 }
  0x8f   :  { %3787 = vmatprep.mubr.msk.f32.mxu1 %vm449_vm0, %v5212_v63 }
  0x90   :  { %722 = vmatmul.mubr.f32.gmra.mrb[42].mxu0 %v5222_v4 }
  0x91   :  { %3761 = vmatprep.mubr.msk.f32.mxu0 %vm449_vm0, %v5228_v5 }
  0x92   :  { %949 = vmatmul.mubr.f32.gmra.mrb[42].mxu1 %v5222_v4 }
  0x93   :  { %3788 = vmatprep.mubr.msk.f32.mxu1 %vm449_vm0, %v5228_v5 }
  0x94   :  { %728 = vmatmul.mubr.f32.gmra.mrb[44].mxu0 %v5238_v6 }
  0x95   :  { %3762 = vmatprep.mubr.msk.f32.mxu0 %vm449_vm0, %v5244_v8 }
  0x96   :  { %955 = vmatmul.mubr.f32.gmra.mrb[44].mxu1 %v5238_v6 }
  0x97   :  { %3789 = vmatprep.mubr.msk.f32.mxu1 %vm449_vm0, %v5244_v8 }
  0x98   :  { %734 = vmatmul.mubr.f32.gmra.mrb[46].mxu0 %v5254_v9 }
  0x99   :  { %3763 = vmatprep.mubr.msk.f32.mxu0 %vm449_vm0, %v5260_v12 }
  0x9a   :  { %961 = vmatmul.mubr.f32.gmra.mrb[46].mxu1 %v5254_v9 }
  0x9b   :  { %3790 = vmatprep.mubr.msk.f32.mxu1 %vm449_vm0, %v5260_v12 }
  0x9c   :  { %740 = vmatmul.mubr.f32.gmra.mrb[48].mxu0 %v5270_v13 }
  0x9d   :  { %3764 = vmatprep.mubr.msk.f32.mxu0 %vm449_vm0, %v5276_v15 }
  0x9e   :  { %967 = vmatmul.mubr.f32.gmra.mrb[48].mxu1 %v5270_v13 }
  0x9f   :  { %3791 = vmatprep.mubr.msk.f32.mxu1 %vm449_vm0, %v5276_v15 }
  0xa0   :  { %746 = vmatmul.mubr.f32.gmra.mrb[50].mxu0 %v5286_v17 }
  0xa1   :  { %3765 = vmatprep.mubr.msk.f32.mxu0 %vm449_vm0, %v5292_v18 }
  0xa2   :  { %973 = vmatmul.mubr.f32.gmra.mrb[50].mxu1 %v5286_v17 }
  0xa3   :  { %3792 = vmatprep.mubr.msk.f32.mxu1 %vm449_vm0, %v5292_v18 }
  0xa4   :  { %752 = vmatmul.mubr.f32.gmra.mrb[52].mxu0 %v5302_v20 }
  0xa5   :  { %3793 = vmatprep.mubr.msk.f32.mxu0 %vm449_vm0, %v4558_v10  ;;  %v4271_v10 = vmov 0  }
  0xa6   :  { %979 = vmatmul.mubr.f32.gmra.mrb[52].mxu1 %v5302_v20  ;;  %4045 = vset.pattern.permute.xlu0 %v4271_v10 }
  0xa7   :  { %3820 = vmatprep.mubr.msk.f32.mxu1 %vm449_vm0, %v4101_v23  ;;  %4046 = vset.pattern.permute.xlu1 %v4271_v10 }
  0xa8   :  { %1050 = vmatmul.mubr.f32.vlgmr.msra.gmra.mrb[54].mxu0 %v4663_v30 }
  0xa9   :  { %3794 = vmatprep.mubr.msk.f32.mxu0 %vm449_vm0, %v4680_v41 }
  0xaa   :  { %1277 = vmatmul.mubr.f32.vlgmr.msra.gmra.mrb[54].mxu1 %v4663_v30  ;;  %v3195_v30 = vld [vmem:[%s7835_s3] sm:$0xff] }
  0xab   :  { %3821 = vmatprep.mubr.msk.f32.mxu1 %vm449_vm0, %v4680_v41  ;;  %3224 = vperm.xlu0 %4045, %v3195_v30   ;;  %v3196_v41 = vld [vmem:[%s7835_s3 + $0x8] sm:$0xff] }
  0xac   :  { %1056 = vmatmul.mubr.f32.gmra.mrb[56].mxu0 %v4692_v47  ;;  %3229 = vperm.xlu1 %4046, %v3196_v41  }
  0xad   :  { %3795 = vmatprep.mubr.msk.f32.mxu0 %vm449_vm0, %v4706_v53 }
  0xae   :  { %1282 = vmatmul.mubr.f32.gmra.mrb[56].mxu1 %v4692_v47  ;;  %v3197_v47 = vld [vmem:[%s7835_s3 + $0x10] sm:$0xff] }
  0xaf   :  { %3822 = vmatprep.mubr.msk.f32.mxu1 %vm449_vm0, %v4706_v53  ;;  %3234 = vperm.xlu0 %4045, %v3197_v47   ;;  %v3198_v53 = vld [vmem:[%s7835_s3 + $0x18] sm:$0xff] }
  0xb0   :  { %1062 = vmatmul.mubr.f32.gmra.mrb[58].mxu0 %v4729_v1  ;;  %3239 = vperm.xlu1 %4046, %v3198_v53  }
  0xb1   :  { %3796 = vmatprep.mubr.msk.f32.mxu0 %vm449_vm0, %v4741_v7 }
  0xb2   :  { %1287 = vmatmul.mubr.f32.gmra.mrb[58].mxu1 %v4729_v1  ;;  %v3199_v1 = vld [vmem:[%s7835_s3 + $0x20] sm:$0xff] }
  0xb3   :  { %3823 = vmatprep.mubr.msk.f32.mxu1 %vm449_vm0, %v4741_v7  ;;  %3244 = vperm.xlu0 %4045, %v3199_v1   ;;  %v3200_v7 = vld [vmem:[%s7835_s3 + $0x28] sm:$0xff] }
  0xb4   :  { %1068 = vmatmul.mubr.f32.gmra.mrb[60].mxu0 %v4764_v19  ;;  %3249 = vperm.xlu1 %4046, %v3200_v7  }
  0xb5   :  { %3797 = vmatprep.mubr.msk.f32.mxu0 %vm449_vm0, %v4776_v25 }
  0xb6   :  { %1292 = vmatmul.mubr.f32.gmra.mrb[60].mxu1 %v4764_v19  ;;  %v3201_v19 = vld [vmem:[%s7835_s3 + $0x30] sm:$0xff] }
  0xb7   :  { %3824 = vmatprep.mubr.msk.f32.mxu1 %vm449_vm0, %v4776_v25  ;;  %3254 = vperm.xlu0 %4045, %v3201_v19   ;;  %v3202_v25 = vld [vmem:[%s7835_s3 + $0x38] sm:$0xff] }
  0xb8   :  { %1074 = vmatmul.mubr.f32.gmra.mrb[62].mxu0 %v4799_v37  ;;  %3259 = vperm.xlu1 %4046, %v3202_v25  }
  0xb9   :  { %3798 = vmatprep.mubr.msk.f32.mxu0 %vm449_vm0, %v4811_v44 }
  0xba   :  { %1297 = vmatmul.mubr.f32.gmra.mrb[62].mxu1 %v4799_v37  ;;  %v3203_v37 = vld [vmem:[%s7835_s3 + $0x40] sm:$0xff] }
  0xbb   :  { %3825 = vmatprep.mubr.msk.f32.mxu1 %vm449_vm0, %v4811_v44  ;;  %3264 = vperm.xlu0 %4045, %v3203_v37   ;;  %v3204_v44 = vld [vmem:[%s7835_s3 + $0x48] sm:$0xff] }
  0xbc   :  { %1080 = vmatmul.mubr.f32.gmra.mrb[64].mxu0 %v4834_v57  ;;  %3269 = vperm.xlu1 %4046, %v3204_v44  }
  0xbd   :  { %3799 = vmatprep.mubr.msk.f32.mxu0 %vm449_vm0, %v4846_v0 }
  0xbe   :  { %1302 = vmatmul.mubr.f32.gmra.mrb[64].mxu1 %v4834_v57  ;;  %v3205_v57 = vld [vmem:[%s7835_s3 + $0x50] sm:$0xff] }
  0xbf   :  { %3826 = vmatprep.mubr.msk.f32.mxu1 %vm449_vm0, %v4846_v0  ;;  %3274 = vperm.xlu0 %4045, %v3205_v57   ;;  %v3206_v0 = vld [vmem:[%s7835_s3 + $0x58] sm:$0xff] }
  0xc0   :  { %1086 = vmatmul.mubr.f32.gmra.mrb[66].mxu0 %v4869_v14  ;;  %3279 = vperm.xlu1 %4046, %v3206_v0  }
  0xc1   :  { %3800 = vmatprep.mubr.msk.f32.mxu0 %vm449_vm0, %v4881_v21 }
  0xc2   :  { %1307 = vmatmul.mubr.f32.gmra.mrb[66].mxu1 %v4869_v14  ;;  %v3207_v14 = vld [vmem:[%s7835_s3 + $0x60] sm:$0xff] }
  0xc3   :  { %3827 = vmatprep.mubr.msk.f32.mxu1 %vm449_vm0, %v4881_v21  ;;  %3284 = vperm.xlu0 %4045, %v3207_v14   ;;  %v3208_v21 = vld [vmem:[%s7835_s3 + $0x68] sm:$0xff] }
  0xc4   :  { %1092 = vmatmul.mubr.f32.gmra.mrb[68].mxu0 %v4904_v34  ;;  %3289 = vperm.xlu1 %4046, %v3208_v21  }
  0xc5   :  { %3801 = vmatprep.mubr.msk.f32.mxu0 %vm449_vm0, %v4916_v42 }
  0xc6   :  { %1312 = vmatmul.mubr.f32.gmra.mrb[68].mxu1 %v4904_v34 }
  0xc7   :  { %3828 = vmatprep.mubr.msk.f32.mxu1 %vm449_vm0, %v4916_v42 }
  0xc8   :  { %1098 = vmatmul.mubr.f32.gmra.mrb[70].mxu0 %v4939_v56 }
  0xc9   :  { %3802 = vmatprep.mubr.msk.f32.mxu0 %vm449_vm0, %v4951_v2 }
  0xca   :  { %1317 = vmatmul.mubr.f32.gmra.mrb[70].mxu1 %v4939_v56 }
  0xcb   :  { %3829 = vmatprep.mubr.msk.f32.mxu1 %vm449_vm0, %v4951_v2 }
  0xcc   :  { %1104 = vmatmul.mubr.f32.gmra.mrb[72].mxu0 %v4974_v16 }
  0xcd   :  { %3803 = vmatprep.mubr.msk.f32.mxu0 %vm449_vm0, %v4986_v24 }
  0xce   :  { %1322 = vmatmul.mubr.f32.gmra.mrb[72].mxu1 %v4974_v16 }
  0xcf   :  { %3830 = vmatprep.mubr.msk.f32.mxu1 %vm449_vm0, %v4986_v24 }
  0xd0   :  { %1110 = vmatmul.mubr.f32.gmra.mrb[74].mxu0 %v5009_v39 }
  0xd1   :  { %3804 = vmatprep.mubr.msk.f32.mxu0 %vm449_vm0, %v5021_v49 }
  0xd2   :  { %1327 = vmatmul.mubr.f32.gmra.mrb[74].mxu1 %v5009_v39 }
  0xd3   :  { %3831 = vmatprep.mubr.msk.f32.mxu1 %vm449_vm0, %v5021_v49 }
  0xd4   :  { %1116 = vmatmul.mubr.f32.gmra.mrb[76].mxu0 %v5044_v3 }
  0xd5   :  { %3805 = vmatprep.mubr.msk.f32.mxu0 %vm449_vm0, %v5056_v11 }
  0xd6   :  { %1332 = vmatmul.mubr.f32.gmra.mrb[76].mxu1 %v5044_v3 }
  0xd7   :  { %3832 = vmatprep.mubr.msk.f32.mxu1 %vm449_vm0, %v5056_v11 }
  0xd8   :  { %1122 = vmatmul.mubr.f32.gmra.mrb[78].mxu0 %v5067_v22 }
  0xd9   :  { %3806 = vmatprep.mubr.msk.f32.mxu0 %vm449_vm0, %v5073_v26 }
  0xda   :  { %1337 = vmatmul.mubr.f32.gmra.mrb[78].mxu1 %v5067_v22 }
  0xdb   :  { %3833 = vmatprep.mubr.msk.f32.mxu1 %vm449_vm0, %v5073_v26 }
  0xdc   :  { %1128 = vmatmul.mubr.f32.gmra.mrb[80].mxu0 %v5090_v32 }
  0xdd   :  { %3807 = vmatprep.mubr.msk.f32.mxu0 %vm449_vm0, %v5099_v36 }
  0xde   :  { %1342 = vmatmul.mubr.f32.gmra.mrb[80].mxu1 %v5090_v32 }
  0xdf   :  { %3834 = vmatprep.mubr.msk.f32.mxu1 %vm449_vm0, %v5099_v36 }
  0xe0   :  { %1134 = vmatmul.mubr.f32.gmra.mrb[82].mxu0 %v5110_v43 }
  0xe1   :  { %3808 = vmatprep.mubr.msk.f32.mxu0 %vm449_vm0, %v5116_v45 }
  0xe2   :  { %1347 = vmatmul.mubr.f32.gmra.mrb[82].mxu1 %v5110_v43 }
  0xe3   :  { %3835 = vmatprep.mubr.msk.f32.mxu1 %vm449_vm0, %v5116_v45 }
  0xe4   :  { %1140 = vmatmul.mubr.f32.gmra.mrb[84].mxu0 %v5126_v46 }
  0xe5   :  { %3809 = vmatprep.mubr.msk.f32.mxu0 %vm449_vm0, %v5132_v48 }
  0xe6   :  { %1352 = vmatmul.mubr.f32.gmra.mrb[84].mxu1 %v5126_v46 }
  0xe7   :  { %3836 = vmatprep.mubr.msk.f32.mxu1 %vm449_vm0, %v5132_v48 }
  0xe8   :  { %1146 = vmatmul.mubr.f32.gmra.mrb[86].mxu0 %v5142_v50 }
  0xe9   :  { %3810 = vmatprep.mubr.msk.f32.mxu0 %vm449_vm0, %v5148_v51 }
  0xea   :  { %1357 = vmatmul.mubr.f32.gmra.mrb[86].mxu1 %v5142_v50 }
  0xeb   :  { %3837 = vmatprep.mubr.msk.f32.mxu1 %vm449_vm0, %v5148_v51 }
  0xec   :  { %1152 = vmatmul.mubr.f32.gmra.mrb[88].mxu0 %v5158_v52 }
  0xed   :  { %3811 = vmatprep.mubr.msk.f32.mxu0 %vm449_vm0, %v5164_v54 }
  0xee   :  { %1362 = vmatmul.mubr.f32.gmra.mrb[88].mxu1 %v5158_v52 }
  0xef   :  { %3838 = vmatprep.mubr.msk.f32.mxu1 %vm449_vm0, %v5164_v54 }
  0xf0   :  { %1158 = vmatmul.mubr.f32.gmra.mrb[90].mxu0 %v5174_v55 }
  0xf1   :  { %3812 = vmatprep.mubr.msk.f32.mxu0 %vm449_vm0, %v5180_v58 }
  0xf2   :  { %1367 = vmatmul.mubr.f32.gmra.mrb[90].mxu1 %v5174_v55 }
  0xf3   :  { %3839 = vmatprep.mubr.msk.f32.mxu1 %vm449_vm0, %v5180_v58 }
  0xf4   :  { %1164 = vmatmul.mubr.f32.gmra.mrb[92].mxu0 %v5190_v60 }
  0xf5   :  { %3813 = vmatprep.mubr.msk.f32.mxu0 %vm449_vm0, %v5196_v61 }
  0xf6   :  { %1372 = vmatmul.mubr.f32.gmra.mrb[92].mxu1 %v5190_v60 }
  0xf7   :  { %3840 = vmatprep.mubr.msk.f32.mxu1 %vm449_vm0, %v5196_v61 }
  0xf8   :  { %1170 = vmatmul.mubr.f32.gmra.mrb[94].mxu0 %v5206_v62 }
  0xf9   :  { %3814 = vmatprep.mubr.msk.f32.mxu0 %vm449_vm0, %v5212_v63 }
  0xfa   :  { %1377 = vmatmul.mubr.f32.gmra.mrb[94].mxu1 %v5206_v62 }
  0xfb   :  { %3841 = vmatprep.mubr.msk.f32.mxu1 %vm449_vm0, %v5212_v63 }
  0xfc   :  { %1176 = vmatmul.mubr.f32.gmra.mrb[96].mxu0 %v5222_v4 }
  0xfd   :  { %3815 = vmatprep.mubr.msk.f32.mxu0 %vm449_vm0, %v5228_v5 }
  0xfe   :  { %1382 = vmatmul.mubr.f32.gmra.mrb[96].mxu1 %v5222_v4 }
  0xff   :  { %3842 = vmatprep.mubr.msk.f32.mxu1 %vm449_vm0, %v5228_v5 }
 0x100   :  { %1182 = vmatmul.mubr.f32.gmra.mrb[98].mxu0 %v5238_v6 }
 0x101   :  { %3816 = vmatprep.mubr.msk.f32.mxu0 %vm449_vm0, %v5244_v8 }
 0x102   :  { %1387 = vmatmul.mubr.f32.gmra.mrb[98].mxu1 %v5238_v6 }
 0x103   :  { %3843 = vmatprep.mubr.msk.f32.mxu1 %vm449_vm0, %v5244_v8 }
 0x104   :  { %1188 = vmatmul.mubr.f32.gmra.mrb[100].mxu0 %v5254_v9 }
 0x105   :  { %3817 = vmatprep.mubr.msk.f32.mxu0 %vm449_vm0, %v5260_v12 }
 0x106   :  { %1392 = vmatmul.mubr.f32.gmra.mrb[100].mxu1 %v5254_v9 }
 0x107   :  { %3844 = vmatprep.mubr.msk.f32.mxu1 %vm449_vm0, %v5260_v12 }
 0x108   :  { %1194 = vmatmul.mubr.f32.gmra.mrb[102].mxu0 %v5270_v13 }
 0x109   :  { %3818 = vmatprep.mubr.msk.f32.mxu0 %vm449_vm0, %v5276_v15 }
 0x10a   :  { %1397 = vmatmul.mubr.f32.gmra.mrb[102].mxu1 %v5270_v13 }
 0x10b   :  { %3845 = vmatprep.mubr.msk.f32.mxu1 %vm449_vm0, %v5276_v15 }
 0x10c   :  { %1200 = vmatmul.mubr.f32.gmra.mrb[104].mxu0 %v5286_v17 }
 0x10d   :  { %3819 = vmatprep.mubr.msk.f32.mxu0 %vm449_vm0, %v5292_v18 }
 0x10e   :  { %1402 = vmatmul.mubr.f32.gmra.mrb[104].mxu1 %v5286_v17 }
 0x10f   :  { %v597_v34 = vpop.f32.mrb[0].mxu0  ;;  %3846 = vmatprep.mubr.msk.f32.mxu1 %vm449_vm0, %v5292_v18 }
 0x110   :  { %1412 = vst [vmem:[#allocation2] sm:$0xff] %v597_v34  ;;  %v599_v42 = vpop.f32.mrb[1].mxu0  ;;  %1206 = vmatmul.mubr.f32.gmra.mrb[106].mxu0 %v5302_v20 }
 0x111   :  { %1413 = vst [vmem:[#allocation2 + $0x8] sm:$0xff] %v599_v42  ;;  %v824_v56 = vpop.f32.mrb[0].mxu1  ;;  %v1791_v2 = vadd.f32 %v599_v42, %v597_v34 }
 0x112   :  { %1414 = vst [vmem:[#allocation2 + $0x10] sm:$0xff] %v824_v56  ;;  %v826_v16 = vpop.f32.mrb[1].mxu1  ;;  %1407 = vmatmul.mubr.f32.gmra.mrb[106].mxu1 %v5302_v20 }
 0x113   :  { %v603_v24 = vpop.f32.mrb[2].mxu0  ;;  %1415 = vst [vmem:[#allocation2 + $0x18] sm:$0xff] %v826_v16  ;;  %v1792_v39 = vadd.f32 %v1791_v2, %v824_v56 }
 0x114   :  { %1420 = vst [vmem:[#allocation2 + $0x38] sm:$0xff] %v603_v24  ;;  %v605_v49 = vpop.f32.mrb[3].mxu0 }
 0x115   :  { %1421 = vst [vmem:[#allocation2 + $0x40] sm:$0xff] %v605_v49  ;;  %v830_v3 = vpop.f32.mrb[2].mxu1  ;;  %v5515_v11 = vadd.f32 %v1792_v39, %v826_v16  ;;  %v1800_v22 = vadd.f32 %v605_v49, %v603_v24 }
 0x116   :  { %1422 = vst [vmem:[#allocation2 + $0x48] sm:$0xff] %v830_v3  ;;  %v832_v26 = vpop.f32.mrb[3].mxu1 }
 0x117   :  { %v609_v27 = vpop.f32.mrb[4].mxu0  ;;  %1423 = vst [vmem:[#allocation2 + $0x50] sm:$0xff] %v832_v26  ;;  %v1801_v28 = vadd.f32 %v1800_v22, %v830_v3 }
 0x118   :  { %1427 = vst [vmem:[#allocation2 + $0x70] sm:$0xff] %v609_v27  ;;  %v611_v29 = vpop.f32.mrb[5].mxu0 }
 0x119   :  { %1428 = vst [vmem:[#allocation2 + $0x78] sm:$0xff] %v611_v29  ;;  %v836_v31 = vpop.f32.mrb[4].mxu1  ;;  %v5517_v32 = vadd.f32 %v1801_v28, %v832_v26  ;;  %v1809_v33 = vadd.f32 %v611_v29, %v609_v27 }
 0x11a   :  { %1429 = vst [vmem:[#allocation2 + $0x80] sm:$0xff] %v836_v31  ;;  %v838_v35 = vpop.f32.mrb[5].mxu1 }
 0x11b   :  { %v615_v36 = vpop.f32.mrb[6].mxu0  ;;  %1430 = vst [vmem:[#allocation2 + $0x88] sm:$0xff] %v838_v35  ;;  %v1810_v38 = vadd.f32 %v1809_v33, %v836_v31 }
 0x11c   :  { %1434 = vst [vmem:[#allocation2 + $0xa8] sm:$0xff] %v615_v36  ;;  %v617_v40 = vpop.f32.mrb[7].mxu0 }
 0x11d   :  { %1435 = vst [vmem:[#allocation2 + $0xb0] sm:$0xff] %v617_v40  ;;  %v842_v43 = vpop.f32.mrb[6].mxu1  ;;  %v5519_v45 = vadd.f32 %v1810_v38, %v838_v35  ;;  %v1818_v59 = vadd.f32 %v617_v40, %v615_v36 }
 0x11e   :  { %1436 = vst [vmem:[#allocation2 + $0xb8] sm:$0xff] %v842_v43  ;;  %v844_v46 = vpop.f32.mrb[7].mxu1 }
 0x11f   :  { %v621_v48 = vpop.f32.mrb[8].mxu0  ;;  %1437 = vst [vmem:[#allocation2 + $0xc0] sm:$0xff] %v844_v46  ;;  %v1819_v50 = vadd.f32 %v1818_v59, %v842_v43 }
 0x120   :  { %1441 = vst [vmem:[#allocation2 + $0xe0] sm:$0xff] %v621_v48  ;;  %v623_v51 = vpop.f32.mrb[9].mxu0 }
 0x121   :  { %1442 = vst [vmem:[#allocation2 + $0xe8] sm:$0xff] %v623_v51  ;;  %v848_v52 = vpop.f32.mrb[8].mxu1  ;;  %v5521_v54 = vadd.f32 %v1819_v50, %v844_v46  ;;  %v1827_v55 = vadd.f32 %v623_v51, %v621_v48 }
 0x122   :  { %1443 = vst [vmem:[#allocation2 + $0xf0] sm:$0xff] %v848_v52  ;;  %v850_v58 = vpop.f32.mrb[9].mxu1 }
 0x123   :  { %v627_v60 = vpop.f32.mrb[10].mxu0  ;;  %1444 = vst [vmem:[#allocation2 + $0xf8] sm:$0xff] %v850_v58  ;;  %v1828_v61 = vadd.f32 %v1827_v55, %v848_v52 }
 0x124   :  { %1448 = vst [vmem:[#allocation2 + $0x118] sm:$0xff] %v627_v60  ;;  %v629_v62 = vpop.f32.mrb[11].mxu0 }
 0x125   :  { %1449 = vst [vmem:[#allocation2 + $0x120] sm:$0xff] %v629_v62  ;;  %v854_v63 = vpop.f32.mrb[10].mxu1  ;;  %v5523_v4 = vadd.f32 %v1828_v61, %v850_v58  ;;  %v1836_v5 = vadd.f32 %v629_v62, %v627_v60 }
 0x126   :  { %1450 = vst [vmem:[#allocation2 + $0x128] sm:$0xff] %v854_v63  ;;  %v856_v6 = vpop.f32.mrb[11].mxu1 }
 0x127   :  { %v633_v8 = vpop.f32.mrb[12].mxu0  ;;  %1451 = vst [vmem:[#allocation2 + $0x130] sm:$0xff] %v856_v6  ;;  %v1837_v9 = vadd.f32 %v1836_v5, %v854_v63 }
 0x128   :  { %1455 = vst [vmem:[#allocation2 + $0x150] sm:$0xff] %v633_v8  ;;  %v635_v12 = vpop.f32.mrb[13].mxu0 }
 0x129   :  { %1456 = vst [vmem:[#allocation2 + $0x158] sm:$0xff] %v635_v12  ;;  %v860_v13 = vpop.f32.mrb[12].mxu1  ;;  %v5525_v15 = vadd.f32 %v1837_v9, %v856_v6  ;;  %v1845_v17 = vadd.f32 %v635_v12, %v633_v8 }
 0x12a   :  { %1457 = vst [vmem:[#allocation2 + $0x160] sm:$0xff] %v860_v13  ;;  %v862_v18 = vpop.f32.mrb[13].mxu1 }
 0x12b   :  { %v639_v20 = vpop.f32.mrb[14].mxu0  ;;  %1458 = vst [vmem:[#allocation2 + $0x168] sm:$0xff] %v862_v18  ;;  %v1846_v23 = vadd.f32 %v1845_v17, %v860_v13 }
 0x12c   :  { %1462 = vst [vmem:[#allocation2 + $0x188] sm:$0xff] %v639_v20  ;;  %v641_v10 = vpop.f32.mrb[15].mxu0 }
 0x12d   :  { %1463 = vst [vmem:[#allocation2 + $0x190] sm:$0xff] %v641_v10  ;;  %v866_v30 = vpop.f32.mrb[14].mxu1  ;;  %v5527_v41 = vadd.f32 %v1846_v23, %v862_v18  ;;  %v1854_v47 = vadd.f32 %v641_v10, %v639_v20 }
 0x12e   :  { %1464 = vst [vmem:[#allocation2 + $0x198] sm:$0xff] %v866_v30  ;;  %v868_v53 = vpop.f32.mrb[15].mxu1 }
 0x12f   :  { %v645_v1 = vpop.f32.mrb[16].mxu0  ;;  %1465 = vst [vmem:[#allocation2 + $0x1a0] sm:$0xff] %v868_v53  ;;  %v1855_v7 = vadd.f32 %v1854_v47, %v866_v30 }
 0x130   :  { %1469 = vst [vmem:[#allocation2 + $0x1c0] sm:$0xff] %v645_v1  ;;  %v647_v19 = vpop.f32.mrb[17].mxu0 }
 0x131   :  { %1470 = vst [vmem:[#allocation2 + $0x1c8] sm:$0xff] %v647_v19  ;;  %v872_v25 = vpop.f32.mrb[16].mxu1  ;;  %v5529_v37 = vadd.f32 %v1855_v7, %v868_v53  ;;  %v1863_v44 = vadd.f32 %v647_v19, %v645_v1 }
 0x132   :  { %1471 = vst [vmem:[#allocation2 + $0x1d0] sm:$0xff] %v872_v25  ;;  %v874_v57 = vpop.f32.mrb[17].mxu1 }
 0x133   :  { %v651_v0 = vpop.f32.mrb[18].mxu0  ;;  %1472 = vst [vmem:[#allocation2 + $0x1d8] sm:$0xff] %v874_v57  ;;  %v1864_v14 = vadd.f32 %v1863_v44, %v872_v25 }
 0x134   :  { %1476 = vst [vmem:[#allocation2 + $0x1f8] sm:$0xff] %v651_v0  ;;  %v653_v21 = vpop.f32.mrb[19].mxu0 }
 0x135   :  { %1477 = vst [vmem:[#allocation2 + $0x200] sm:$0xff] %v653_v21  ;;  %v878_v34 = vpop.f32.mrb[18].mxu1  ;;  %v5531_v42 = vadd.f32 %v1864_v14, %v874_v57  ;;  %v1872_v56 = vadd.f32 %v653_v21, %v651_v0 }
 0x136   :  { %1478 = vst [vmem:[#allocation2 + $0x208] sm:$0xff] %v878_v34  ;;  %v880_v2 = vpop.f32.mrb[19].mxu1 }
 0x137   :  { %v657_v16 = vpop.f32.mrb[20].mxu0  ;;  %1479 = vst [vmem:[#allocation2 + $0x210] sm:$0xff] %v880_v2  ;;  %v1873_v24 = vadd.f32 %v1872_v56, %v878_v34 }
 0x138   :  { %1483 = vst [vmem:[#allocation2 + $0x230] sm:$0xff] %v657_v16  ;;  %v659_v39 = vpop.f32.mrb[21].mxu0 }
 0x139   :  { %1484 = vst [vmem:[#allocation2 + $0x238] sm:$0xff] %v659_v39  ;;  %v884_v49 = vpop.f32.mrb[20].mxu1  ;;  %v5533_v3 = vadd.f32 %v1873_v24, %v880_v2  ;;  %v1881_v22 = vadd.f32 %v659_v39, %v657_v16 }
 0x13a   :  { %1485 = vst [vmem:[#allocation2 + $0x240] sm:$0xff] %v884_v49  ;;  %v886_v26 = vpop.f32.mrb[21].mxu1 }
 0x13b   :  { %v663_v27 = vpop.f32.mrb[22].mxu0  ;;  %1486 = vst [vmem:[#allocation2 + $0x248] sm:$0xff] %v886_v26  ;;  %v1882_v28 = vadd.f32 %v1881_v22, %v884_v49 }
 0x13c   :  { %1490 = vst [vmem:[#allocation2 + $0x268] sm:$0xff] %v663_v27  ;;  %v665_v29 = vpop.f32.mrb[23].mxu0 }
 0x13d   :  { %1491 = vst [vmem:[#allocation2 + $0x270] sm:$0xff] %v665_v29  ;;  %v890_v31 = vpop.f32.mrb[22].mxu1  ;;  %v5535_v33 = vadd.f32 %v1882_v28, %v886_v26  ;;  %v1890_v35 = vadd.f32 %v665_v29, %v663_v27 }
 0x13e   :  { %1492 = vst [vmem:[#allocation2 + $0x278] sm:$0xff] %v890_v31  ;;  %v892_v36 = vpop.f32.mrb[23].mxu1 }
 0x13f   :  { %v669_v38 = vpop.f32.mrb[24].mxu0  ;;  %1493 = vst [vmem:[#allocation2 + $0x280] sm:$0xff] %v892_v36  ;;  %v1891_v40 = vadd.f32 %v1890_v35, %v890_v31 }
 0x140   :  { %1497 = vst [vmem:[#allocation2 + $0x2a0] sm:$0xff] %v669_v38  ;;  %v671_v43 = vpop.f32.mrb[25].mxu0 }
 0x141   :  { %1498 = vst [vmem:[#allocation2 + $0x2a8] sm:$0xff] %v671_v43  ;;  %v896_v59 = vpop.f32.mrb[24].mxu1  ;;  %v5537_v46 = vadd.f32 %v1891_v40, %v892_v36  ;;  %v1899_v48 = vadd.f32 %v671_v43, %v669_v38 }
 0x142   :  { %1499 = vst [vmem:[#allocation2 + $0x2b0] sm:$0xff] %v896_v59  ;;  %v898_v50 = vpop.f32.mrb[25].mxu1 }
 0x143   :  { %v675_v51 = vpop.f32.mrb[26].mxu0  ;;  %1500 = vst [vmem:[#allocation2 + $0x2b8] sm:$0xff] %v898_v50  ;;  %v1900_v52 = vadd.f32 %v1899_v48, %v896_v59 }
 0x144   :  { %1504 = vst [vmem:[#allocation2 + $0x2d8] sm:$0xff] %v675_v51  ;;  %v677_v55 = vpop.f32.mrb[27].mxu0 }
 0x145   :  { %1505 = vst [vmem:[#allocation2 + $0x2e0] sm:$0xff] %v677_v55  ;;  %v902_v58 = vpop.f32.mrb[26].mxu1  ;;  %v5539_v60 = vadd.f32 %v1900_v52, %v898_v50  ;;  %v1908_v61 = vadd.f32 %v677_v55, %v675_v51 }
 0x146   :  { %1506 = vst [vmem:[#allocation2 + $0x2e8] sm:$0xff] %v902_v58  ;;  %v904_v62 = vpop.f32.mrb[27].mxu1 }
 0x147   :  { %v681_v63 = vpop.f32.mrb[28].mxu0  ;;  %1507 = vst [vmem:[#allocation2 + $0x2f0] sm:$0xff] %v904_v62  ;;  %v1909_v5 = vadd.f32 %v1908_v61, %v902_v58 }
 0x148   :  { %1511 = vst [vmem:[#allocation2 + $0x310] sm:$0xff] %v681_v63  ;;  %v683_v6 = vpop.f32.mrb[29].mxu0 }
 0x149   :  { %1512 = vst [vmem:[#allocation2 + $0x318] sm:$0xff] %v683_v6  ;;  %v908_v8 = vpop.f32.mrb[28].mxu1  ;;  %v5541_v9 = vadd.f32 %v1909_v5, %v904_v62  ;;  %v1917_v12 = vadd.f32 %v683_v6, %v681_v63 }
 0x14a   :  { %1513 = vst [vmem:[#allocation2 + $0x320] sm:$0xff] %v908_v8  ;;  %v910_v13 = vpop.f32.mrb[29].mxu1 }
 0x14b   :  { %v687_v17 = vpop.f32.mrb[30].mxu0  ;;  %1514 = vst [vmem:[#allocation2 + $0x328] sm:$0xff] %v910_v13  ;;  %v1918_v18 = vadd.f32 %v1917_v12, %v908_v8 }
 0x14c   :  { %1518 = vst [vmem:[#allocation2 + $0x348] sm:$0xff] %v687_v17  ;;  %v689_v20 = vpop.f32.mrb[31].mxu0 }
 0x14d   :  { %1519 = vst [vmem:[#allocation2 + $0x350] sm:$0xff] %v689_v20  ;;  %v914_v23 = vpop.f32.mrb[30].mxu1  ;;  %v5543_v10 = vadd.f32 %v1918_v18, %v910_v13  ;;  %v1926_v30 = vadd.f32 %v689_v20, %v687_v17 }
 0x14e   :  { %1520 = vst [vmem:[#allocation2 + $0x358] sm:$0xff] %v914_v23  ;;  %v916_v47 = vpop.f32.mrb[31].mxu1 }
 0x14f   :  { %v693_v53 = vpop.f32.mrb[32].mxu0  ;;  %1521 = vst [vmem:[#allocation2 + $0x360] sm:$0xff] %v916_v47  ;;  %v1927_v1 = vadd.f32 %v1926_v30, %v914_v23 }
 0x150   :  { %1525 = vst [vmem:[#allocation2 + $0x380] sm:$0xff] %v693_v53  ;;  %v695_v7 = vpop.f32.mrb[33].mxu0 }
 0x151   :  { %1526 = vst [vmem:[#allocation2 + $0x388] sm:$0xff] %v695_v7  ;;  %v920_v19 = vpop.f32.mrb[32].mxu1  ;;  %v5545_v25 = vadd.f32 %v1927_v1, %v916_v47  ;;  %v1935_v44 = vadd.f32 %v695_v7, %v693_v53 }
 0x152   :  { %1527 = vst [vmem:[#allocation2 + $0x390] sm:$0xff] %v920_v19  ;;  %v922_v57 = vpop.f32.mrb[33].mxu1 }
 0x153   :  { %v699_v0 = vpop.f32.mrb[34].mxu0  ;;  %1528 = vst [vmem:[#allocation2 + $0x398] sm:$0xff] %v922_v57  ;;  %v1936_v14 = vadd.f32 %v1935_v44, %v920_v19 }
 0x154   :  { %1532 = vst [vmem:[#allocation2 + $0x3b8] sm:$0xff] %v699_v0  ;;  %v701_v21 = vpop.f32.mrb[35].mxu0 }
 0x155   :  { %1533 = vst [vmem:[#allocation2 + $0x3c0] sm:$0xff] %v701_v21  ;;  %v926_v34 = vpop.f32.mrb[34].mxu1  ;;  %v5547_v56 = vadd.f32 %v1936_v14, %v922_v57  ;;  %v1944_v2 = vadd.f32 %v701_v21, %v699_v0 }
 0x156   :  { %1534 = vst [vmem:[#allocation2 + $0x3c8] sm:$0xff] %v926_v34  ;;  %v928_v16 = vpop.f32.mrb[35].mxu1 }
 0x157   :  { %v705_v24 = vpop.f32.mrb[36].mxu0  ;;  %1535 = vst [vmem:[#allocation2 + $0x3d0] sm:$0xff] %v928_v16  ;;  %v1945_v39 = vadd.f32 %v1944_v2, %v926_v34 }
 0x158   :  { %1539 = vst [vmem:[#allocation2 + $0x3f0] sm:$0xff] %v705_v24  ;;  %v707_v49 = vpop.f32.mrb[37].mxu0 }
 0x159   :  { %1540 = vst [vmem:[#allocation2 + $0x3f8] sm:$0xff] %v707_v49  ;;  %v932_v22 = vpop.f32.mrb[36].mxu1  ;;  %v5549_v26 = vadd.f32 %v1945_v39, %v928_v16 }
 0x15a   :  { %1541 = vst [vmem:[#allocation2 + $0x400] sm:$0xff] %v932_v22  ;;  %v5551_v27 = vpop.f32.mrb[37].mxu1 }
 0x15b   :  { %v711_v28 = vpop.f32.mrb[38].mxu0  ;;  %1542 = vst [vmem:[#allocation2 + $0x408] sm:$0xff] %v5551_v27 }
 0x15c   :  { %1546 = vst [vmem:[#allocation2 + $0x428] sm:$0xff] %v711_v28  ;;  %v713_v29 = vpop.f32.mrb[39].mxu0 }
 0x15d   :  { %1547 = vst [vmem:[#allocation2 + $0x430] sm:$0xff] %v713_v29  ;;  %v938_v31 = vpop.f32.mrb[38].mxu1 }
 0x15e   :  { %1548 = vst [vmem:[#allocation2 + $0x438] sm:$0xff] %v938_v31  ;;  %v940_v35 = vpop.f32.mrb[39].mxu1 }
 0x15f   :  { %v717_v36 = vpop.f32.mrb[40].mxu0  ;;  %1549 = vst [vmem:[#allocation2 + $0x440] sm:$0xff] %v940_v35 }
 0x160   :  { %1553 = vst [vmem:[#allocation2 + $0x460] sm:$0xff] %v717_v36  ;;  %v719_v38 = vpop.f32.mrb[41].mxu0 }
 0x161   :  { %1554 = vst [vmem:[#allocation2 + $0x468] sm:$0xff] %v719_v38  ;;  %v944_v40 = vpop.f32.mrb[40].mxu1 }
 0x162   :  { %1555 = vst [vmem:[#allocation2 + $0x470] sm:$0xff] %v944_v40  ;;  %v946_v43 = vpop.f32.mrb[41].mxu1 }
 0x163   :  { %v723_v59 = vpop.f32.mrb[42].mxu0  ;;  %1556 = vst [vmem:[#allocation2 + $0x478] sm:$0xff] %v946_v43 }
 0x164   :  { %1560 = vst [vmem:[#allocation2 + $0x498] sm:$0xff] %v723_v59  ;;  %v725_v48 = vpop.f32.mrb[43].mxu0 }
 0x165   :  { %1561 = vst [vmem:[#allocation2 + $0x4a0] sm:$0xff] %v725_v48  ;;  %v950_v50 = vpop.f32.mrb[42].mxu1 }
 0x166   :  { %1562 = vst [vmem:[#allocation2 + $0x4a8] sm:$0xff] %v950_v50  ;;  %v952_v51 = vpop.f32.mrb[43].mxu1 }
 0x167   :  { %v729_v52 = vpop.f32.mrb[44].mxu0  ;;  %1563 = vst [vmem:[#allocation2 + $0x4b0] sm:$0xff] %v952_v51 }
 0x168   :  { %1567 = vst [vmem:[#allocation2 + $0x4d0] sm:$0xff] %v729_v52  ;;  %v731_v55 = vpop.f32.mrb[45].mxu0 }
 0x169   :  { %1568 = vst [vmem:[#allocation2 + $0x4d8] sm:$0xff] %v731_v55  ;;  %v956_v58 = vpop.f32.mrb[44].mxu1 }
 0x16a   :  { %1569 = vst [vmem:[#allocation2 + $0x4e0] sm:$0xff] %v956_v58  ;;  %v958_v61 = vpop.f32.mrb[45].mxu1 }
 0x16b   :  { %v735_v62 = vpop.f32.mrb[46].mxu0  ;;  %1570 = vst [vmem:[#allocation2 + $0x4e8] sm:$0xff] %v958_v61 }
 0x16c   :  { %1574 = vst [vmem:[#allocation2 + $0x508] sm:$0xff] %v735_v62  ;;  %v737_v63 = vpop.f32.mrb[47].mxu0 }
 0x16d   :  { %1575 = vst [vmem:[#allocation2 + $0x510] sm:$0xff] %v737_v63  ;;  %v962_v5 = vpop.f32.mrb[46].mxu1 }
 0x16e   :  { %1576 = vst [vmem:[#allocation2 + $0x518] sm:$0xff] %v962_v5  ;;  %v964_v6 = vpop.f32.mrb[47].mxu1 }
 0x16f   :  { %v741_v8 = vpop.f32.mrb[48].mxu0  ;;  %1577 = vst [vmem:[#allocation2 + $0x520] sm:$0xff] %v964_v6 }
 0x170   :  { %1581 = vst [vmem:[#allocation2 + $0x540] sm:$0xff] %v741_v8  ;;  %v743_v12 = vpop.f32.mrb[49].mxu0 }
 0x171   :  { %1582 = vst [vmem:[#allocation2 + $0x548] sm:$0xff] %v743_v12  ;;  %v968_v13 = vpop.f32.mrb[48].mxu1 }
 0x172   :  { %1583 = vst [vmem:[#allocation2 + $0x550] sm:$0xff] %v968_v13  ;;  %v970_v17 = vpop.f32.mrb[49].mxu1 }
 0x173   :  { %v747_v18 = vpop.f32.mrb[50].mxu0  ;;  %1584 = vst [vmem:[#allocation2 + $0x558] sm:$0xff] %v970_v17 }
 0x174   :  { %1588 = vst [vmem:[#allocation2 + $0x578] sm:$0xff] %v747_v18  ;;  %v749_v20 = vpop.f32.mrb[51].mxu0 }
 0x175   :  { %1589 = vst [vmem:[#allocation2 + $0x580] sm:$0xff] %v749_v20  ;;  %v974_v23 = vpop.f32.mrb[50].mxu1 }
 0x176   :  { %1590 = vst [vmem:[#allocation2 + $0x588] sm:$0xff] %v974_v23  ;;  %v976_v30 = vpop.f32.mrb[51].mxu1 }
 0x177   :  { %v753_v47 = vpop.f32.mrb[52].mxu0  ;;  %1591 = vst [vmem:[#allocation2 + $0x590] sm:$0xff] %v976_v30 }
 0x178   :  { %1595 = vst [vmem:[#allocation2 + $0x5b0] sm:$0xff] %v753_v47  ;;  %v755_v53 = vpop.f32.mrb[53].mxu0 }
 0x179   :  { %1596 = vst [vmem:[#allocation2 + $0x5b8] sm:$0xff] %v755_v53  ;;  %v980_v1 = vpop.f32.mrb[52].mxu1 }
 0x17a   :  { %1597 = vst [vmem:[#allocation2 + $0x5c0] sm:$0xff] %v980_v1  ;;  %v982_v7 = vpop.f32.mrb[53].mxu1 }
 0x17b   :  { %1598 = vst [vmem:[#allocation2 + $0x5c8] sm:$0xff] %v982_v7  ;;  %v5554_v19 = vpop.f32.mrb[54].mxu0 }
 0x17c   :  { %v5556_v44 = vpop.f32.mrb[55].mxu0  ;;  %v1794_v57 = vadd.f32 %v5515_v11, %v5554_v19 }
 0x17d   :  { %v1278_v0 = vpop.f32.mrb[54].mxu1 }
 0x17e   :  { %1419 = vst.msk [vmem:[#allocation2 + $0x30] sm:$0xff] %vm1418_vm1, %v1278_v0  ;;  %v1280_v14 = vpop.f32.mrb[55].mxu1  ;;  %v1795_v21 = vadd.f32 %v1794_v57, %v5556_v44 }
 0x17f   :  { %v5562_v34 = vpop.f32.mrb[56].mxu0 }
 0x180   :  { %v5564_v2 = vpop.f32.mrb[57].mxu0  ;;  %v1803_v16 = vadd.f32 %v5517_v32, %v5562_v34 }
 0x181   :  { %v1283_v24 = vpop.f32.mrb[56].mxu1 }
 0x182   :  { %1426 = vst.msk [vmem:[#allocation2 + $0x68] sm:$0xff] %vm1418_vm1, %v1283_v24  ;;  %v1285_v39 = vpop.f32.mrb[57].mxu1  ;;  %v1804_v49 = vadd.f32 %v1803_v16, %v5564_v2 }
 0x183   :  { %v5570_v11 = vpop.f32.mrb[58].mxu0 }
 0x184   :  { %v5572_v22 = vpop.f32.mrb[59].mxu0  ;;  %v1812_v28 = vadd.f32 %v5519_v45, %v5570_v11 }
 0x185   :  { %v1288_v29 = vpop.f32.mrb[58].mxu1  ;;  %v5576_v31 = vld [vmem:[#allocation2 + $0x30] sm:$0xff] }
 0x186   :  { %1433 = vst.msk [vmem:[#allocation2 + $0xa0] sm:$0xff] %vm1418_vm1, %v1288_v29  ;;  %v1290_v35 = vpop.f32.mrb[59].mxu1  ;;  %v1796_v32 = vsel %vm1418_vm1, %v5576_v31, 0.0  ;;  %v1813_v36 = vadd.f32 %v1812_v28, %v5572_v22 }
 0x187   :  { %v5582_v38 = vpop.f32.mrb[60].mxu0  ;;  %v1797_v40 = vadd.f32 %v1796_v32, %v1795_v21 }
 0x188   :  { %v5584_v43 = vpop.f32.mrb[61].mxu0  ;;  %v1821_v59 = vadd.f32 %v5521_v54, %v5582_v38 }
 0x189   :  { %v1293_v45 = vpop.f32.mrb[60].mxu1  ;;  %1798 = vadd.xlane.f32.xlu0 %v1797_v40  ;;  %v5588_v48 = vld [vmem:[#allocation2 + $0x68] sm:$0xff] }
 0x18a   :  { %1440 = vst.msk [vmem:[#allocation2 + $0xd8] sm:$0xff] %vm1418_vm1, %v1293_v45  ;;  %v1295_v50 = vpop.f32.mrb[61].mxu1  ;;  %v1805_v51 = vsel %vm1418_vm1, %v5588_v48, 0.0  ;;  %v1822_v52 = vadd.f32 %v1821_v59, %v5584_v43 }
 0x18b   :  { %v5594_v55 = vpop.f32.mrb[62].mxu0  ;;  %v1806_v58 = vadd.f32 %v1805_v51, %v1804_v49 }
 0x18c   :  { %v5596_v61 = vpop.f32.mrb[63].mxu0  ;;  %v1830_v54 = vadd.f32 %v5523_v4, %v5594_v55 }
 0x18d   :  { %v1298_v62 = vpop.f32.mrb[62].mxu1  ;;  %1807 = vadd.xlane.f32.xlu0 %v1806_v58  ;;  %v5600_v63 = vld [vmem:[#allocation2 + $0xa0] sm:$0xff] }
 0x18e   :  { %1447 = vst.msk [vmem:[#allocation2 + $0x110] sm:$0xff] %vm1418_vm1, %v1298_v62  ;;  %v1300_v5 = vpop.f32.mrb[63].mxu1  ;;  %v1814_v6 = vsel %vm1418_vm1, %v5600_v63, 0.0  ;;  %v1831_v8 = vadd.f32 %v1830_v54, %v5596_v61 }
 0x18f   :  { %v5606_v12 = vpop.f32.mrb[64].mxu0  ;;  %v1815_v13 = vadd.f32 %v1814_v6, %v1813_v36 }
 0x190   :  { %v5608_v17 = vpop.f32.mrb[65].mxu0  ;;  %v1839_v4 = vadd.f32 %v5525_v15, %v5606_v12 }
 0x191   :  { %v1303_v18 = vpop.f32.mrb[64].mxu1  ;;  %1816 = vadd.xlane.f32.xlu1 %v1815_v13  ;;  %v5612_v20 = vld [vmem:[#allocation2 + $0xd8] sm:$0xff] }
 0x192   :  { %1454 = vst.msk [vmem:[#allocation2 + $0x148] sm:$0xff] %vm1418_vm1, %v1303_v18  ;;  %v1305_v23 = vpop.f32.mrb[65].mxu1  ;;  %v1823_v30 = vsel %vm1418_vm1, %v5612_v20, 0.0  ;;  %v1840_v47 = vadd.f32 %v1839_v4, %v5608_v17 }
 0x193   :  { %v5618_v53 = vpop.f32.mrb[66].mxu0  ;;  %v1824_v1 = vadd.f32 %v1823_v30, %v1822_v52 }
 0x194   :  { %v1089_v7 = vpop.f32.mrb[67].mxu0  ;;  %v1848_v57 = vadd.f32 %v5527_v41, %v5618_v53 }
 0x195   :  { %1460 = vst [vmem:[#allocation2 + $0x178] sm:$0xff] %v1089_v7  ;;  %v1308_v15 = vpop.f32.mrb[66].mxu1  ;;  %1825 = vadd.xlane.f32.xlu1 %v1824_v1  ;;  %v5622_v0 = vld [vmem:[#allocation2 + $0x110] sm:$0xff] }
 0x196   :  { %1461 = vst.msk [vmem:[#allocation2 + $0x180] sm:$0xff] %vm1418_vm1, %v1308_v15  ;;  %v1310_v14 = vpop.f32.mrb[67].mxu1  ;;  %v1832_v21 = vsel %vm1418_vm1, %v5622_v0, 0.0  ;;  %v1849_v16 = vadd.f32 %v1848_v57, %v1089_v7 }
 0x197   :  { %v1093_v24 = vpop.f32.mrb[68].mxu0  ;;  %v1833_v39 = vadd.f32 %v1832_v21, %v1831_v8 }
 0x198   :  { %1466 = vst [vmem:[#allocation2 + $0x1a8] sm:$0xff] %v1093_v24  ;;  %v1095_v49 = vpop.f32.mrb[69].mxu0  ;;  %v1857_v28 = vadd.f32 %v5529_v37, %v1093_v24 }
 0x199   :  { %1467 = vst [vmem:[#allocation2 + $0x1b0] sm:$0xff] %v1095_v49  ;;  %v1313_v41 = vpop.f32.mrb[68].mxu1  ;;  %1834 = vadd.xlane.f32.xlu0 %v1833_v39  ;;  %v5628_v29 = vld [vmem:[#allocation2 + $0x148] sm:$0xff] }
 0x19a   :  { %1468 = vst.msk [vmem:[#allocation2 + $0x1b8] sm:$0xff] %vm1418_vm1, %v1313_v41  ;;  %v1315_v35 = vpop.f32.mrb[69].mxu1  ;;  %v1841_v32 = vsel %vm1418_vm1, %v5628_v29, 0.0  ;;  %v1858_v36 = vadd.f32 %v1857_v28, %v1095_v49 }
 0x19b   :  { %v1099_v40 = vpop.f32.mrb[70].mxu0  ;;  %v1842_v59 = vadd.f32 %v1841_v32, %v1840_v47 }
 0x19c   :  { %1473 = vst [vmem:[#allocation2 + $0x1e0] sm:$0xff] %v1099_v40  ;;  %v1101_v45 = vpop.f32.mrb[71].mxu0  ;;  %v1866_v50 = vadd.f32 %v5531_v42, %v1099_v40 }
 0x19d   :  { %1474 = vst [vmem:[#allocation2 + $0x1e8] sm:$0xff] %v1101_v45  ;;  %v1318_v37 = vpop.f32.mrb[70].mxu1  ;;  %1843 = vadd.xlane.f32.xlu1 %v1842_v59  ;;  %v5634_v51 = vld [vmem:[#allocation2 + $0x180] sm:$0xff] }
 0x19e   :  { %1475 = vst.msk [vmem:[#allocation2 + $0x1f0] sm:$0xff] %vm1418_vm1, %v1318_v37  ;;  %v1320_v52 = vpop.f32.mrb[71].mxu1  ;;  %v1850_v58 = vsel %vm1418_vm1, %v5634_v51, 0.0  ;;  %v1867_v54 = vadd.f32 %v1866_v50, %v1101_v45 }
 0x19f   :  { %v1105_v62 = vpop.f32.mrb[72].mxu0  ;;  %v1851_v5 = vadd.f32 %v1850_v58, %v1849_v16 }
 0x1a0   :  { %1480 = vst [vmem:[#allocation2 + $0x218] sm:$0xff] %v1105_v62  ;;  %v1107_v6 = vpop.f32.mrb[73].mxu0  ;;  %v1875_v8 = vadd.f32 %v5533_v3, %v1105_v62 }
 0x1a1   :  { %1481 = vst [vmem:[#allocation2 + $0x220] sm:$0xff] %v1107_v6  ;;  %v1323_v42 = vpop.f32.mrb[72].mxu1  ;;  %1852 = vadd.xlane.f32.xlu0 %v1851_v5  ;;  %v5640_v13 = vld [vmem:[#allocation2 + $0x1b8] sm:$0xff] }
 0x1a2   :  { %1482 = vst.msk [vmem:[#allocation2 + $0x228] sm:$0xff] %vm1418_vm1, %v1323_v42  ;;  %v1325_v4 = vpop.f32.mrb[73].mxu1  ;;  %v1859_v18 = vsel %vm1418_vm1, %v5640_v13, 0.0  ;;  %v1876_v23 = vadd.f32 %v1875_v8, %v1107_v6 }
 0x1a3   :  { %v1111_v30 = vpop.f32.mrb[74].mxu0  ;;  %v1860_v47 = vadd.f32 %v1859_v18, %v1858_v36 }
 0x1a4   :  { %1487 = vst [vmem:[#allocation2 + $0x250] sm:$0xff] %v1111_v30  ;;  %v1113_v1 = vpop.f32.mrb[75].mxu0  ;;  %v1884_v7 = vadd.f32 %v5535_v33, %v1111_v30 }
 0x1a5   :  { %1488 = vst [vmem:[#allocation2 + $0x258] sm:$0xff] %v1113_v1  ;;  %v1328_v3 = vpop.f32.mrb[74].mxu1  ;;  %1861 = vadd.xlane.f32.xlu1 %v1860_v47  ;;  %v5646_v57 = vld [vmem:[#allocation2 + $0x1f0] sm:$0xff] }
 0x1a6   :  { %1489 = vst.msk [vmem:[#allocation2 + $0x260] sm:$0xff] %vm1418_vm1, %v1328_v3  ;;  %v1330_v15 = vpop.f32.mrb[75].mxu1  ;;  %v1868_v14 = vsel %vm1418_vm1, %v5646_v57, 0.0  ;;  %v1885_v21 = vadd.f32 %v1884_v7, %v1113_v1 }
 0x1a7   :  { %v1117_v16 = vpop.f32.mrb[76].mxu0  ;;  %v1869_v24 = vadd.f32 %v1868_v14, %v1867_v54 }
 0x1a8   :  { %1494 = vst [vmem:[#allocation2 + $0x288] sm:$0xff] %v1117_v16  ;;  %v1119_v39 = vpop.f32.mrb[77].mxu0  ;;  %v1893_v49 = vadd.f32 %v5537_v46, %v1117_v16  ;;  %v1729_v16 = vld [vmem:[#allocation2 + $0x3f8] sm:$0xff] }
 0x1a9   :  { %1495 = vst [vmem:[#allocation2 + $0x290] sm:$0xff] %v1119_v39  ;;  %v1333_v33 = vpop.f32.mrb[76].mxu1  ;;  %1870 = vadd.xlane.f32.xlu0 %v1869_v24  ;;  %v1671_v28 = vld [vmem:[#allocation2 + $0x228] sm:$0xff] }
 0x1aa   :  { %1496 = vst.msk [vmem:[#allocation2 + $0x298] sm:$0xff] %vm1418_vm1, %v1333_v33  ;;  %v1335_v41 = vpop.f32.mrb[77].mxu1  ;;  %v1877_v35 = vsel %vm1418_vm1, %v1671_v28, 0.0  ;;  %v1894_v32 = vadd.f32 %v1893_v49, %v1119_v39 }
 0x1ab   :  { %v1123_v36 = vpop.f32.mrb[78].mxu0  ;;  %v1878_v40 = vadd.f32 %v1877_v35, %v1876_v23 }
 0x1ac   :  { %1501 = vst [vmem:[#allocation2 + $0x2c0] sm:$0xff] %v1123_v36  ;;  %v1125_v59 = vpop.f32.mrb[79].mxu0  ;;  %v1902_v45 = vadd.f32 %v5539_v60, %v1123_v36 }
 0x1ad   :  { %1502 = vst [vmem:[#allocation2 + $0x2c8] sm:$0xff] %v1125_v59  ;;  %v1338_v50 = vpop.f32.mrb[78].mxu1  ;;  %1879 = vadd.xlane.f32.xlu1 %v1878_v40  ;;  %v1678_v46 = vld [vmem:[#allocation2 + $0x260] sm:$0xff] }
 0x1ae   :  { %1503 = vst.msk [vmem:[#allocation2 + $0x2d0] sm:$0xff] %vm1418_vm1, %v1338_v50  ;;  %v1340_v37 = vpop.f32.mrb[79].mxu1  ;;  %v1886_v52 = vsel %vm1418_vm1, %v1678_v46, 0.0  ;;  %v1903_v58 = vadd.f32 %v1902_v45, %v1125_v59  ;;  %v1735_v45 = vld [vmem:[#allocation2 + $0x428] sm:$0xff]  ;;  %v1736_v50 = vld [vmem:[#allocation2 + $0x430] sm:$0xff] }
 0x1af   :  { %v1129_v54 = vpop.f32.mrb[80].mxu0  ;;  %v1887_v62 = vadd.f32 %v1886_v52, %v1885_v21  ;;  %v1728_v21 = vld [vmem:[#allocation2 + $0x3f0] sm:$0xff] }
 0x1b0   :  { %1508 = vst [vmem:[#allocation2 + $0x2f8] sm:$0xff] %v1129_v54  ;;  %v1131_v5 = vpop.f32.mrb[81].mxu0  ;;  %v1911_v6 = vadd.f32 %v5541_v9, %v1129_v54  ;;  %v1953_v41 = vadd.f32 %v1729_v16, %v1728_v21  ;;  %v1749_v16 = vld [vmem:[#allocation2 + $0x498] sm:$0xff] }
 0x1b1   :  { %1509 = vst [vmem:[#allocation2 + $0x300] sm:$0xff] %v1131_v5  ;;  %v1343_v8 = vpop.f32.mrb[80].mxu1  ;;  %1888 = vadd.xlane.f32.xlu0 %v1887_v62  ;;  %v1685_v60 = vld [vmem:[#allocation2 + $0x298] sm:$0xff] }
 0x1b2   :  { %1510 = vst.msk [vmem:[#allocation2 + $0x308] sm:$0xff] %vm1418_vm1, %v1343_v8  ;;  %v1345_v42 = vpop.f32.mrb[81].mxu1  ;;  %v1895_v4 = vsel %vm1418_vm1, %v1685_v60, 0.0  ;;  %v1912_v18 = vadd.f32 %v1911_v6, %v1131_v5  ;;  %v1962_v8 = vadd.f32 %v1736_v50, %v1735_v45 }
 0x1b3   :  { %v1135_v23 = vpop.f32.mrb[82].mxu0  ;;  %v1896_v30 = vadd.f32 %v1895_v4, %v1894_v32  ;;  %v1742_v4 = vld [vmem:[#allocation2 + $0x460] sm:$0xff] }
 0x1b4   :  { %1515 = vst [vmem:[#allocation2 + $0x330] sm:$0xff] %v1135_v23  ;;  %v1137_v47 = vpop.f32.mrb[83].mxu0  ;;  %v1920_v1 = vadd.f32 %v5543_v10, %v1135_v23 }
 0x1b5   :  { %1516 = vst [vmem:[#allocation2 + $0x338] sm:$0xff] %v1137_v47  ;;  %v1348_v7 = vpop.f32.mrb[82].mxu1  ;;  %1897 = vadd.xlane.f32.xlu1 %v1896_v30  ;;  %v1692_v9 = vld [vmem:[#allocation2 + $0x2d0] sm:$0xff] }
 0x1b6   :  { %1517 = vst.msk [vmem:[#allocation2 + $0x340] sm:$0xff] %vm1418_vm1, %v1348_v7  ;;  %v1350_v3 = vpop.f32.mrb[83].mxu1  ;;  %v1904_v15 = vsel %vm1418_vm1, %v1692_v9, 0.0  ;;  %v1921_v14 = vadd.f32 %v1920_v1, %v1137_v47  ;;  %v1737_v7 = vld [vmem:[#allocation2 + $0x438] sm:$0xff] }
 0x1b7   :  { %v1141_v24 = vpop.f32.mrb[84].mxu0  ;;  %v1905_v39 = vadd.f32 %v1904_v15, %v1903_v58 }
 0x1b8   :  { %1522 = vst [vmem:[#allocation2 + $0x368] sm:$0xff] %v1141_v24  ;;  %v1143_v49 = vpop.f32.mrb[85].mxu0  ;;  %v1929_v33 = vadd.f32 %v5545_v25, %v1141_v24  ;;  %v1730_v25 = vld [vmem:[#allocation2 + $0x400] sm:$0xff] }
 0x1b9   :  { %1523 = vst [vmem:[#allocation2 + $0x370] sm:$0xff] %v1143_v49  ;;  %v1353_v10 = vpop.f32.mrb[84].mxu1  ;;  %1906 = vadd.xlane.f32.xlu0 %v1905_v39  ;;  %v1699_v28 = vld [vmem:[#allocation2 + $0x308] sm:$0xff]  ;;  %v1954_v54 = vadd.f32 %v1953_v41, %v1730_v25  ;;  %v1750_v24 = vld [vmem:[#allocation2 + $0x4a0] sm:$0xff]  ;;  %v1744_v41 = vld [vmem:[#allocation2 + $0x470] sm:$0xff] }
 0x1ba   :  { %1524 = vst.msk [vmem:[#allocation2 + $0x378] sm:$0xff] %vm1418_vm1, %v1353_v10  ;;  %v1355_v35 = vpop.f32.mrb[85].mxu1  ;;  %v1913_v32 = vsel %vm1418_vm1, %v1699_v28, 0.0  ;;  %v1930_v36 = vadd.f32 %v1929_v33, %v1143_v49  ;;  %v1738_v28 = vld [vmem:[#allocation2 + $0x440] sm:$0xff]  ;;  %v1757_v25 = vld [vmem:[#allocation2 + $0x4d8] sm:$0xff] }
 0x1bb   :  { %v1147_v40 = vpop.f32.mrb[86].mxu0  ;;  %v1914_v59 = vadd.f32 %v1913_v32, %v1912_v18  ;;  %v1743_v18 = vld [vmem:[#allocation2 + $0x468] sm:$0xff]  ;;  %v1955_v1 = vadd.f32 %v1954_v54, %v5551_v27  ;;  %v1980_v35 = vadd.f32 %v1750_v24, %v1749_v16  ;;  %v1758_v24 = vld [vmem:[#allocation2 + $0x4e0] sm:$0xff] }
 0x1bc   :  { %1529 = vst [vmem:[#allocation2 + $0x3a0] sm:$0xff] %v1147_v40  ;;  %v1149_v46 = vpop.f32.mrb[87].mxu0  ;;  %v1938_v37 = vadd.f32 %v5547_v56, %v1147_v40  ;;  %v1971_v21 = vadd.f32 %v1743_v18, %v1742_v4  ;;  %v1751_v54 = vld [vmem:[#allocation2 + $0x4a8] sm:$0xff] }
 0x1bd   :  { %1530 = vst [vmem:[#allocation2 + $0x3a8] sm:$0xff] %v1149_v46  ;;  %v1358_v52 = vpop.f32.mrb[86].mxu1  ;;  %1915 = vadd.xlane.f32.xlu1 %v1914_v59  ;;  %v1706_v58 = vld [vmem:[#allocation2 + $0x340] sm:$0xff] }
 0x1be   :  { %1531 = vst.msk [vmem:[#allocation2 + $0x3b0] sm:$0xff] %vm1418_vm1, %v1358_v52  ;;  %v1360_v62 = vpop.f32.mrb[87].mxu1  ;;  %v1922_v5 = vsel %vm1418_vm1, %v1706_v58, 0.0  ;;  %v1939_v6 = vadd.f32 %v1938_v37, %v1149_v46  ;;  %v1972_v50 = vadd.f32 %v1971_v21, %v1744_v41  ;;  %v1756_v37 = vld [vmem:[#allocation2 + $0x4d0] sm:$0xff] }
 0x1bf   :  { %v1153_v60 = vpop.f32.mrb[88].mxu0  ;;  %v1923_v42 = vadd.f32 %v1922_v5, %v1921_v14  ;;  %v1963_v14 = vadd.f32 %v1962_v8, %v1737_v7  ;;  %v1745_v8 = vld [vmem:[#allocation2 + $0x478] sm:$0xff] }
 0x1c0   :  { %1536 = vst [vmem:[#allocation2 + $0x3d8] sm:$0xff] %v1153_v60  ;;  %v1155_v23 = vpop.f32.mrb[89].mxu0  ;;  %v1947_v56 = vadd.f32 %v5549_v26, %v1153_v60  ;;  %v1981_v60 = vadd.f32 %v1980_v35, %v1751_v54 }
 0x1c1   :  { %1537 = vst [vmem:[#allocation2 + $0x3e0] sm:$0xff] %v1155_v23  ;;  %v1363_v30 = vpop.f32.mrb[88].mxu1  ;;  %1924 = vadd.xlane.f32.xlu0 %v1923_v42  ;;  %v1713_v47 = vld [vmem:[#allocation2 + $0x378] sm:$0xff]  ;;  %v1964_v45 = vadd.f32 %v1963_v14, %v1738_v28 }
 0x1c2   :  { %1538 = vst.msk [vmem:[#allocation2 + $0x3e8] sm:$0xff] %vm1418_vm1, %v1363_v30  ;;  %v1365_v9 = vpop.f32.mrb[89].mxu1  ;;  %v1931_v3 = vsel %vm1418_vm1, %v1713_v47, 0.0  ;;  %v1948_v15 = vadd.f32 %v1947_v56, %v1155_v23  ;;  %v1973_v23 = vadd.f32 %v1972_v50, %v1745_v8  ;;  %v1763_v47 = vld [vmem:[#allocation2 + $0x508] sm:$0xff]  ;;  %v1778_v8 = vld [vmem:[#allocation2 + $0x580] sm:$0xff] }
 0x1c3   :  { %v1159_v39 = vpop.f32.mrb[90].mxu0  ;;  %v1932_v49 = vadd.f32 %v1931_v3, %v1930_v36  ;;  %v1752_v3 = vld [vmem:[#allocation2 + $0x4b0] sm:$0xff]  ;;  %v1759_v50 = vld [vmem:[#allocation2 + $0x4e8] sm:$0xff] }
 0x1c4   :  { %1543 = vst [vmem:[#allocation2 + $0x410] sm:$0xff] %v1159_v39  ;;  %v1161_v26 = vpop.f32.mrb[91].mxu0  ;;  %v1956_v33 = vadd.f32 %v1955_v1, %v1159_v39  ;;  %v1764_v1 = vld [vmem:[#allocation2 + $0x510] sm:$0xff]  ;;  %v1982_v16 = vadd.f32 %v1981_v60, %v1752_v3 }
 0x1c5   :  { %1544 = vst [vmem:[#allocation2 + $0x418] sm:$0xff] %v1161_v26  ;;  %v1368_v10 = vpop.f32.mrb[90].mxu1  ;;  %1933 = vadd.xlane.f32.xlu1 %v1932_v49  ;;  %v1720_v27 = vld [vmem:[#allocation2 + $0x3b0] sm:$0xff] }
 0x1c6   :  { %1545 = vst.msk [vmem:[#allocation2 + $0x420] sm:$0xff] %vm1418_vm1, %v1368_v10  ;;  %v1370_v32 = vpop.f32.mrb[91].mxu1  ;;  %v1940_v40 = vsel %vm1418_vm1, %v1720_v27, 0.0  ;;  %v1957_v59 = vadd.f32 %v1956_v33, %v1161_v26  ;;  %v1770_v10 = vld [vmem:[#allocation2 + $0x540] sm:$0xff]  ;;  %v1771_v27 = vld [vmem:[#allocation2 + $0x548] sm:$0xff] }
 0x1c7   :  { %v1165_v46 = vpop.f32.mrb[92].mxu0  ;;  %v1941_v36 = vadd.f32 %v1940_v40, %v1939_v6  ;;  %v1989_v6 = vadd.f32 %v1757_v25, %v1756_v37 }
 0x1c8   :  { %1550 = vst [vmem:[#allocation2 + $0x448] sm:$0xff] %v1165_v46  ;;  %v1167_v52 = vpop.f32.mrb[93].mxu0  ;;  %v1965_v58 = vadd.f32 %v1964_v45, %v1165_v46  ;;  %v1765_v46 = vld [vmem:[#allocation2 + $0x518] sm:$0xff] }
 0x1c9   :  { %1551 = vst [vmem:[#allocation2 + $0x450] sm:$0xff] %v1167_v52  ;;  %v1373_v62 = vpop.f32.mrb[92].mxu1  ;;  %1942 = vadd.xlane.f32.xlu0 %v1941_v36  ;;  %v1727_v5 = vld [vmem:[#allocation2 + $0x3e8] sm:$0xff]  ;;  %v1990_v33 = vadd.f32 %v1989_v6, %v1758_v24  ;;  %v2007_v36 = vadd.f32 %v1771_v27, %v1770_v10 }
 0x1ca   :  { %1552 = vst.msk [vmem:[#allocation2 + $0x458] sm:$0xff] %vm1418_vm1, %v1373_v62  ;;  %v1375_v42 = vpop.f32.mrb[93].mxu1  ;;  %v1949_v4 = vsel %vm1418_vm1, %v1727_v5, 0.0  ;;  %v1966_v18 = vadd.f32 %v1965_v58, %v1167_v52  ;;  %v1777_v5 = vld [vmem:[#allocation2 + $0x578] sm:$0xff]  ;;  %v1779_v27 = vld [vmem:[#allocation2 + $0x588] sm:$0xff] }
 0x1cb   :  { %v1171_v56 = vpop.f32.mrb[94].mxu0  ;;  %v1950_v30 = vadd.f32 %v1949_v4, %v1948_v15  ;;  %v1998_v15 = vadd.f32 %v1764_v1, %v1763_v47  ;;  %v1991_v58 = vadd.f32 %v1990_v33, %v1759_v50  ;;  %v1772_v4 = vld [vmem:[#allocation2 + $0x550] sm:$0xff] }
 0x1cc   :  { %1557 = vst [vmem:[#allocation2 + $0x480] sm:$0xff] %v1171_v56  ;;  %v1173_v7 = vpop.f32.mrb[95].mxu0  ;;  %v1974_v9 = vadd.f32 %v1973_v23, %v1171_v56  ;;  %v1766_v56 = vld [vmem:[#allocation2 + $0x520] sm:$0xff] }
 0x1cd   :  { %1558 = vst [vmem:[#allocation2 + $0x488] sm:$0xff] %v1173_v7  ;;  %v1378_v14 = vpop.f32.mrb[94].mxu1  ;;  %1951 = vadd.xlane.f32.xlu1 %v1950_v30  ;;  %v1734_v21 = vld [vmem:[#allocation2 + $0x420] sm:$0xff]  ;;  %v1999_v54 = vadd.f32 %v1998_v15, %v1765_v46  ;;  %v2008_v30 = vadd.f32 %v2007_v36, %v1772_v4 }
 0x1ce   :  { %1559 = vst.msk [vmem:[#allocation2 + $0x490] sm:$0xff] %vm1418_vm1, %v1378_v14  ;;  %v1380_v39 = vpop.f32.mrb[95].mxu1  ;;  %v1958_v49 = vsel %vm1418_vm1, %v1734_v21, 0.0  ;;  %v1975_v26 = vadd.f32 %v1974_v9, %v1173_v7  ;;  %v1784_v21 = vld [vmem:[#allocation2 + $0x5b0] sm:$0xff] }
 0x1cf   :  { %v1177_v28 = vpop.f32.mrb[96].mxu0  ;;  %v1959_v41 = vadd.f32 %v1958_v49, %v1957_v59  ;;  %v2000_v9 = vadd.f32 %v1999_v54, %v1766_v56  ;;  %v1773_v49 = vld [vmem:[#allocation2 + $0x558] sm:$0xff]  ;;  %v1787_v56 = vld [vmem:[#allocation2 + $0x5c8] sm:$0xff] }
 0x1d0   :  { %1564 = vst [vmem:[#allocation2 + $0x4b8] sm:$0xff] %v1177_v28  ;;  %v1179_v35 = vpop.f32.mrb[97].mxu0  ;;  %v1983_v32 = vadd.f32 %v1982_v16, %v1177_v28  ;;  %v1785_v16 = vld [vmem:[#allocation2 + $0x5b8] sm:$0xff]  ;;  %v2009_v10 = vadd.f32 %v2008_v30, %v1773_v49 }
 0x1d1   :  { %1565 = vst [vmem:[#allocation2 + $0x4c0] sm:$0xff] %v1179_v35  ;;  %v1383_v40 = vpop.f32.mrb[96].mxu1  ;;  %1960 = vadd.xlane.f32.xlu0 %v1959_v41  ;;  %v1741_v45 = vld [vmem:[#allocation2 + $0x458] sm:$0xff] }
 0x1d2   :  { %1566 = vst.msk [vmem:[#allocation2 + $0x4c8] sm:$0xff] %vm1418_vm1, %v1383_v40  ;;  %v1385_v37 = vpop.f32.mrb[97].mxu1  ;;  %v1967_v25 = vsel %vm1418_vm1, %v1741_v45, 0.0  ;;  %v1984_v52 = vadd.f32 %v1983_v32, %v1179_v35 }
 0x1d3   :  { %v1183_v62 = vpop.f32.mrb[98].mxu0  ;;  %v1968_v59 = vadd.f32 %v1967_v25, %v1966_v18  ;;  %v2016_v18 = vadd.f32 %v1778_v8, %v1777_v5  ;;  %v1780_v25 = vld [vmem:[#allocation2 + $0x590] sm:$0xff] }
 0x1d4   :  { %1571 = vst [vmem:[#allocation2 + $0x4f0] sm:$0xff] %v1183_v62  ;;  %v1185_v60 = vpop.f32.mrb[99].mxu0  ;;  %v1992_v42 = vadd.f32 %v1991_v58, %v1183_v62  ;;  %v1786_v58 = vld [vmem:[#allocation2 + $0x5c0] sm:$0xff] }
 0x1d5   :  { %1572 = vst [vmem:[#allocation2 + $0x4f8] sm:$0xff] %v1185_v60  ;;  %v1388_v23 = vpop.f32.mrb[98].mxu1  ;;  %1969 = vadd.xlane.f32.xlu1 %v1968_v59  ;;  %v1748_v6 = vld [vmem:[#allocation2 + $0x490] sm:$0xff]  ;;  %v2017_v32 = vadd.f32 %v2016_v18, %v1779_v27 }
 0x1d6   :  { %1573 = vst.msk [vmem:[#allocation2 + $0x500] sm:$0xff] %vm1418_vm1, %v1388_v23  ;;  %v1390_v47 = vpop.f32.mrb[99].mxu1  ;;  %v1976_v1 = vsel %vm1418_vm1, %v1748_v6, 0.0  ;;  %v1993_v7 = vadd.f32 %v1992_v42, %v1185_v60 }
 0x1d7   :  { %v1189_v3 = vpop.f32.mrb[100].mxu0  ;;  %v1977_v14 = vadd.f32 %v1976_v1, %v1975_v26  ;;  %v2025_v26 = vadd.f32 %v1785_v16, %v1784_v21  ;;  %v2018_v5 = vadd.f32 %v2017_v32, %v1780_v25  ;;  %v3209_v25 = vld [vmem:[%s7835_s3 + $0x70] sm:$0xff] }
 0x1d8   :  { %1578 = vst [vmem:[#allocation2 + $0x528] sm:$0xff] %v1189_v3  ;;  %v1191_v24 = vpop.f32.mrb[101].mxu0  ;;  %v2001_v39 = vadd.f32 %v2000_v9, %v1189_v3 }
 0x1d9   :  { %1579 = vst [vmem:[#allocation2 + $0x530] sm:$0xff] %v1191_v24  ;;  %v1393_v33 = vpop.f32.mrb[100].mxu1  ;;  %1978 = vadd.xlane.f32.xlu0 %v1977_v14  ;;  %v1755_v15 = vld [vmem:[#allocation2 + $0x4c8] sm:$0xff]  ;;  %v2026_v8 = vadd.f32 %v2025_v26, %v1786_v58 }
 0x1da   :  { %1580 = vst.msk [vmem:[#allocation2 + $0x538] sm:$0xff] %vm1418_vm1, %v1393_v33  ;;  %v1395_v28 = vpop.f32.mrb[101].mxu1  ;;  %v1985_v41 = vsel %vm1418_vm1, %v1755_v15, 0.0  ;;  %v2002_v35 = vadd.f32 %v2001_v39, %v1191_v24 }
 0x1db   :  { %v1195_v40 = vpop.f32.mrb[102].mxu0  ;;  %v1986_v45 = vadd.f32 %v1985_v41, %v1984_v52  ;;  %v2027_v9 = vadd.f32 %v2026_v8, %v1787_v56  ;;  %v5692_v41 = vpop.permute.xlu0 %3224  ;;  %v4104_v56 = vld [vmem:[#allocation2 + $0x10] sm:$0xff] }
 0x1dc   :  { %1585 = vst [vmem:[#allocation2 + $0x560] sm:$0xff] %v1195_v40  ;;  %v1197_v50 = vpop.f32.mrb[103].mxu0  ;;  %v2010_v46 = vadd.f32 %v2009_v10, %v1195_v40  ;;  %v5697_v40 = vpop.permute.xlu1 %3229 }
 0x1dd   :  { %1586 = vst [vmem:[#allocation2 + $0x568] sm:$0xff] %v1197_v50  ;;  %v1398_v36 = vpop.f32.mrb[102].mxu1  ;;  %1987 = vadd.xlane.f32.xlu1 %v1986_v45  ;;  %v1762_v37 = vld [vmem:[#allocation2 + $0x500] sm:$0xff] }
 0x1de   :  { %1587 = vst.msk [vmem:[#allocation2 + $0x570] sm:$0xff] %vm1418_vm1, %v1398_v36  ;;  %v1400_v54 = vpop.f32.mrb[103].mxu1  ;;  %v1994_v62 = vsel %vm1418_vm1, %v1762_v37, 0.0  ;;  %v2011_v59 = vadd.f32 %v2010_v46, %v1197_v50  ;;  %v3210_v50 = vld [vmem:[%s7835_s3 + $0x78] sm:$0xff] }
 0x1df   :  { %v1201_v60 = vpop.f32.mrb[104].mxu0  ;;  %v1995_v42 = vadd.f32 %v1994_v62, %v1993_v7  ;;  %v5695_v26 = vpop.permute.xlu0 %3234 }
 0x1e0   :  { %1592 = vst [vmem:[#allocation2 + $0x598] sm:$0xff] %v1201_v60  ;;  %v1203_v52 = vpop.f32.mrb[105].mxu0  ;;  %v2019_v4 = vadd.f32 %v2018_v5, %v1201_v60  ;;  %v5704_v46 = vpop.permute.xlu1 %3239 }
 0x1e1   :  { %1593 = vst [vmem:[#allocation2 + $0x5a0] sm:$0xff] %v1203_v52  ;;  %v1403_v23 = vpop.f32.mrb[104].mxu1  ;;  %1996 = vadd.xlane.f32.xlu0 %v1995_v42  ;;  %v1769_v6 = vld [vmem:[#allocation2 + $0x538] sm:$0xff]  ;;  %8002 = vst [vmem:[#allocation4_spill] sm:$0xff] %v5704_v46 }
 0x1e2   :  { %1594 = vst.msk [vmem:[#allocation2 + $0x5a8] sm:$0xff] %vm1418_vm1, %v1403_v23  ;;  %v1405_v30 = vpop.f32.mrb[105].mxu1  ;;  %v2003_v47 = vsel %vm1418_vm1, %v1769_v6, 0.0  ;;  %v2020_v1 = vadd.f32 %v2019_v4, %v1203_v52  ;;  %v4102_v52 = vld [vmem:[#allocation2] sm:$0xff]  ;;  %v4103_v23 = vld [vmem:[#allocation2 + $0x8] sm:$0xff] }
 0x1e3   :  { %v1207_v18 = vpop.f32.mrb[106].mxu0  ;;  %v2004_v3 = vadd.f32 %v2003_v47, %v2002_v35  ;;  %v5699_v45 = vpop.permute.xlu0 %3244 }
 0x1e4   :  { %1599 = vst [vmem:[#allocation2 + $0x5d0] sm:$0xff] %v1207_v18  ;;  %v1209_v14 = vpop.f32.mrb[107].mxu0  ;;  %v2028_v7 = vadd.f32 %v2027_v9, %v1207_v18  ;;  %8001 = vst [vmem:[#allocation3_spill] sm:$0xff] %v5699_v45  ;;  %v5708_v37 = vpop.permute.xlu1 %3249  ;;  %v4105_v9 = vld [vmem:[#allocation2 + $0x18] sm:$0xff]  ;;  %v4118_v45 = vld [vmem:[#allocation2 + $0xe0] sm:$0xff] }
 0x1e5   :  { %1600 = vst [vmem:[#allocation2 + $0x5d8] sm:$0xff] %v1209_v14  ;;  %v1408_v21 = vpop.f32.mrb[106].mxu1  ;;  %2005 = vadd.xlane.f32.xlu1 %v2004_v3  ;;  %v1776_v16 = vld [vmem:[#allocation2 + $0x570] sm:$0xff]  ;;  %8004 = vst [vmem:[#allocation6_spill] sm:$0xff] %v5708_v37 }
 0x1e6   :  { %1601 = vst.msk [vmem:[#allocation2 + $0x5e0] sm:$0xff] %vm1418_vm1, %v1408_v21  ;;  %v2012_v24 = vsel %vm1418_vm1, %v1776_v16, 0.0  ;;  %v2029_v39 = vadd.f32 %v2028_v7, %v1209_v14  ;;  %v1410_v49 = vpop.f32.mrb[107].mxu1 }
 0x1e7   :  { %v2013_v33 = vadd.f32 %v2012_v24, %v2011_v59  ;;  %v5706_v36 = vpop.permute.xlu0 %3254 }
 0x1e8   :  { %8003 = vst [vmem:[#allocation5_spill] sm:$0xff] %v5706_v36  ;;  %v5715_v54 = vpop.permute.xlu1 %3259 }
 0x1e9   :  { %2014 = vadd.xlane.f32.xlu0 %v2013_v33  ;;  %v1783_v15 = vld [vmem:[#allocation2 + $0x5a8] sm:$0xff]  ;;  %8006 = vst [vmem:[#allocation8_spill] sm:$0xff] %v5715_v54  ;;  %v4106_v33 = vld [vmem:[#allocation2 + $0x38] sm:$0xff] }
 0x1ea   :  { %v2021_v10 = vsel %vm1418_vm1, %v1783_v15, 0.0 }
 0x1eb   :  { %v2022_v27 = vadd.f32 %v2021_v10, %v2020_v1  ;;  %v5713_v58 = vpop.permute.xlu0 %3264 }
 0x1ec   :  { %8005 = vst [vmem:[#allocation7_spill] sm:$0xff] %v5713_v58  ;;  %v5719_v59 = vpop.permute.xlu1 %3269 }
 0x1ed   :  { %2023 = vadd.xlane.f32.xlu1 %v2022_v27  ;;  %v1790_v28 = vld [vmem:[#allocation2 + $0x5e0] sm:$0xff] }
 0x1ee   :  { %v2030_v35 = vsel %vm1418_vm1, %v1790_v28, 0.0 }
 0x1ef   :  { %v2031_v32 = vadd.f32 %v2030_v35, %v2029_v39  ;;  %v5717_v62 = vpop.permute.xlu0 %3274  ;;  %v4108_v35 = vld [vmem:[#allocation2 + $0x48] sm:$0xff] }
 0x1f0   :  { %8007 = vst [vmem:[#allocation9_spill] sm:$0xff] %v5717_v62  ;;  %v5723_v8 = vpop.permute.xlu1 %3279  ;;  %v4114_v62 = vld [vmem:[#allocation2 + $0xa8] sm:$0xff] }
 0x1f1   :  { %2032 = vadd.xlane.f32.xlu0 %v2031_v32  ;;  %8009 = vst [vmem:[#allocation11_spill] sm:$0xff] %v5723_v8  ;;  %v4115_v8 = vld [vmem:[#allocation2 + $0xb0] sm:$0xff] }
 0x1f3   :  { %v5721_v5 = vpop.permute.xlu0 %3284 }
 0x1f4   :  { %8008 = vst [vmem:[#allocation10_spill] sm:$0xff] %v5721_v5  ;;  %v5731_v47 = vpop.permute.xlu1 %3289 }
 0x1f5   :  { %8010 = vst [vmem:[#allocation12_spill] sm:$0xff] %v5731_v47 }
 0x1fe   :  { %3299 = vperm.xlu1 %4046, %v3210_v50  }
 0x207   :  { %3294 = vperm.xlu0 %4045, %v3209_v25  }
 0x216   :  { %v1799_v60 = vpop.xlane.xlu0 %1798 }
 0x217   :  { %v2061_v42 = vmul.f32 0.0012755102, %v1799_v60 }
 0x219   :  { %v5725_v4 = vsub.f32 %v4102_v52, %v2061_v42  ;;  %v5727_v6 = vsub.f32 %v4103_v23, %v2061_v42  ;;  %v5729_v30 = vsub.f32 %v4104_v56, %v2061_v42  ;;  %v5733_v18 = vsub.f32 %v4105_v9, %v2061_v42 }
 0x21a   :  { %v1808_v1 = vpop.xlane.xlu0 %1807  ;;  %v5736_v14 = vsub.f32 %v5576_v31, %v2061_v42  ;;  %v5743_v16 = vsub.f32 %v5554_v19, %v2061_v42  ;;  %v5746_v24 = vsub.f32 %v5556_v44, %v2061_v42  ;;  %v4107_v31 = vld [vmem:[#allocation2 + $0x40] sm:$0xff]  ;;  %v4109_v42 = vld [vmem:[#allocation2 + $0x50] sm:$0xff] }
 0x21b   :  { %v2062_v3 = vmul.f32 0.0012755102, %v1808_v1  ;;  %v2277_v7 = vmul.f32 %v5725_v4, %v5725_v4  ;;  %v2278_v21 = vmul.f32 %v5727_v6, %v5727_v6  ;;  %v2279_v39 = vmul.f32 %v5729_v30, %v5729_v30 }
 0x21c   :  { %v2280_v28 = vmul.f32 %v5733_v18, %v5733_v18  ;;  %v2283_v44 = vmul.f32 %v5736_v14, %v5736_v14  ;;  %v2281_v60 = vmul.f32 %v5743_v16, %v5743_v16  ;;  %v2282_v1 = vmul.f32 %v5746_v24, %v5746_v24 }
 0x21d   :  { %v2466_v49 = vadd.f32 %v2278_v21, %v2277_v7  ;;  %v5750_v15 = vsub.f32 %v4106_v33, %v2062_v3  ;;  %v5752_v10 = vsub.f32 %v4107_v31, %v2062_v3  ;;  %v5756_v19 = vsub.f32 %v4108_v35, %v2062_v3  ;;  %v4110_v21 = vld [vmem:[#allocation2 + $0x70] sm:$0xff] }
 0x21e   :  { %v1817_v27 = vpop.xlane.xlu1 %1816  ;;  %v5764_v52 = vsub.f32 %v4109_v42, %v2062_v3  ;;  %v5767_v23 = vsub.f32 %v5562_v34, %v2062_v3  ;;  %v5774_v7 = vsub.f32 %v5588_v48, %v2062_v3  ;;  %v5779_v33 = vsub.f32 %v5564_v2, %v2062_v3  ;;  %v4112_v48 = vld [vmem:[#allocation2 + $0x80] sm:$0xff] }
 0x21f   :  { %v2063_v32 = vmul.f32 0.0012755102, %v1817_v27  ;;  %v2467_v50 = vadd.f32 %v2466_v49, %v2279_v39  ;;  %v2284_v25 = vmul.f32 %v5750_v15, %v5750_v15  ;;  %v2285_v56 = vmul.f32 %v5752_v10, %v5752_v10  ;;  %v4111_v27 = vld [vmem:[#allocation2 + $0x78] sm:$0xff] }
 0x220   :  { %v2286_v34 = vmul.f32 %v5756_v19, %v5756_v19  ;;  %v2288_v2 = vmul.f32 %v5767_v23, %v5767_v23 }
 0x221   :  { %v2468_v9 = vadd.f32 %v2467_v50, %v2280_v28  ;;  %v5776_v39 = vsub.f32 %v4110_v21, %v2063_v32  ;;  %v2475_v31 = vadd.f32 %v2285_v56, %v2284_v25  ;;  %v5783_v35 = vsub.f32 %v4111_v27, %v2063_v32 }
 0x222   :  { %v1826_v49 = vpop.xlane.xlu1 %1825  ;;  %v2471_v28 = vsel %vm1418_vm1, %v2283_v44, 0.0  ;;  %v5786_v50 = vsub.f32 %v4112_v48, %v2063_v32  ;;  %v2287_v21 = vmul.f32 %v5764_v52, %v5764_v52  ;;  %v2289_v48 = vmul.f32 %v5779_v33, %v5779_v33 }
 0x223   :  { %v2064_v42 = vmul.f32 0.0012755102, %v1826_v49  ;;  %v2469_v5 = vadd.f32 %v2468_v9, %v2281_v60  ;;  %v2476_v3 = vadd.f32 %v2475_v31, %v2286_v34  ;;  %v2291_v25 = vmul.f32 %v5776_v39, %v5776_v39  ;;  %v4113_v60 = vld [vmem:[#allocation2 + $0x88] sm:$0xff] }
 0x224   :  { %v2290_v49 = vmul.f32 %v5774_v7, %v5774_v7  ;;  %v5796_v9 = vsub.f32 %v4113_v60, %v2063_v32  ;;  %v2292_v44 = vmul.f32 %v5783_v35, %v5783_v35  ;;  %v5803_v34 = vsub.f32 %v5570_v11, %v2063_v32  ;;  %v4116_v11 = vld [vmem:[#allocation2 + $0xb8] sm:$0xff] }
 0x225   :  { %v2470_v56 = vadd.f32 %v2469_v5, %v2282_v1  ;;  %v2477_v47 = vadd.f32 %v2476_v3, %v2287_v21  ;;  %v5806_v31 = vsub.f32 %v5600_v63, %v2063_v32  ;;  %v2293_v1 = vmul.f32 %v5786_v50, %v5786_v50 }
 0x226   :  { %v1835_v27 = vpop.xlane.xlu0 %1834  ;;  %v2484_v60 = vadd.f32 %v2292_v44, %v2291_v25  ;;  %v5810_v58 = vsub.f32 %v4114_v62, %v2064_v42  ;;  %v5813_v36 = vsub.f32 %v5572_v22, %v2063_v32  ;;  %v5815_v21 = vsub.f32 %v4115_v8, %v2064_v42 }
 0x227   :  { %v2472_v5 = vadd.f32 %v2471_v28, %v2470_v56  ;;  %v2478_v54 = vadd.f32 %v2477_v47, %v2288_v2  ;;  %v5817_v3 = vsub.f32 %v4116_v11, %v2064_v42  ;;  %v2065_v63 = vmul.f32 0.0012755102, %v1835_v27 }
 0x228   :  { %8011 = vst [vmem:[#allocation13_spill] sm:$0xff] %v5815_v21  ;;  %v2480_v28 = vsel %vm1418_vm1, %v2290_v49, 0.0  ;;  %v2294_v25 = vmul.f32 %v5796_v9, %v5796_v9  ;;  %v2485_v56 = vadd.f32 %v2484_v60, %v2293_v1  ;;  %v2297_v47 = vmul.f32 %v5806_v31, %v5806_v31  ;;  %v4117_v49 = vld [vmem:[#allocation2 + $0xc0] sm:$0xff] }
 0x229   :  { %2473 = vadd.xlane.f32.xlu1 %v2472_v5  ;;  %v2479_v62 = vadd.f32 %v2478_v54, %v2289_v48  ;;  %v2298_v22 = vmul.f32 %v5810_v58, %v5810_v58  ;;  %v2299_v8 = vmul.f32 %v5815_v21, %v5815_v21  ;;  %v2295_v2 = vmul.f32 %v5803_v34, %v5803_v34 }
 0x22a   :  { %v1844_v32 = vpop.xlane.xlu1 %1843  ;;  %v2486_v44 = vadd.f32 %v2485_v56, %v2294_v25  ;;  %v5830_v27 = vsub.f32 %v4117_v49, %v2064_v42  ;;  %v5833_v5 = vsub.f32 %v5612_v20, %v2064_v42  ;;  %v2296_v48 = vmul.f32 %v5813_v36, %v5813_v36  ;;  %v4119_v56 = vld [vmem:[#allocation2 + $0xe8] sm:$0xff] }
 0x22b   :  { %v2481_v54 = vadd.f32 %v2480_v28, %v2479_v62  ;;  %v5838_v1 = vsub.f32 %v5582_v38, %v2064_v42  ;;  %v2300_v60 = vmul.f32 %v5817_v3, %v5817_v3  ;;  %v2493_v37 = vadd.f32 %v2299_v8, %v2298_v22  ;;  %v4120_v38 = vld [vmem:[#allocation2 + $0xf0] sm:$0xff] }
 0x22c   :  { %8012 = vst [vmem:[#allocation14_spill] sm:$0xff] %v5833_v5  ;;  %v2487_v11 = vadd.f32 %v2486_v44, %v2295_v2  ;;  %v5842_v25 = vsub.f32 %v4118_v45, %v2065_v63  ;;  %v5844_v49 = vsub.f32 %v4119_v56, %v2065_v63  ;;  %v2066_v20 = vmul.f32 0.0012755102, %v1844_v32  ;;  %v4121_v2 = vld [vmem:[#allocation2 + $0xf8] sm:$0xff] }
 0x22d   :  { %2482 = vadd.xlane.f32.xlu0 %v2481_v54  ;;  %v2489_v28 = vsel %vm1418_vm1, %v2297_v47, 0.0  ;;  %v5848_v62 = vsub.f32 %v5584_v43, %v2064_v42  ;;  %v5850_v46 = vsub.f32 %v4120_v38, %v2065_v63  ;;  %v2301_v22 = vmul.f32 %v5830_v27, %v5830_v27 }
 0x22e   :  { %8013 = vst [vmem:[#allocation15_spill] sm:$0xff] %v5842_v25  ;;  %8014 = vst [vmem:[#allocation16_spill] sm:$0xff] %v5844_v49  ;;  %v2488_v21 = vadd.f32 %v2487_v11, %v2296_v48  ;;  %v2304_v45 = vmul.f32 %v5833_v5, %v5833_v5  ;;  %v2494_v8 = vadd.f32 %v2493_v37, %v2300_v60  ;;  %v1853_v47 = vpop.xlane.xlu0 %1852 }
 0x22f   :  { %8015 = vst [vmem:[#allocation17_spill] sm:$0xff] %v5848_v62  ;;  %8016 = vst [vmem:[#allocation18_spill] sm:$0xff] %v5850_v46  ;;  %v2302_v32 = vmul.f32 %v5838_v1, %v5838_v1  ;;  %v5858_v44 = vsub.f32 %v4121_v2, %v2065_v63  ;;  %v2305_v43 = vmul.f32 %v5842_v25, %v5842_v25  ;;  %v4122_v2 = vld [vmem:[#allocation2 + $0x118] sm:$0xff] }
 0x230   :  { %v2306_v42 = vmul.f32 %v5844_v49, %v5844_v49  ;;  %v2490_v54 = vadd.f32 %v2489_v28, %v2488_v21  ;;  %v2495_v48 = vadd.f32 %v2494_v8, %v2301_v22  ;;  %v5865_v11 = vsub.f32 %v5594_v55, %v2065_v63  ;;  %v4123_v28 = vld [vmem:[#allocation2 + $0x120] sm:$0xff] }
 0x231   :  { %8017 = vst [vmem:[#allocation19_spill] sm:$0xff] %v5858_v44  ;;  %v5868_v37 = vsub.f32 %v5622_v0, %v2065_v63  ;;  %v2303_v60 = vmul.f32 %v5848_v62, %v5848_v62  ;;  %v2307_v56 = vmul.f32 %v5850_v46, %v5850_v46  ;;  %v5874_v25 = vsub.f32 %v4122_v2, %v2066_v20 }
 0x232   :  { %8018 = vst [vmem:[#allocation20_spill] sm:$0xff] %v5865_v11  ;;  %v2502_v38 = vadd.f32 %v2306_v42, %v2305_v43  ;;  %2491 = vadd.xlane.f32.xlu1 %v2490_v54  ;;  %v2496_v49 = vadd.f32 %v2495_v48, %v2302_v32  ;;  %v2498_v21 = vsel %vm1418_vm1, %v2304_v45, 0.0  ;;  %v5878_v55 = vsub.f32 %v5596_v61, %v2065_v63  ;;  %v1862_v8 = vpop.xlane.xlu1 %1861  ;;  %v4124_v43 = vld [vmem:[#allocation2 + $0x128] sm:$0xff] }
 0x233   :  { %8019 = vst [vmem:[#allocation21_spill] sm:$0xff] %v5868_v37  ;;  %8020 = vst [vmem:[#allocation22_spill] sm:$0xff] %v5874_v25  ;;  %v5880_v0 = vsub.f32 %v4123_v28, %v2066_v20  ;;  %v2067_v22 = vmul.f32 0.0012755102, %v1853_v47  ;;  %v2308_v5 = vmul.f32 %v5858_v44, %v5858_v44  ;;  %v5884_v42 = vsub.f32 %v4124_v43, %v2066_v20  ;;  %v4125_v47 = vld [vmem:[#allocation2 + $0x130] sm:$0xff] }
 0x234   :  { %8021 = vst [vmem:[#allocation23_spill] sm:$0xff] %v5878_v55  ;;  %v2503_v46 = vadd.f32 %v2502_v38, %v2307_v56  ;;  %v2497_v2 = vadd.f32 %v2496_v49, %v2303_v60  ;;  %v2309_v32 = vmul.f32 %v5865_v11, %v5865_v11  ;;  %v2311_v61 = vmul.f32 %v5868_v37, %v5868_v37  ;;  %v4155_v37 = vld [vmem:[#allocation2 + $0x260] sm:$0xff] }
 0x235   :  { %8022 = vst [vmem:[#allocation24_spill] sm:$0xff] %v5880_v0  ;;  %8023 = vst [vmem:[#allocation25_spill] sm:$0xff] %v5884_v42  ;;  %v2312_v63 = vmul.f32 %v5874_v25, %v5874_v25  ;;  %v5892_v54 = vsub.f32 %v4125_v47, %v2066_v20  ;;  %v5895_v48 = vsub.f32 %v5606_v12, %v2066_v20  ;;  %v5899_v49 = vmul.f32 0.0012755102, %v1862_v8  ;;  %v4126_v47 = vld [vmem:[#allocation2 + $0x150] sm:$0xff]  ;;  %v4128_v25 = vld [vmem:[#allocation2 + $0x160] sm:$0xff] }
 0x236   :  { %v2504_v45 = vadd.f32 %v2503_v46, %v2308_v5  ;;  %v2313_v56 = vmul.f32 %v5880_v0, %v5880_v0  ;;  %v2499_v60 = vadd.f32 %v2498_v21, %v2497_v2  ;;  %v2310_v38 = vmul.f32 %v5878_v55, %v5878_v55  ;;  %v4127_v21 = vld [vmem:[#allocation2 + $0x158] sm:$0xff] }
 0x237   :  { %8024 = vst [vmem:[#allocation26_spill] sm:$0xff] %v5892_v54  ;;  %8025 = vst [vmem:[#allocation27_spill] sm:$0xff] %v5895_v48  ;;  %v5904_v28 = vsub.f32 %v5628_v29, %v2066_v20  ;;  %v2314_v46 = vmul.f32 %v5884_v42, %v5884_v42  ;;  %v5908_v12 = vsub.f32 %v4126_v47, %v2067_v22  ;;  %v2507_v0 = vsel %vm1418_vm1, %v2311_v61, 0.0 }
 0x238   :  { %v2505_v43 = vadd.f32 %v2504_v45, %v2309_v32  ;;  %v2511_v5 = vadd.f32 %v2313_v56, %v2312_v63  ;;  %2500 = vadd.xlane.f32.xlu0 %v2499_v60  ;;  %v5912_v8 = vsub.f32 %v5608_v17, %v2066_v20  ;;  %v5914_v2 = vsub.f32 %v4127_v21, %v2067_v22  ;;  %v1871_v32 = vpop.xlane.xlu0 %1870  ;;  %v4129_v17 = vld [vmem:[#allocation2 + $0x168] sm:$0xff] }
 0x239   :  { %8026 = vst [vmem:[#allocation28_spill] sm:$0xff] %v5904_v28  ;;  %8027 = vst [vmem:[#allocation29_spill] sm:$0xff] %v5908_v12  ;;  %v5916_v29 = vsub.f32 %v4128_v25, %v2067_v22  ;;  %v2315_v63 = vmul.f32 %v5892_v54, %v5892_v54  ;;  %v2316_v56 = vmul.f32 %v5895_v48, %v5895_v48 }
 0x23a   :  { %8028 = vst [vmem:[#allocation30_spill] sm:$0xff] %v5912_v8  ;;  %8029 = vst [vmem:[#allocation31_spill] sm:$0xff] %v5914_v2  ;;  %v2506_v45 = vadd.f32 %v2505_v43, %v2310_v38  ;;  %v2512_v60 = vadd.f32 %v2511_v5, %v2314_v46  ;;  %v2318_v61 = vmul.f32 %v5904_v28, %v5904_v28  ;;  %v5936_v46 = vmul.f32 0.0012755102, %v1871_v32  ;;  %v4132_v32 = vld [vmem:[#allocation2 + $0x178] sm:$0xff] }
 0x23b   :  { %8030 = vst [vmem:[#allocation32_spill] sm:$0xff] %v5916_v29  ;;  %v5924_v20 = vsub.f32 %v4129_v17, %v2067_v22  ;;  %v2319_v47 = vmul.f32 %v5908_v12, %v5908_v12  ;;  %v2320_v25 = vmul.f32 %v5914_v2, %v5914_v2  ;;  %v5931_v21 = vsub.f32 %v5618_v53, %v2067_v22  ;;  %v4130_v2 = vld [vmem:[#allocation2 + $0x188] sm:$0xff]  ;;  %v4131_v53 = vld [vmem:[#allocation2 + $0x190] sm:$0xff] }
 0x23c   :  { %v2508_v38 = vadd.f32 %v2507_v0, %v2506_v45  ;;  %v2513_v43 = vadd.f32 %v2512_v60, %v2315_v63  ;;  %v5934_v48 = vsub.f32 %v5634_v51, %v2067_v22  ;;  %v2321_v5 = vmul.f32 %v5916_v29, %v5916_v29  ;;  %v1880_v51 = vpop.xlane.xlu1 %1879 }
 0x23d   :  { %8031 = vst [vmem:[#allocation33_spill] sm:$0xff] %v5924_v20  ;;  %8032 = vst [vmem:[#allocation34_spill] sm:$0xff] %v5931_v21  ;;  %v2520_v17 = vadd.f32 %v2320_v25, %v2319_v47  ;;  %v2317_v12 = vmul.f32 %v5912_v8, %v5912_v8  ;;  %v5943_v0 = vsub.f32 %v4130_v2, %v5899_v49  ;;  %v4133_v25 = vld [vmem:[#allocation2 + $0x198] sm:$0xff]  ;;  %v2516_v2 = vsel %vm1418_vm1, %v2318_v61, 0.0  ;;  %v4135_v61 = vld [vmem:[#allocation2 + $0x1a8] sm:$0xff] }
 0x23e   :  { %8033 = vst [vmem:[#allocation35_spill] sm:$0xff] %v5934_v48  ;;  %2509 = vadd.xlane.f32.xlu1 %v2508_v38  ;;  %v2514_v28 = vadd.f32 %v2513_v43, %v2316_v56  ;;  %v5946_v45 = vsub.f32 %v4131_v53, %v5899_v49  ;;  %v5948_v63 = vsub.f32 %v4132_v32, %v2067_v22  ;;  %v4134_v22 = vld [vmem:[#allocation2 + $0x1a0] sm:$0xff] }
 0x23f   :  { %8034 = vst [vmem:[#allocation36_spill] sm:$0xff] %v5943_v0  ;;  %v2322_v60 = vmul.f32 %v5924_v20, %v5924_v20  ;;  %v2521_v47 = vadd.f32 %v2520_v17, %v2321_v5  ;;  %v5953_v38 = vsub.f32 %v4133_v25, %v5899_v49  ;;  %v2323_v43 = vmul.f32 %v5931_v21, %v5931_v21  ;;  %v4139_v21 = vld [vmem:[#allocation2 + $0x1d0] sm:$0xff] }
 0x240   :  { %8035 = vst [vmem:[#allocation37_spill] sm:$0xff] %v5946_v45  ;;  %8036 = vst [vmem:[#allocation38_spill] sm:$0xff] %v5948_v63  ;;  %v2515_v56 = vadd.f32 %v2514_v28, %v2317_v12  ;;  %v2325_v53 = vmul.f32 %v5934_v48, %v5934_v48  ;;  %v5961_v32 = vsub.f32 %v4134_v22, %v5899_v49  ;;  %v5967_v28 = vmul.f32 0.0012755102, %v1880_v51  ;;  %v4136_v51 = vld [vmem:[#allocation2 + $0x1b0] sm:$0xff] }
 0x241   :  { %8037 = vst [vmem:[#allocation39_spill] sm:$0xff] %v5953_v38  ;;  %v2522_v29 = vadd.f32 %v2521_v47, %v2322_v60  ;;  %v2326_v5 = vmul.f32 %v5943_v0, %v5943_v0  ;;  %v2327_v17 = vmul.f32 %v5946_v45, %v5946_v45  ;;  %v5970_v25 = vsub.f32 %v4135_v61, %v5899_v49  ;;  %v4138_v45 = vld [vmem:[#allocation2 + $0x1c8] sm:$0xff]  ;;  %v4149_v20 = vld [vmem:[#allocation2 + $0x230] sm:$0xff] }
 0x242   :  { %8038 = vst [vmem:[#allocation40_spill] sm:$0xff] %v5961_v32  ;;  %v2517_v12 = vadd.f32 %v2516_v2, %v2515_v56  ;;  %v5974_v60 = vsub.f32 %v5640_v13, %v5899_v49  ;;  %v2324_v47 = vmul.f32 %v5948_v63, %v5948_v63  ;;  %v2328_v0 = vmul.f32 %v5953_v38, %v5953_v38  ;;  %v4137_v2 = vld [vmem:[#allocation2 + $0x1c0] sm:$0xff] }
 0x243   :  { %8039 = vst [vmem:[#allocation41_spill] sm:$0xff] %v5970_v25  ;;  %v2523_v22 = vadd.f32 %v2522_v29, %v2323_v43  ;;  %v2529_v48 = vadd.f32 %v2327_v17, %v2326_v5  ;;  %v5981_v56 = vsub.f32 %v4136_v51, %v5899_v49  ;;  %v5984_v61 = vsub.f32 %v4137_v2, %v5936_v46  ;;  %v1889_v43 = vpop.xlane.xlu0 %1888 }
 0x244   :  { %8040 = vst [vmem:[#allocation42_spill] sm:$0xff] %v5974_v60  ;;  %2518 = vadd.xlane.f32.xlu0 %v2517_v12  ;;  %v5987_v13 = vsub.f32 %v4138_v45, %v5936_v46  ;;  %v5990_v29 = vsub.f32 %v4139_v21, %v5936_v46  ;;  %v2525_v5 = vsel %vm1418_vm1, %v2325_v53, 0.0  ;;  %v2329_v49 = vmul.f32 %v5961_v32, %v5961_v32  ;;  %v4140_v53 = vld [vmem:[#allocation2 + $0x1d8] sm:$0xff] }
 0x245   :  { %8041 = vst [vmem:[#allocation43_spill] sm:$0xff] %v5981_v56  ;;  %8042 = vst [vmem:[#allocation44_spill] sm:$0xff] %v5984_v61  ;;  %v2524_v38 = vadd.f32 %v2523_v22, %v2324_v47  ;;  %v2530_v17 = vadd.f32 %v2529_v48, %v2328_v0  ;;  %v2330_v12 = vmul.f32 %v5970_v25, %v5970_v25  ;;  %v1898_v47 = vpop.xlane.xlu1 %1897  ;;  %v4141_v48 = vld [vmem:[#allocation2 + $0x1e0] sm:$0xff]  ;;  %v6009_v25 = vmul.f32 0.0012755102, %v1889_v43 }
 0x246   :  { %8043 = vst [vmem:[#allocation45_spill] sm:$0xff] %v5987_v13  ;;  %8044 = vst [vmem:[#allocation46_spill] sm:$0xff] %v5990_v29  ;;  %v2332_v51 = vmul.f32 %v5974_v60, %v5974_v60  ;;  %v2333_v45 = vmul.f32 %v5984_v61, %v5984_v61  ;;  %v2334_v21 = vmul.f32 %v5987_v13, %v5987_v13  ;;  %v6025_v13 = vmul.f32 0.0012755102, %v1898_v47 }
 0x247   :  { %v2526_v2 = vadd.f32 %v2525_v5, %v2524_v38  ;;  %v2531_v22 = vadd.f32 %v2530_v17, %v2329_v49  ;;  %v6004_v63 = vsub.f32 %v4140_v53, %v5936_v46  ;;  %v6007_v0 = vsub.f32 %v4141_v48, %v5936_v46  ;;  %v4142_v17 = vld [vmem:[#allocation2 + $0x1f8] sm:$0xff]  ;;  %v4143_v48 = vld [vmem:[#allocation2 + $0x200] sm:$0xff] }
 0x248   :  { %v2331_v60 = vmul.f32 %v5981_v56, %v5981_v56  ;;  %v6015_v61 = vsub.f32 %v5646_v57, %v5936_v46  ;;  %v2335_v38 = vmul.f32 %v5990_v29, %v5990_v29  ;;  %v2538_v49 = vadd.f32 %v2334_v21, %v2333_v45  ;;  %v4144_v57 = vld [vmem:[#allocation2 + $0x1e8] sm:$0xff]  ;;  %v1907_v21 = vpop.xlane.xlu0 %1906 }
 0x249   :  { %8045 = vst [vmem:[#allocation47_spill] sm:$0xff] %v6004_v63  ;;  %8046 = vst [vmem:[#allocation48_spill] sm:$0xff] %v6007_v0  ;;  %2527 = vadd.xlane.f32.xlu1 %v2526_v2  ;;  %v2532_v5 = vadd.f32 %v2531_v22, %v2330_v12  ;;  %v6020_v53 = vsub.f32 %v4142_v17, %v5967_v28  ;;  %v6023_v43 = vsub.f32 %v4143_v48, %v5967_v28  ;;  %v4145_v29 = vld [vmem:[#allocation2 + $0x208] sm:$0xff]  ;;  %v4146_v17 = vld [vmem:[#allocation2 + $0x210] sm:$0xff] }
 0x24a   :  { %8047 = vst [vmem:[#allocation49_spill] sm:$0xff] %v6015_v61  ;;  %v2534_v56 = vsel %vm1418_vm1, %v2332_v51, 0.0  ;;  %v6029_v32 = vsub.f32 %v4144_v57, %v5936_v46  ;;  %v6032_v12 = vsub.f32 %v4145_v29, %v5967_v28  ;;  %v2336_v2 = vmul.f32 %v6004_v63, %v6004_v63  ;;  %v4147_v57 = vld [vmem:[#allocation2 + $0x218] sm:$0xff] }
 0x24b   :  { %v2533_v45 = vadd.f32 %v2532_v5, %v2331_v60  ;;  %v2337_v22 = vmul.f32 %v6007_v0, %v6007_v0  ;;  %v2539_v47 = vadd.f32 %v2538_v49, %v2335_v38  ;;  %v2339_v51 = vmul.f32 %v6015_v61, %v6015_v61  ;;  %v4148_v38 = vld [vmem:[#allocation2 + $0x228] sm:$0xff] }
 0x24c   :  { %8048 = vst [vmem:[#allocation50_spill] sm:$0xff] %v6029_v32  ;;  %v6041_v46 = vsub.f32 %v4146_v17, %v5967_v28  ;;  %v2340_v29 = vmul.f32 %v6020_v53, %v6020_v53  ;;  %v2341_v60 = vmul.f32 %v6023_v43, %v6023_v43  ;;  %v6048_v63 = vsub.f32 %v4147_v57, %v5967_v28  ;;  %v4151_v57 = vld [vmem:[#allocation2 + $0x238] sm:$0xff] }
 0x24d   :  { %v2535_v5 = vadd.f32 %v2534_v56, %v2533_v45  ;;  %v2540_v48 = vadd.f32 %v2539_v47, %v2336_v2  ;;  %v6051_v49 = vsub.f32 %v4148_v38, %v5967_v28  ;;  %v6053_v61 = vmul.f32 0.0012755102, %v1907_v21  ;;  %v4150_v2 = vld [vmem:[#allocation2 + $0x220] sm:$0xff] }
 0x24e   :  { %v2342_v17 = vmul.f32 %v6032_v12, %v6032_v12  ;;  %v2547_v0 = vadd.f32 %v2341_v60, %v2340_v29  ;;  %v6058_v8 = vsub.f32 %v4149_v20, %v6009_v25  ;;  %v2338_v56 = vmul.f32 %v6029_v32, %v6029_v32  ;;  %v1916_v29 = vpop.xlane.xlu1 %1915 }
 0x24f   :  { %2536 = vadd.xlane.f32.xlu0 %v2535_v5  ;;  %v2541_v45 = vadd.f32 %v2540_v48, %v2337_v22  ;;  %v6063_v47 = vsub.f32 %v4150_v2, %v5967_v28  ;;  %v6066_v21 = vsub.f32 %v4151_v57, %v6009_v25  ;;  %v2543_v38 = vsel %vm1418_vm1, %v2339_v51, 0.0  ;;  %v4152_v5 = vld [vmem:[#allocation2 + $0x240] sm:$0xff]  ;;  %v4153_v57 = vld [vmem:[#allocation2 + $0x248] sm:$0xff] }
 0x250   :  { %8049 = vst [vmem:[#allocation51_spill] sm:$0xff] %v6058_v8  ;;  %v2343_v20 = vmul.f32 %v6041_v46, %v6041_v46  ;;  %v2548_v60 = vadd.f32 %v2547_v0, %v2342_v17  ;;  %v6072_v54 = vsub.f32 %v4152_v5, %v6009_v25  ;;  %v2344_v28 = vmul.f32 %v6048_v63, %v6048_v63  ;;  %v4154_v0 = vld [vmem:[#allocation2 + $0x250] sm:$0xff] }
 0x251   :  { %8050 = vst [vmem:[#allocation52_spill] sm:$0xff] %v6066_v21  ;;  %v2542_v22 = vadd.f32 %v2541_v45, %v2338_v56  ;;  %v2346_v48 = vmul.f32 %v6051_v49, %v6051_v49  ;;  %v2347_v2 = vmul.f32 %v6058_v8, %v6058_v8  ;;  %v6081_v32 = vsub.f32 %v4153_v57, %v6009_v25 }
 0x252   :  { %8051 = vst [vmem:[#allocation53_spill] sm:$0xff] %v6072_v54  ;;  %v2549_v51 = vadd.f32 %v2548_v60, %v2343_v20  ;;  %v6084_v17 = vsub.f32 %v4154_v0, %v6009_v25  ;;  %v2348_v56 = vmul.f32 %v6066_v21, %v6066_v21  ;;  %v6088_v5 = vmul.f32 0.0012755102, %v1916_v29  ;;  %v4156_v0 = vld [vmem:[#allocation2 + $0x268] sm:$0xff]  ;;  %v4157_v29 = vld [vmem:[#allocation2 + $0x258] sm:$0xff]  ;;  %v4158_v21 = vld [vmem:[#allocation2 + $0x270] sm:$0xff]  ;;  %v1934_v62 = vpop.xlane.xlu1 %1933 }
 0x253   :  { %8052 = vst [vmem:[#allocation54_spill] sm:$0xff] %v6081_v32  ;;  %v2544_v45 = vadd.f32 %v2543_v38, %v2542_v22  ;;  %v2345_v42 = vmul.f32 %v6063_v47, %v6063_v47  ;;  %v6093_v20 = vsub.f32 %v4155_v37, %v6009_v25  ;;  %v2349_v57 = vmul.f32 %v6072_v54, %v6072_v54 }
 0x254   :  { %8053 = vst [vmem:[#allocation55_spill] sm:$0xff] %v6084_v17  ;;  %v2550_v60 = vadd.f32 %v2549_v51, %v2344_v28  ;;  %v2556_v8 = vadd.f32 %v2348_v56, %v2347_v2  ;;  %v6098_v55 = vsub.f32 %v4156_v0, %v6025_v13  ;;  %v2552_v38 = vsel %vm1418_vm1, %v2346_v48, 0.0  ;;  %v4159_v28 = vld [vmem:[#allocation2 + $0x278] sm:$0xff]  ;;  %v1925_v56 = vpop.xlane.xlu0 %1924 }
 0x255   :  { %8054 = vst [vmem:[#allocation56_spill] sm:$0xff] %v6093_v20  ;;  %2545 = vadd.xlane.f32.xlu1 %v2544_v45  ;;  %v6102_v22 = vsub.f32 %v4157_v29, %v6009_v25  ;;  %v6105_v37 = vsub.f32 %v4158_v21, %v6025_v13  ;;  %v6108_v51 = vsub.f32 %v4159_v28, %v6025_v13  ;;  %v4160_v29 = vld [vmem:[#allocation2 + $0x280] sm:$0xff] }
 0x256   :  { %v2551_v2 = vadd.f32 %v2550_v60, %v2345_v42  ;;  %v2350_v0 = vmul.f32 %v6081_v32, %v6081_v32  ;;  %v2351_v48 = vmul.f32 %v6084_v17, %v6084_v17  ;;  %v2557_v45 = vadd.f32 %v2556_v8, %v2349_v57  ;;  %v4161_v32 = vld [vmem:[#allocation2 + $0x288] sm:$0xff]  ;;  %v4162_v8 = vld [vmem:[#allocation2 + $0x298] sm:$0xff] }
 0x257   :  { %8055 = vst [vmem:[#allocation57_spill] sm:$0xff] %v6102_v22  ;;  %8056 = vst [vmem:[#allocation58_spill] sm:$0xff] %v6108_v51  ;;  %v2353_v25 = vmul.f32 %v6093_v20, %v6093_v20  ;;  %v6117_v21 = vsub.f32 %v4160_v29, %v6025_v13  ;;  %v2354_v28 = vmul.f32 %v6098_v55, %v6098_v55  ;;  %v6129_v20 = vmul.f32 0.0012755102, %v1925_v56 }
 0x258   :  { %v2355_v42 = vmul.f32 %v6105_v37, %v6105_v37  ;;  %v2553_v60 = vadd.f32 %v2552_v38, %v2551_v2  ;;  %v2558_v54 = vadd.f32 %v2557_v45, %v2350_v0  ;;  %v6124_v11 = vsub.f32 %v4161_v32, %v6025_v13  ;;  %v4163_v2 = vld [vmem:[#allocation2 + $0x290] sm:$0xff]  ;;  %v4164_v32 = vld [vmem:[#allocation2 + $0x2a0] sm:$0xff] }
 0x259   :  { %8057 = vst [vmem:[#allocation59_spill] sm:$0xff] %v6117_v21  ;;  %v6127_v57 = vsub.f32 %v4162_v8, %v6025_v13  ;;  %v2352_v29 = vmul.f32 %v6102_v22, %v6102_v22  ;;  %v2356_v17 = vmul.f32 %v6108_v51, %v6108_v51  ;;  %v6136_v0 = vsub.f32 %v4163_v2, %v6025_v13  ;;  %v4165_v8 = vld [vmem:[#allocation2 + $0x2a8] sm:$0xff] }
 0x25a   :  { %8058 = vst [vmem:[#allocation60_spill] sm:$0xff] %v6124_v11  ;;  %v2565_v44 = vadd.f32 %v2355_v42, %v2354_v28  ;;  %2554 = vadd.xlane.f32.xlu0 %v2553_v60  ;;  %v2559_v38 = vadd.f32 %v2558_v54, %v2351_v48  ;;  %v6139_v45 = vsub.f32 %v4164_v32, %v6053_v61  ;;  %v2561_v22 = vsel %vm1418_vm1, %v2353_v25, 0.0  ;;  %v4166_v54 = vld [vmem:[#allocation2 + $0x2b0] sm:$0xff] }
 0x25b   :  { %8059 = vst [vmem:[#allocation61_spill] sm:$0xff] %v6127_v57  ;;  %8060 = vst [vmem:[#allocation62_spill] sm:$0xff] %v6136_v0  ;;  %v6142_v56 = vsub.f32 %v4165_v8, %v6053_v61  ;;  %v2357_v28 = vmul.f32 %v6117_v21, %v6117_v21  ;;  %v6148_v48 = vsub.f32 %v4166_v54, %v6053_v61  ;;  %v4167_v8 = vld [vmem:[#allocation2 + $0x2b8] sm:$0xff]  ;;  %v6164_v54 = vmul.f32 0.0012755102, %v1934_v62 }
 0x25c   :  { %8061 = vst [vmem:[#allocation63_spill] sm:$0xff] %v6139_v45  ;;  %v2566_v42 = vadd.f32 %v2565_v44, %v2356_v17  ;;  %v2560_v13 = vadd.f32 %v2559_v38, %v2352_v29  ;;  %v2358_v60 = vmul.f32 %v6124_v11, %v6124_v11  ;;  %v2360_v2 = vmul.f32 %v6127_v57, %v6127_v57  ;;  %v4168_v44 = vld [vmem:[#allocation2 + $0x2c0] sm:$0xff]  ;;  %v4169_v11 = vld [vmem:[#allocation2 + $0x2d0] sm:$0xff] }
 0x25d   :  { %8062 = vst [vmem:[#allocation64_spill] sm:$0xff] %v6142_v56  ;;  %8063 = vst [vmem:[#allocation65_spill] sm:$0xff] %v6148_v48  ;;  %v2361_v32 = vmul.f32 %v6139_v45, %v6139_v45  ;;  %v6157_v51 = vsub.f32 %v4167_v8, %v6053_v61  ;;  %v6160_v17 = vsub.f32 %v4168_v44, %v6053_v61  ;;  %v4170_v44 = vld [vmem:[#allocation2 + $0x2d8] sm:$0xff] }
 0x25e   :  { %v2567_v25 = vadd.f32 %v2566_v42, %v2357_v28  ;;  %v2362_v29 = vmul.f32 %v6142_v56, %v6142_v56  ;;  %v2562_v38 = vadd.f32 %v2561_v22, %v2560_v13  ;;  %v2359_v57 = vmul.f32 %v6136_v0, %v6136_v0  ;;  %v4171_v22 = vld [vmem:[#allocation2 + $0x2c8] sm:$0xff]  ;;  %v4172_v56 = vld [vmem:[#allocation2 + $0x2e0] sm:$0xff] }
 0x25f   :  { %8064 = vst [vmem:[#allocation66_spill] sm:$0xff] %v6157_v51  ;;  %8065 = vst [vmem:[#allocation67_spill] sm:$0xff] %v6160_v17  ;;  %v6169_v28 = vsub.f32 %v4169_v11, %v6053_v61  ;;  %v2363_v8 = vmul.f32 %v6148_v48, %v6148_v48  ;;  %v6174_v21 = vsub.f32 %v4170_v44, %v6088_v5  ;;  %v2570_v62 = vsel %vm1418_vm1, %v2360_v2, 0.0 }
 0x260   :  { %v2568_v42 = vadd.f32 %v2567_v25, %v2358_v60  ;;  %v2574_v45 = vadd.f32 %v2362_v29, %v2361_v32  ;;  %2563 = vadd.xlane.f32.xlu1 %v2562_v38  ;;  %v6178_v13 = vsub.f32 %v4171_v22, %v6053_v61  ;;  %v6181_v11 = vsub.f32 %v4172_v56, %v6088_v5  ;;  %v4173_v60 = vld [vmem:[#allocation2 + $0x2e8] sm:$0xff]  ;;  %v1943_v29 = vpop.xlane.xlu0 %1942  ;;  %v4174_v22 = vld [vmem:[#allocation2 + $0x2f0] sm:$0xff] }
 0x261   :  { %8066 = vst [vmem:[#allocation68_spill] sm:$0xff] %v6169_v28  ;;  %8067 = vst [vmem:[#allocation69_spill] sm:$0xff] %v6174_v21  ;;  %v6184_v25 = vsub.f32 %v4173_v60, %v6088_v5  ;;  %v2364_v44 = vmul.f32 %v6157_v51, %v6157_v51  ;;  %v2365_v2 = vmul.f32 %v6160_v17, %v6160_v17  ;;  %v4175_v51 = vld [vmem:[#allocation2 + $0x2f8] sm:$0xff] }
 0x262   :  { %8068 = vst [vmem:[#allocation70_spill] sm:$0xff] %v6178_v13  ;;  %8069 = vst [vmem:[#allocation71_spill] sm:$0xff] %v6181_v11  ;;  %v2569_v32 = vadd.f32 %v2568_v42, %v2359_v57  ;;  %v2575_v38 = vadd.f32 %v2574_v45, %v2363_v8  ;;  %v2367_v61 = vmul.f32 %v6169_v28, %v6169_v28  ;;  %v4176_v45 = vld [vmem:[#allocation2 + $0x308] sm:$0xff]  ;;  %v6205_v28 = vmul.f32 0.0012755102, %v1943_v29 }
 0x263   :  { %8070 = vst [vmem:[#allocation72_spill] sm:$0xff] %v6184_v25  ;;  %v6193_v56 = vsub.f32 %v4174_v22, %v6088_v5  ;;  %v2368_v60 = vmul.f32 %v6174_v21, %v6174_v21  ;;  %v2369_v57 = vmul.f32 %v6181_v11, %v6181_v11  ;;  %v6200_v0 = vsub.f32 %v4175_v51, %v6088_v5  ;;  %v4178_v51 = vld [vmem:[#allocation2 + $0x310] sm:$0xff]  ;;  %v1952_v11 = vpop.xlane.xlu1 %1951 }
 0x264   :  { %v2571_v42 = vadd.f32 %v2570_v62, %v2569_v32  ;;  %v2576_v48 = vadd.f32 %v2575_v38, %v2364_v44  ;;  %v6203_v8 = vsub.f32 %v4176_v45, %v6088_v5  ;;  %v2366_v22 = vmul.f32 %v6178_v13, %v6178_v13  ;;  %v4177_v32 = vld [vmem:[#allocation2 + $0x300] sm:$0xff]  ;;  %v4179_v45 = vld [vmem:[#allocation2 + $0x318] sm:$0xff] }
 0x265   :  { %8071 = vst [vmem:[#allocation73_spill] sm:$0xff] %v6193_v56  ;;  %8072 = vst [vmem:[#allocation74_spill] sm:$0xff] %v6200_v0  ;;  %v2370_v17 = vmul.f32 %v6184_v25, %v6184_v25  ;;  %v2583_v21 = vadd.f32 %v2369_v57, %v2368_v60  ;;  %v6212_v44 = vsub.f32 %v4177_v32, %v6088_v5  ;;  %v2579_v13 = vsel %vm1418_vm1, %v2367_v61, 0.0 }
 0x266   :  { %8073 = vst [vmem:[#allocation75_spill] sm:$0xff] %v6203_v8  ;;  %2572 = vadd.xlane.f32.xlu0 %v2571_v42  ;;  %v2577_v62 = vadd.f32 %v2576_v48, %v2365_v2  ;;  %v6215_v38 = vsub.f32 %v4178_v51, %v6129_v20  ;;  %v6218_v29 = vsub.f32 %v4179_v45, %v6129_v20  ;;  %v4180_v48 = vld [vmem:[#allocation2 + $0x320] sm:$0xff]  ;;  %v4181_v45 = vld [vmem:[#allocation2 + $0x328] sm:$0xff] }
 0x267   :  { %8074 = vst [vmem:[#allocation76_spill] sm:$0xff] %v6212_v44  ;;  %v2371_v60 = vmul.f32 %v6193_v56, %v6193_v56  ;;  %v2584_v57 = vadd.f32 %v2583_v21, %v2370_v17  ;;  %v6224_v2 = vsub.f32 %v4180_v48, %v6129_v20  ;;  %v2372_v42 = vmul.f32 %v6200_v0, %v6200_v0  ;;  %v4182_v21 = vld [vmem:[#allocation2 + $0x330] sm:$0xff]  ;;  %v4183_v0 = vld [vmem:[#allocation2 + $0x340] sm:$0xff] }
 0x268   :  { %8075 = vst [vmem:[#allocation77_spill] sm:$0xff] %v6215_v38  ;;  %8076 = vst [vmem:[#allocation78_spill] sm:$0xff] %v6218_v29  ;;  %v2578_v5 = vadd.f32 %v2577_v62, %v2366_v22  ;;  %v2374_v32 = vmul.f32 %v6203_v8, %v6203_v8  ;;  %v2375_v51 = vmul.f32 %v6215_v38, %v6215_v38  ;;  %v6240_v48 = vmul.f32 0.0012755102, %v1952_v11  ;;  %v4185_v11 = vld [vmem:[#allocation2 + $0x338] sm:$0xff] }
 0x269   :  { %8077 = vst [vmem:[#allocation79_spill] sm:$0xff] %v6224_v2  ;;  %v2585_v61 = vadd.f32 %v2584_v57, %v2371_v60  ;;  %v6233_v25 = vsub.f32 %v4181_v45, %v6129_v20  ;;  %v6236_v17 = vsub.f32 %v4182_v21, %v6129_v20  ;;  %v2376_v22 = vmul.f32 %v6218_v29, %v6218_v29  ;;  %v4184_v21 = vld [vmem:[#allocation2 + $0x348] sm:$0xff]  ;;  %v4186_v29 = vld [vmem:[#allocation2 + $0x350] sm:$0xff] }
 0x26a   :  { %v2580_v62 = vadd.f32 %v2579_v13, %v2578_v5  ;;  %v2373_v8 = vmul.f32 %v6212_v44, %v6212_v44  ;;  %v6245_v60 = vsub.f32 %v4183_v0, %v6129_v20  ;;  %v2377_v45 = vmul.f32 %v6224_v2, %v6224_v2 }
 0x26b   :  { %8078 = vst [vmem:[#allocation80_spill] sm:$0xff] %v6233_v25  ;;  %8079 = vst [vmem:[#allocation81_spill] sm:$0xff] %v6236_v17  ;;  %v2586_v57 = vadd.f32 %v2585_v61, %v2372_v42  ;;  %v2592_v38 = vadd.f32 %v2376_v22, %v2375_v51  ;;  %v6250_v56 = vsub.f32 %v4184_v21, %v6164_v54  ;;  %v2588_v13 = vsel %vm1418_vm1, %v2374_v32, 0.0  ;;  %v4187_v42 = vld [vmem:[#allocation2 + $0x358] sm:$0xff]  ;;  %v1961_v22 = vpop.xlane.xlu0 %1960 }
 0x26c   :  { %8080 = vst [vmem:[#allocation82_spill] sm:$0xff] %v6245_v60  ;;  %2581 = vadd.xlane.f32.xlu1 %v2580_v62  ;;  %v6254_v5 = vsub.f32 %v4185_v11, %v6129_v20  ;;  %v6257_v0 = vsub.f32 %v4186_v29, %v6164_v54  ;;  %v6260_v61 = vsub.f32 %v4187_v42, %v6164_v54  ;;  %v4188_v11 = vld [vmem:[#allocation2 + $0x360] sm:$0xff] }
 0x26d   :  { %8081 = vst [vmem:[#allocation83_spill] sm:$0xff] %v6250_v56  ;;  %v2587_v51 = vadd.f32 %v2586_v57, %v2373_v8  ;;  %v2378_v21 = vmul.f32 %v6233_v25, %v6233_v25  ;;  %v2379_v32 = vmul.f32 %v6236_v17, %v6236_v17  ;;  %v2593_v62 = vadd.f32 %v2592_v38, %v2377_v45  ;;  %v4189_v25 = vld [vmem:[#allocation2 + $0x368] sm:$0xff]  ;;  %v4190_v38 = vld [vmem:[#allocation2 + $0x378] sm:$0xff] }
 0x26e   :  { %8082 = vst [vmem:[#allocation84_spill] sm:$0xff] %v6254_v5  ;;  %8083 = vst [vmem:[#allocation85_spill] sm:$0xff] %v6257_v0  ;;  %v2381_v20 = vmul.f32 %v6245_v60, %v6245_v60  ;;  %v6269_v29 = vsub.f32 %v4188_v11, %v6164_v54  ;;  %v2382_v42 = vmul.f32 %v6250_v56, %v6250_v56  ;;  %v6281_v60 = vmul.f32 0.0012755102, %v1961_v22 }
 0x26f   :  { %8084 = vst [vmem:[#allocation86_spill] sm:$0xff] %v6260_v61  ;;  %v2383_v8 = vmul.f32 %v6257_v0, %v6257_v0  ;;  %v2589_v57 = vadd.f32 %v2588_v13, %v2587_v51  ;;  %v2594_v2 = vadd.f32 %v2593_v62, %v2378_v21  ;;  %v6276_v44 = vsub.f32 %v4189_v25, %v6164_v54  ;;  %v4191_v51 = vld [vmem:[#allocation2 + $0x370] sm:$0xff]  ;;  %v4192_v25 = vld [vmem:[#allocation2 + $0x380] sm:$0xff] }
 0x270   :  { %8085 = vst [vmem:[#allocation87_spill] sm:$0xff] %v6269_v29  ;;  %v6279_v45 = vsub.f32 %v4190_v38, %v6164_v54  ;;  %v2380_v11 = vmul.f32 %v6254_v5, %v6254_v5  ;;  %v2384_v56 = vmul.f32 %v6260_v61, %v6260_v61  ;;  %v6288_v21 = vsub.f32 %v4191_v51, %v6164_v54  ;;  %v4193_v38 = vld [vmem:[#allocation2 + $0x388] sm:$0xff]  ;;  %v1970_v5 = vpop.xlane.xlu1 %1969 }
 0x271   :  { %8086 = vst [vmem:[#allocation88_spill] sm:$0xff] %v6276_v44  ;;  %v2601_v17 = vadd.f32 %v2383_v8, %v2382_v42  ;;  %2590 = vadd.xlane.f32.xlu0 %v2589_v57  ;;  %v2595_v13 = vadd.f32 %v2594_v2, %v2379_v32  ;;  %v6291_v62 = vsub.f32 %v4192_v25, %v6205_v28  ;;  %v2597_v0 = vsel %vm1418_vm1, %v2381_v20, 0.0  ;;  %v4194_v2 = vld [vmem:[#allocation2 + $0x390] sm:$0xff] }
 0x272   :  { %8087 = vst [vmem:[#allocation89_spill] sm:$0xff] %v6279_v45  ;;  %8088 = vst [vmem:[#allocation90_spill] sm:$0xff] %v6288_v21  ;;  %v6294_v22 = vsub.f32 %v4193_v38, %v6205_v28  ;;  %v2385_v42 = vmul.f32 %v6269_v29, %v6269_v29  ;;  %v6300_v32 = vsub.f32 %v4194_v2, %v6205_v28  ;;  %v4195_v38 = vld [vmem:[#allocation2 + $0x398] sm:$0xff]  ;;  %v6316_v2 = vmul.f32 0.0012755102, %v1970_v5 }
 0x273   :  { %8089 = vst [vmem:[#allocation91_spill] sm:$0xff] %v6291_v62  ;;  %v2602_v8 = vadd.f32 %v2601_v17, %v2384_v56  ;;  %v2596_v54 = vadd.f32 %v2595_v13, %v2380_v11  ;;  %v2386_v57 = vmul.f32 %v6276_v44, %v6276_v44  ;;  %v2388_v51 = vmul.f32 %v6279_v45, %v6279_v45  ;;  %v4196_v56 = vld [vmem:[#allocation2 + $0x3a0] sm:$0xff]  ;;  %v4197_v44 = vld [vmem:[#allocation2 + $0x3b0] sm:$0xff] }
 0x274   :  { %8090 = vst [vmem:[#allocation92_spill] sm:$0xff] %v6294_v22  ;;  %8091 = vst [vmem:[#allocation93_spill] sm:$0xff] %v6300_v32  ;;  %v2389_v25 = vmul.f32 %v6291_v62, %v6291_v62  ;;  %v6309_v61 = vsub.f32 %v4195_v38, %v6205_v28  ;;  %v6312_v17 = vsub.f32 %v4196_v56, %v6205_v28  ;;  %v4198_v56 = vld [vmem:[#allocation2 + $0x3b8] sm:$0xff] }
 0x275   :  { %v2603_v20 = vadd.f32 %v2602_v8, %v2385_v42  ;;  %v2390_v11 = vmul.f32 %v6294_v22, %v6294_v22  ;;  %v2598_v13 = vadd.f32 %v2597_v0, %v2596_v54  ;;  %v2387_v45 = vmul.f32 %v6288_v21, %v6288_v21  ;;  %v4199_v0 = vld [vmem:[#allocation2 + $0x3a8] sm:$0xff]  ;;  %v4200_v22 = vld [vmem:[#allocation2 + $0x3c0] sm:$0xff] }
 0x276   :  { %8092 = vst [vmem:[#allocation94_spill] sm:$0xff] %v6309_v61  ;;  %8093 = vst [vmem:[#allocation95_spill] sm:$0xff] %v6312_v17  ;;  %v6321_v42 = vsub.f32 %v4197_v44, %v6205_v28  ;;  %v2391_v38 = vmul.f32 %v6300_v32, %v6300_v32  ;;  %v6326_v29 = vsub.f32 %v4198_v56, %v6240_v48  ;;  %v2606_v5 = vsel %vm1418_vm1, %v2388_v51, 0.0 }
 0x277   :  { %v2604_v8 = vadd.f32 %v2603_v20, %v2386_v57  ;;  %v2610_v62 = vadd.f32 %v2390_v11, %v2389_v25  ;;  %2599 = vadd.xlane.f32.xlu1 %v2598_v13  ;;  %v6330_v54 = vsub.f32 %v4199_v0, %v6205_v28  ;;  %v6333_v44 = vsub.f32 %v4200_v22, %v6240_v48  ;;  %v4201_v57 = vld [vmem:[#allocation2 + $0x3c8] sm:$0xff]  ;;  %v1979_v11 = vpop.xlane.xlu0 %1978  ;;  %v4202_v0 = vld [vmem:[#allocation2 + $0x3d0] sm:$0xff] }
 0x278   :  { %8094 = vst [vmem:[#allocation96_spill] sm:$0xff] %v6321_v42  ;;  %8095 = vst [vmem:[#allocation97_spill] sm:$0xff] %v6326_v29  ;;  %v6336_v20 = vsub.f32 %v4201_v57, %v6240_v48  ;;  %v2392_v56 = vmul.f32 %v6309_v61, %v6309_v61  ;;  %v2393_v51 = vmul.f32 %v6312_v17, %v6312_v17  ;;  %v4203_v61 = vld [vmem:[#allocation2 + $0x3d8] sm:$0xff] }
 0x279   :  { %8096 = vst [vmem:[#allocation98_spill] sm:$0xff] %v6330_v54  ;;  %8097 = vst [vmem:[#allocation99_spill] sm:$0xff] %v6333_v44  ;;  %v2605_v25 = vadd.f32 %v2604_v8, %v2387_v45  ;;  %v2611_v13 = vadd.f32 %v2610_v62, %v2391_v38  ;;  %v2395_v28 = vmul.f32 %v6321_v42, %v6321_v42  ;;  %v4204_v62 = vld [vmem:[#allocation2 + $0x3e8] sm:$0xff]  ;;  %v6357_v42 = vmul.f32 0.0012755102, %v1979_v11 }
 0x27a   :  { %8098 = vst [vmem:[#allocation100_spill] sm:$0xff] %v6336_v20  ;;  %v6345_v22 = vsub.f32 %v4202_v0, %v6240_v48  ;;  %v2396_v57 = vmul.f32 %v6326_v29, %v6326_v29  ;;  %v2397_v45 = vmul.f32 %v6333_v44, %v6333_v44  ;;  %v6352_v21 = vsub.f32 %v4203_v61, %v6240_v48  ;;  %v4206_v61 = vld [vmem:[#allocation2 + $0x3f0] sm:$0xff] }
 0x27b   :  { %v2607_v8 = vadd.f32 %v2606_v5, %v2605_v25  ;;  %v2612_v32 = vadd.f32 %v2611_v13, %v2392_v56  ;;  %v6355_v38 = vsub.f32 %v4204_v62, %v6240_v48  ;;  %v2394_v0 = vmul.f32 %v6330_v54, %v6330_v54  ;;  %v4205_v25 = vld [vmem:[#allocation2 + $0x3e0] sm:$0xff]  ;;  %v4207_v62 = vld [vmem:[#allocation2 + $0x3f8] sm:$0xff]  ;;  %v1988_v54 = vpop.xlane.xlu1 %1987 }
 0x27c   :  { %8099 = vst [vmem:[#allocation101_spill] sm:$0xff] %v6345_v22  ;;  %8100 = vst [vmem:[#allocation102_spill] sm:$0xff] %v6352_v21  ;;  %v2398_v29 = vmul.f32 %v6336_v20, %v6336_v20  ;;  %v2619_v17 = vadd.f32 %v2397_v45, %v2396_v57  ;;  %v6364_v56 = vsub.f32 %v4205_v25, %v6240_v48  ;;  %v2615_v44 = vsel %vm1418_vm1, %v2395_v28, 0.0 }
 0x27d   :  { %8101 = vst [vmem:[#allocation103_spill] sm:$0xff] %v6355_v38  ;;  %2608 = vadd.xlane.f32.xlu0 %v2607_v8  ;;  %v2613_v5 = vadd.f32 %v2612_v32, %v2393_v51  ;;  %v6367_v13 = vsub.f32 %v4206_v61, %v6281_v60  ;;  %v6370_v11 = vsub.f32 %v4207_v62, %v6281_v60  ;;  %v4208_v32 = vld [vmem:[#allocation2 + $0x400] sm:$0xff]  ;;  %v4209_v62 = vld [vmem:[#allocation2 + $0x408] sm:$0xff] }
 0x27e   :  { %8102 = vst [vmem:[#allocation104_spill] sm:$0xff] %v6364_v56  ;;  %v2399_v57 = vmul.f32 %v6345_v22, %v6345_v22  ;;  %v2620_v45 = vadd.f32 %v2619_v17, %v2398_v29  ;;  %v6376_v51 = vsub.f32 %v4208_v32, %v6281_v60  ;;  %v2400_v8 = vmul.f32 %v6352_v21, %v6352_v21  ;;  %v4210_v29 = vld [vmem:[#allocation2 + $0x410] sm:$0xff]  ;;  %v4211_v21 = vld [vmem:[#allocation2 + $0x420] sm:$0xff] }
 0x27f   :  { %8103 = vst [vmem:[#allocation105_spill] sm:$0xff] %v6367_v13  ;;  %8104 = vst [vmem:[#allocation106_spill] sm:$0xff] %v6370_v11  ;;  %v2614_v48 = vadd.f32 %v2613_v5, %v2394_v0  ;;  %v2402_v25 = vmul.f32 %v6355_v38, %v6355_v38  ;;  %v2403_v61 = vmul.f32 %v6367_v13, %v6367_v13  ;;  %v6392_v32 = vmul.f32 0.0012755102, %v1988_v54 }
 0x280   :  { %8105 = vst [vmem:[#allocation107_spill] sm:$0xff] %v6376_v51  ;;  %v2621_v28 = vadd.f32 %v2620_v45, %v2399_v57  ;;  %v6385_v20 = vsub.f32 %v4209_v62, %v6281_v60  ;;  %v6388_v17 = vsub.f32 %v4210_v29, %v6281_v60  ;;  %v2404_v0 = vmul.f32 %v6370_v11, %v6370_v11  ;;  %v4212_v29 = vld [vmem:[#allocation2 + $0x428] sm:$0xff]  ;;  %v4214_v11 = vld [vmem:[#allocation2 + $0x430] sm:$0xff] }
 0x281   :  { %v2616_v5 = vadd.f32 %v2615_v44, %v2614_v48  ;;  %v2401_v38 = vmul.f32 %v6364_v56, %v6364_v56  ;;  %v6397_v57 = vsub.f32 %v4211_v21, %v6281_v60  ;;  %v2405_v62 = vmul.f32 %v6376_v51, %v6376_v51  ;;  %v4213_v44 = vld [vmem:[#allocation2 + $0x418] sm:$0xff] }
 0x282   :  { %8106 = vst [vmem:[#allocation108_spill] sm:$0xff] %v6385_v20  ;;  %8107 = vst [vmem:[#allocation109_spill] sm:$0xff] %v6388_v17  ;;  %v2622_v45 = vadd.f32 %v2621_v28, %v2400_v8  ;;  %v2628_v13 = vadd.f32 %v2404_v0, %v2403_v61  ;;  %v6402_v22 = vsub.f32 %v4212_v29, %v6316_v2  ;;  %v2624_v54 = vsel %vm1418_vm1, %v2402_v25, 0.0  ;;  %v4215_v8 = vld [vmem:[#allocation2 + $0x438] sm:$0xff]  ;;  %v1997_v0 = vpop.xlane.xlu0 %1996 }
 0x283   :  { %8108 = vst [vmem:[#allocation110_spill] sm:$0xff] %v6397_v57  ;;  %2617 = vadd.xlane.f32.xlu1 %v2616_v5  ;;  %v6406_v48 = vsub.f32 %v4213_v44, %v6281_v60  ;;  %v6409_v21 = vsub.f32 %v4214_v11, %v6316_v2  ;;  %v6412_v28 = vsub.f32 %v4215_v8, %v6316_v2  ;;  %v4216_v44 = vld [vmem:[#allocation2 + $0x440] sm:$0xff] }
 0x284   :  { %8109 = vst [vmem:[#allocation111_spill] sm:$0xff] %v6402_v22  ;;  %v2623_v61 = vadd.f32 %v2622_v45, %v2401_v38  ;;  %v2406_v29 = vmul.f32 %v6385_v20, %v6385_v20  ;;  %v2407_v25 = vmul.f32 %v6388_v17, %v6388_v17  ;;  %v2629_v5 = vadd.f32 %v2628_v13, %v2405_v62  ;;  %v4217_v20 = vld [vmem:[#allocation2 + $0x448] sm:$0xff]  ;;  %v4218_v13 = vld [vmem:[#allocation2 + $0x458] sm:$0xff] }
 0x285   :  { %8110 = vst [vmem:[#allocation112_spill] sm:$0xff] %v6406_v48  ;;  %8111 = vst [vmem:[#allocation113_spill] sm:$0xff] %v6409_v21  ;;  %v2409_v60 = vmul.f32 %v6397_v57, %v6397_v57  ;;  %v6421_v11 = vsub.f32 %v4216_v44, %v6316_v2  ;;  %v2410_v8 = vmul.f32 %v6402_v22, %v6402_v22  ;;  %v6433_v57 = vmul.f32 0.0012755102, %v1997_v0 }
 0x286   :  { %8112 = vst [vmem:[#allocation114_spill] sm:$0xff] %v6412_v28  ;;  %v2411_v38 = vmul.f32 %v6409_v21, %v6409_v21  ;;  %v2625_v45 = vadd.f32 %v2624_v54, %v2623_v61  ;;  %v2630_v51 = vadd.f32 %v2629_v5, %v2406_v29  ;;  %v6428_v56 = vsub.f32 %v4217_v20, %v6316_v2  ;;  %v4219_v61 = vld [vmem:[#allocation2 + $0x450] sm:$0xff]  ;;  %v4220_v20 = vld [vmem:[#allocation2 + $0x460] sm:$0xff] }
 0x287   :  { %8113 = vst [vmem:[#allocation115_spill] sm:$0xff] %v6421_v11  ;;  %v6431_v62 = vsub.f32 %v4218_v13, %v6316_v2  ;;  %v2408_v44 = vmul.f32 %v6406_v48, %v6406_v48  ;;  %v2412_v22 = vmul.f32 %v6412_v28, %v6412_v28  ;;  %v6440_v29 = vsub.f32 %v4219_v61, %v6316_v2  ;;  %v4221_v13 = vld [vmem:[#allocation2 + $0x468] sm:$0xff]  ;;  %v2006_v48 = vpop.xlane.xlu1 %2005 }
 0x288   :  { %8114 = vst [vmem:[#allocation116_spill] sm:$0xff] %v6428_v56  ;;  %v2637_v17 = vadd.f32 %v2411_v38, %v2410_v8  ;;  %2626 = vadd.xlane.f32.xlu0 %v2625_v45  ;;  %v2631_v54 = vadd.f32 %v2630_v51, %v2407_v25  ;;  %v6443_v5 = vsub.f32 %v4220_v20, %v6357_v42  ;;  %v2633_v21 = vsel %vm1418_vm1, %v2409_v60, 0.0  ;;  %v4222_v51 = vld [vmem:[#allocation2 + $0x470] sm:$0xff] }
 0x289   :  { %8115 = vst [vmem:[#allocation117_spill] sm:$0xff] %v6431_v62  ;;  %8116 = vst [vmem:[#allocation118_spill] sm:$0xff] %v6440_v29  ;;  %v6446_v0 = vsub.f32 %v4221_v13, %v6357_v42  ;;  %v2413_v8 = vmul.f32 %v6421_v11, %v6421_v11  ;;  %v6452_v25 = vsub.f32 %v4222_v51, %v6357_v42  ;;  %v4223_v13 = vld [vmem:[#allocation2 + $0x478] sm:$0xff]  ;;  %v6468_v51 = vmul.f32 0.0012755102, %v2006_v48 }
 0x28a   :  { %8117 = vst [vmem:[#allocation119_spill] sm:$0xff] %v6443_v5  ;;  %v2638_v38 = vadd.f32 %v2637_v17, %v2412_v22  ;;  %v2632_v2 = vadd.f32 %v2631_v54, %v2408_v44  ;;  %v2414_v45 = vmul.f32 %v6428_v56, %v6428_v56  ;;  %v2416_v61 = vmul.f32 %v6431_v62, %v6431_v62  ;;  %v4224_v22 = vld [vmem:[#allocation2 + $0x480] sm:$0xff]  ;;  %v4225_v56 = vld [vmem:[#allocation2 + $0x490] sm:$0xff] }
 0x28b   :  { %8118 = vst [vmem:[#allocation120_spill] sm:$0xff] %v6446_v0  ;;  %8119 = vst [vmem:[#allocation121_spill] sm:$0xff] %v6452_v25  ;;  %v2417_v20 = vmul.f32 %v6443_v5, %v6443_v5  ;;  %v6461_v28 = vsub.f32 %v4223_v13, %v6357_v42  ;;  %v6464_v17 = vsub.f32 %v4224_v22, %v6357_v42  ;;  %v4226_v22 = vld [vmem:[#allocation2 + $0x498] sm:$0xff] }
 0x28c   :  { %v2639_v60 = vadd.f32 %v2638_v38, %v2413_v8  ;;  %v2418_v44 = vmul.f32 %v6446_v0, %v6446_v0  ;;  %v2634_v54 = vadd.f32 %v2633_v21, %v2632_v2  ;;  %v2415_v62 = vmul.f32 %v6440_v29, %v6440_v29  ;;  %v4227_v21 = vld [vmem:[#allocation2 + $0x488] sm:$0xff]  ;;  %v4228_v0 = vld [vmem:[#allocation2 + $0x4a0] sm:$0xff] }
 0x28d   :  { %8120 = vst [vmem:[#allocation122_spill] sm:$0xff] %v6461_v28  ;;  %8121 = vst [vmem:[#allocation123_spill] sm:$0xff] %v6464_v17  ;;  %v6473_v8 = vsub.f32 %v4225_v56, %v6357_v42  ;;  %v2419_v13 = vmul.f32 %v6452_v25, %v6452_v25  ;;  %v6478_v11 = vsub.f32 %v4226_v22, %v6392_v32  ;;  %v2642_v48 = vsel %vm1418_vm1, %v2416_v61, 0.0  ;;  %v4230_v22 = vld [vmem:[#allocation2 + $0x4b0] sm:$0xff]  ;;  %v4231_v25 = vld [vmem:[#allocation2 + $0x4b8] sm:$0xff] }
 0x28e   :  { %v2640_v38 = vadd.f32 %v2639_v60, %v2414_v45  ;;  %v2646_v5 = vadd.f32 %v2418_v44, %v2417_v20  ;;  %2635 = vadd.xlane.f32.xlu1 %v2634_v54  ;;  %v6482_v2 = vsub.f32 %v4227_v21, %v6357_v42  ;;  %v6485_v56 = vsub.f32 %v4228_v0, %v6392_v32  ;;  %v4229_v45 = vld [vmem:[#allocation2 + $0x4a8] sm:$0xff]  ;;  %v4236_v29 = vld [vmem:[#allocation2 + $0x4e0] sm:$0xff] }
 0x28f   :  { %8122 = vst [vmem:[#allocation124_spill] sm:$0xff] %v6473_v8  ;;  %8123 = vst [vmem:[#allocation125_spill] sm:$0xff] %v6478_v11  ;;  %v6488_v60 = vsub.f32 %v4229_v45, %v6392_v32  ;;  %v2420_v44 = vmul.f32 %v6461_v28, %v6461_v28  ;;  %v2421_v54 = vmul.f32 %v6464_v17, %v6464_v17  ;;  %v2015_v45 = vpop.xlane.xlu0 %2014 }
 0x290   :  { %8124 = vst [vmem:[#allocation126_spill] sm:$0xff] %v6482_v2  ;;  %8125 = vst [vmem:[#allocation127_spill] sm:$0xff] %v6485_v56  ;;  %v2641_v20 = vadd.f32 %v2640_v38, %v2415_v62  ;;  %v2647_v61 = vadd.f32 %v2646_v5, %v2419_v13  ;;  %v2423_v42 = vmul.f32 %v6473_v8, %v6473_v8  ;;  %v4232_v5 = vld [vmem:[#allocation2 + $0x4c8] sm:$0xff]  ;;  %v4233_v8 = vld [vmem:[#allocation2 + $0x4c0] sm:$0xff] }
 0x291   :  { %8126 = vst [vmem:[#allocation128_spill] sm:$0xff] %v6488_v60  ;;  %v6497_v21 = vsub.f32 %v4230_v22, %v6392_v32  ;;  %v2424_v0 = vmul.f32 %v6478_v11, %v6478_v11  ;;  %v2425_v62 = vmul.f32 %v6485_v56, %v6485_v56  ;;  %v6504_v17 = vsub.f32 %v4231_v25, %v6392_v32  ;;  %v4235_v56 = vld [vmem:[#allocation2 + $0x4d8] sm:$0xff] }
 0x292   :  { %v2643_v38 = vadd.f32 %v2642_v48, %v2641_v20  ;;  %v2648_v28 = vadd.f32 %v2647_v61, %v2420_v44  ;;  %v6507_v13 = vsub.f32 %v4232_v5, %v6392_v32  ;;  %v2422_v22 = vmul.f32 %v6482_v2, %v6482_v2  ;;  %v4234_v61 = vld [vmem:[#allocation2 + $0x4d0] sm:$0xff] }
 0x293   :  { %8127 = vst [vmem:[#allocation129_spill] sm:$0xff] %v6497_v21  ;;  %8128 = vst [vmem:[#allocation130_spill] sm:$0xff] %v6504_v17  ;;  %v6512_v11 = vsub.f32 %v4233_v8, %v6392_v32  ;;  %v2426_v48 = vmul.f32 %v6488_v60, %v6488_v60  ;;  %v2655_v20 = vadd.f32 %v2425_v62, %v2424_v0  ;;  %v6525_v32 = vmul.f32 0.0012755102, %v2015_v45  ;;  %v4237_v45 = vld [vmem:[#allocation2 + $0x4e8] sm:$0xff] }
 0x294   :  { %8129 = vst [vmem:[#allocation131_spill] sm:$0xff] %v6507_v13  ;;  %2644 = vadd.xlane.f32.xlu0 %v2643_v38  ;;  %v2649_v44 = vadd.f32 %v2648_v28, %v2421_v54  ;;  %v6517_v25 = vsub.f32 %v4234_v61, %v6433_v57  ;;  %v6520_v5 = vsub.f32 %v4235_v56, %v6433_v57  ;;  %v2651_v8 = vsel %vm1418_vm1, %v2423_v42, 0.0  ;;  %v4238_v42 = vld [vmem:[#allocation2 + $0x500] sm:$0xff] }
 0x295   :  { %8130 = vst [vmem:[#allocation132_spill] sm:$0xff] %v6512_v11  ;;  %v6523_v2 = vsub.f32 %v4236_v29, %v6433_v57  ;;  %v2427_v0 = vmul.f32 %v6497_v21, %v6497_v21  ;;  %v2656_v28 = vadd.f32 %v2655_v20, %v2426_v48  ;;  %v2428_v62 = vmul.f32 %v6504_v17, %v6504_v17  ;;  %v2024_v29 = vpop.xlane.xlu1 %2023  ;;  %v4241_v17 = vld [vmem:[#allocation2 + $0x510] sm:$0xff] }
 0x296   :  { %8131 = vst [vmem:[#allocation133_spill] sm:$0xff] %v6517_v25  ;;  %8132 = vst [vmem:[#allocation134_spill] sm:$0xff] %v6520_v5  ;;  %v2650_v54 = vadd.f32 %v2649_v44, %v2422_v22  ;;  %v2430_v56 = vmul.f32 %v6507_v13, %v6507_v13  ;;  %v2431_v38 = vmul.f32 %v6517_v25, %v6517_v25  ;;  %v4239_v44 = vld [vmem:[#allocation2 + $0x4f0] sm:$0xff]  ;;  %v4240_v13 = vld [vmem:[#allocation2 + $0x508] sm:$0xff] }
 0x297   :  { %8133 = vst [vmem:[#allocation135_spill] sm:$0xff] %v6523_v2  ;;  %v2657_v61 = vadd.f32 %v2656_v28, %v2427_v0  ;;  %v6537_v60 = vsub.f32 %v4237_v45, %v6433_v57  ;;  %v6540_v21 = vsub.f32 %v4238_v42, %v6433_v57  ;;  %v2432_v22 = vmul.f32 %v6520_v5, %v6520_v5 }
 0x298   :  { %v2652_v48 = vadd.f32 %v2651_v8, %v2650_v54  ;;  %v2429_v20 = vmul.f32 %v6512_v11, %v6512_v11  ;;  %v6547_v25 = vsub.f32 %v4239_v44, %v6433_v57  ;;  %v2433_v0 = vmul.f32 %v6523_v2, %v6523_v2  ;;  %v4242_v44 = vld [vmem:[#allocation2 + $0x4f8] sm:$0xff] }
 0x299   :  { %8134 = vst [vmem:[#allocation136_spill] sm:$0xff] %v6537_v60  ;;  %8135 = vst [vmem:[#allocation137_spill] sm:$0xff] %v6540_v21  ;;  %v2658_v28 = vadd.f32 %v2657_v61, %v2428_v62  ;;  %v2664_v45 = vadd.f32 %v2432_v22, %v2431_v38  ;;  %v6552_v42 = vsub.f32 %v4240_v13, %v6468_v51  ;;  %v6557_v8 = vmul.f32 0.0012755102, %v2024_v29  ;;  %v4243_v2 = vld [vmem:[#allocation2 + $0x518] sm:$0xff]  ;;  %v4244_v29 = vld [vmem:[#allocation2 + $0x520] sm:$0xff] }
 0x29a   :  { %v6555_v5 = vsub.f32 %v4241_v17, %v6468_v51  ;;  %2653 = vadd.xlane.f32.xlu1 %v2652_v48  ;;  %v2660_v54 = vsel %vm1418_vm1, %v2430_v56, 0.0  ;;  %v6561_v11 = vsub.f32 %v4242_v44, %v6433_v57  ;;  %v6564_v62 = vsub.f32 %v4243_v2, %v6468_v51  ;;  %v4245_v56 = vld [vmem:[#allocation2 + $0x528] sm:$0xff] }
 0x29b   :  { %8136 = vst [vmem:[#allocation138_spill] sm:$0xff] %v6552_v42  ;;  %v2659_v38 = vadd.f32 %v2658_v28, %v2429_v20  ;;  %v2434_v13 = vmul.f32 %v6537_v60, %v6537_v60  ;;  %v2437_v17 = vmul.f32 %v6540_v21, %v6540_v21  ;;  %v2665_v61 = vadd.f32 %v2664_v45, %v2433_v0  ;;  %v4246_v0 = vld [vmem:[#allocation2 + $0x538] sm:$0xff]  ;;  %v4247_v21 = vld [vmem:[#allocation2 + $0x540] sm:$0xff] }
 0x29c   :  { %8137 = vst [vmem:[#allocation139_spill] sm:$0xff] %v6555_v5  ;;  %8138 = vst [vmem:[#allocation140_spill] sm:$0xff] %v6561_v11  ;;  %v6571_v22 = vsub.f32 %v4244_v29, %v6468_v51  ;;  %v6574_v57 = vsub.f32 %v4245_v56, %v6468_v51  ;;  %v2438_v2 = vmul.f32 %v6552_v42, %v6552_v42  ;;  %v4248_v42 = vld [vmem:[#allocation2 + $0x548] sm:$0xff] }
 0x29d   :  { %8139 = vst [vmem:[#allocation141_spill] sm:$0xff] %v6564_v62  ;;  %v2439_v48 = vmul.f32 %v6555_v5, %v6555_v5  ;;  %v2661_v20 = vadd.f32 %v2660_v54, %v2659_v38  ;;  %v2435_v28 = vmul.f32 %v6547_v25, %v6547_v25  ;;  %v2666_v44 = vadd.f32 %v2665_v61, %v2434_v13  ;;  %v4249_v61 = vld [vmem:[#allocation2 + $0x550] sm:$0xff] }
 0x29e   :  { %8140 = vst [vmem:[#allocation142_spill] sm:$0xff] %v6571_v22  ;;  %8141 = vst [vmem:[#allocation143_spill] sm:$0xff] %v6574_v57  ;;  %v6583_v45 = vsub.f32 %v4246_v0, %v6468_v51  ;;  %v2440_v29 = vmul.f32 %v6564_v62, %v6564_v62  ;;  %v6588_v60 = vsub.f32 %v4247_v21, %v6525_v32  ;;  %v2669_v13 = vsel %vm1418_vm1, %v2437_v17, 0.0 }
 0x29f   :  { %v2673_v56 = vadd.f32 %v2439_v48, %v2438_v2  ;;  %v6591_v5 = vsub.f32 %v4248_v42, %v6525_v32  ;;  %2662 = vadd.xlane.f32.xlu0 %v2661_v20  ;;  %v2436_v54 = vmul.f32 %v6561_v11, %v6561_v11  ;;  %v2667_v38 = vadd.f32 %v2666_v44, %v2435_v28  ;;  %v4250_v2 = vld [vmem:[#allocation2 + $0x530] sm:$0xff]  ;;  %v4251_v11 = vld [vmem:[#allocation2 + $0x558] sm:$0xff] }
 0x2a0   :  { %8142 = vst [vmem:[#allocation144_spill] sm:$0xff] %v6583_v45  ;;  %8143 = vst [vmem:[#allocation145_spill] sm:$0xff] %v6588_v60  ;;  %v6597_v0 = vsub.f32 %v4249_v61, %v6525_v32  ;;  %v6600_v48 = vsub.f32 %v4250_v2, %v6468_v51  ;;  %v2441_v21 = vmul.f32 %v6571_v22, %v6571_v22  ;;  %v4252_v2 = vld [vmem:[#allocation2 + $0x560] sm:$0xff] }
 0x2a1   :  { %8144 = vst [vmem:[#allocation146_spill] sm:$0xff] %v6591_v5  ;;  %v2442_v42 = vmul.f32 %v6574_v57, %v6574_v57  ;;  %v2674_v20 = vadd.f32 %v2673_v56, %v2440_v29  ;;  %v2668_v62 = vadd.f32 %v2667_v38, %v2436_v54  ;;  %v6607_v28 = vsub.f32 %v4251_v11, %v6525_v32  ;;  %v4253_v29 = vld [vmem:[#allocation2 + $0x570] sm:$0xff]  ;;  %v4256_v57 = vld [vmem:[#allocation2 + $0x588] sm:$0xff] }
 0x2a2   :  { %8145 = vst [vmem:[#allocation147_spill] sm:$0xff] %v6597_v0  ;;  %8146 = vst [vmem:[#allocation148_spill] sm:$0xff] %v6600_v48  ;;  %v2445_v17 = vmul.f32 %v6588_v60, %v6588_v60  ;;  %v2446_v44 = vmul.f32 %v6591_v5, %v6591_v5  ;;  %v2444_v51 = vmul.f32 %v6583_v45, %v6583_v45  ;;  %v4254_v60 = vld [vmem:[#allocation2 + $0x578] sm:$0xff]  ;;  %v4255_v45 = vld [vmem:[#allocation2 + $0x580] sm:$0xff] }
 0x2a3   :  { %8147 = vst [vmem:[#allocation149_spill] sm:$0xff] %v6607_v28  ;;  %v2675_v61 = vadd.f32 %v2674_v20, %v2441_v21  ;;  %v6616_v22 = vsub.f32 %v4252_v2, %v6525_v32  ;;  %v6619_v56 = vsub.f32 %v4253_v29, %v6525_v32  ;;  %v2670_v11 = vadd.f32 %v2669_v13, %v2668_v62  ;;  %v4257_v62 = vld [vmem:[#allocation2 + $0x568] sm:$0xff] }
 0x2a4   :  { %v2447_v54 = vmul.f32 %v6597_v0, %v6597_v0  ;;  %v2682_v38 = vadd.f32 %v2446_v44, %v2445_v17  ;;  %v6624_v5 = vsub.f32 %v4254_v60, %v6557_v8  ;;  %v2443_v21 = vmul.f32 %v6600_v48, %v6600_v48  ;;  %v4258_v0 = vld [vmem:[#allocation2 + $0x590] sm:$0xff] }
 0x2a5   :  { %8148 = vst [vmem:[#allocation150_spill] sm:$0xff] %v6616_v22  ;;  %8149 = vst [vmem:[#allocation151_spill] sm:$0xff] %v6619_v56  ;;  %v2676_v20 = vadd.f32 %v2675_v61, %v2442_v42  ;;  %v6629_v2 = vsub.f32 %v4255_v45, %v6557_v8  ;;  %v6632_v29 = vsub.f32 %v4256_v57, %v6557_v8  ;;  %2671 = vadd.xlane.f32.xlu1 %v2670_v11 }
 0x2a6   :  { %8150 = vst [vmem:[#allocation152_spill] sm:$0xff] %v6624_v5  ;;  %v6635_v13 = vsub.f32 %v4257_v62, %v6525_v32  ;;  %v2448_v60 = vmul.f32 %v6607_v28, %v6607_v28  ;;  %v2683_v17 = vadd.f32 %v2682_v38, %v2447_v54  ;;  %v6640_v42 = vsub.f32 %v4258_v0, %v6557_v8 }
 0x2a7   :  { %8151 = vst [vmem:[#allocation153_spill] sm:$0xff] %v6629_v2  ;;  %8152 = vst [vmem:[#allocation154_spill] sm:$0xff] %v6632_v29  ;;  %v2677_v44 = vadd.f32 %v2676_v20, %v2443_v21  ;;  %v2452_v45 = vmul.f32 %v6624_v5, %v6624_v5  ;;  %v2453_v57 = vmul.f32 %v6629_v2, %v6629_v2  ;;  %v2678_v61 = vsel %vm1418_vm1, %v2444_v51, 0.0  ;;  %v4259_v21 = vld [vmem:[#allocation2 + $0x598] sm:$0xff]  ;;  %v4260_v5 = vld [vmem:[#allocation2 + $0x5a8] sm:$0xff] }
 0x2a8   :  { %8153 = vst [vmem:[#allocation155_spill] sm:$0xff] %v6635_v13  ;;  %8154 = vst [vmem:[#allocation156_spill] sm:$0xff] %v6640_v42  ;;  %v2449_v32 = vmul.f32 %v6616_v22, %v6616_v22  ;;  %v2451_v11 = vmul.f32 %v6619_v56, %v6619_v56  ;;  %v2684_v54 = vadd.f32 %v2683_v17, %v2448_v60  ;;  %v4261_v56 = vld [vmem:[#allocation2 + $0x5a0] sm:$0xff] }
 0x2a9   :  { %v2679_v38 = vadd.f32 %v2678_v61, %v2677_v44  ;;  %v6652_v0 = vsub.f32 %v4259_v21, %v6557_v8  ;;  %v2454_v20 = vmul.f32 %v6632_v29, %v6632_v29  ;;  %v2691_v62 = vadd.f32 %v2453_v57, %v2452_v45  ;;  %v4267_v29 = vld [vmem:[#allocation2 + $0x5d8] sm:$0xff] }
 0x2aa   :  { %v2450_v2 = vmul.f32 %v6635_v13, %v6635_v13  ;;  %v2685_v51 = vadd.f32 %v2684_v54, %v2449_v32  ;;  %v6659_v22 = vsub.f32 %v4260_v5, %v6557_v8  ;;  %v6662_v60 = vsub.f32 %v4261_v56, %v6557_v8 }
 0x2ab   :  { %8155 = vst [vmem:[#allocation157_spill] sm:$0xff] %v6652_v0  ;;  %2680 = vadd.xlane.f32.xlu0 %v2679_v38  ;;  %v2455_v17 = vmul.f32 %v6640_v42, %v6640_v42  ;;  %v2692_v44 = vadd.f32 %v2691_v62, %v2454_v20  ;;  %v2687_v45 = vsel %vm1418_vm1, %v2451_v11, 0.0  ;;  %v2456_v57 = vmul.f32 %v6652_v0, %v6652_v0  ;;  %v6677_v11 = vpop.permute.xlu1 %3299  ;;  %v3214_v62 = vld [vmem:[%s7835_s3 + $0x98] sm:$0xff] }
 0x2ac   :  { %8156 = vst [vmem:[#allocation158_spill] sm:$0xff] %v6659_v22  ;;  %8157 = vst [vmem:[#allocation159_spill] sm:$0xff] %v6662_v60  ;;  %v2686_v61 = vadd.f32 %v2685_v51, %v2450_v2  ;;  %v2458_v5 = vmul.f32 %v6659_v22, %v6659_v22  ;;  %v2457_v38 = vmul.f32 %v6662_v60, %v6662_v60  ;;  %v3212_v2 = vld [vmem:[%s7835_s3 + $0x88] sm:$0xff] }
 0x2ad   :  { %v2693_v32 = vadd.f32 %v2692_v44, %v2455_v17  ;;  %v3216_v17 = vld [vmem:[%s7835_s3 + $0xa8] sm:$0xff] }
 0x2ae   :  { %v2688_v54 = vadd.f32 %v2687_v45, %v2686_v61  ;;  %v2696_v21 = vsel %vm1418_vm1, %v2458_v5, 0.0  ;;  %v3211_v61 = vld [vmem:[%s7835_s3 + $0x80] sm:$0xff]  ;;  %v3218_v45 = vld [vmem:[%s7835_s3 + $0xb8] sm:$0xff] }
 0x2af   :  { %v2694_v8 = vadd.f32 %v2693_v32, %v2456_v57  ;;  %v2033_v32 = vpop.xlane.xlu0 %2032 }
 0x2b0   :  { %2689 = vadd.xlane.f32.xlu1 %v2688_v54  ;;  %v3213_v54 = vld [vmem:[%s7835_s3 + $0x90] sm:$0xff]  ;;  %v2087_v5 = vmul.f32 0.0012755102, %v2033_v32 }
 0x2b1   :  { %v2695_v56 = vadd.f32 %v2694_v8, %v2457_v38  ;;  %v3215_v38 = vld [vmem:[%s7835_s3 + $0xa0] sm:$0xff]  ;;  %v4262_v8 = vld [vmem:[#allocation2 + $0x5b0] sm:$0xff] }
 0x2b3   :  { %v2697_v20 = vadd.f32 %v2696_v21, %v2695_v56  ;;  %v6697_v56 = vsub.f32 %v4262_v8, %v2087_v5  ;;  %v4263_v21 = vld [vmem:[#allocation2 + $0x5b8] sm:$0xff] }
 0x2b5   :  { %2698 = vadd.xlane.f32.xlu0 %v2697_v20  ;;  %8158 = vst [vmem:[#allocation160_spill] sm:$0xff] %v6697_v56  ;;  %v6699_v20 = vsub.f32 %v4263_v21, %v2087_v5  ;;  %v4265_v21 = vld [vmem:[#allocation2 + $0x5c8] sm:$0xff] }
 0x2b6   :  { %v2474_v51 = vpop.xlane.xlu1 %2473 }
 0x2b7   :  { %v2736_v44 = vmul.f32 0.0012755102, %v2474_v51  ;;  %8159 = vst [vmem:[#allocation161_spill] sm:$0xff] %v6699_v20  ;;  %v2459_v51 = vmul.f32 %v6697_v56, %v6697_v56  ;;  %v4266_v56 = vld [vmem:[#allocation2 + $0x5d0] sm:$0xff] }
 0x2b8   :  { %v6722_v0 = vsub.f32 %v4266_v56, %v2087_v5 }
 0x2b9   :  { %v2790_v57 = vadd.f32 1e-05, %v2736_v44 }
 0x2ba   :  { %8162 = vst [vmem:[#allocation164_spill] sm:$0xff] %v6722_v0 }
 0x2bb   :  { %4047 = vrsqrt.f32 %v2790_v57  ;;  %v4264_v57 = vld [vmem:[#allocation2 + $0x5c0] sm:$0xff] }
 0x2bc   :  { %v6716_v32 = vsub.f32 %v4264_v57, %v2087_v5 }
 0x2be   :  { %8160 = vst [vmem:[#allocation162_spill] sm:$0xff] %v6716_v32  ;;  %v2461_v22 = vmul.f32 %v6716_v32, %v6716_v32 }
 0x2c1   :  { %3309 = vperm.xlu1 %4046, %v3212_v2   ;;  %v3217_v2 = vld [vmem:[%s7835_s3 + $0xb0] sm:$0xff] }
 0x2c5   :  { %3319 = vperm.xlu1 %4046, %v3214_v62   ;;  %v6704_v62 = vpop.permute.xlu0 %3294  ;;  %v4048_v44 = vpop.eup %4047 }
 0x2c9   :  { %3329 = vperm.xlu1 %4046, %v3216_v17   ;;  %v2460_v17 = vmul.f32 %v6699_v20, %v6699_v20 }
 0x2cb   :  { %3304 = vperm.xlu0 %4045, %v3211_v61   ;;  %v3219_v61 = vld [vmem:[%s7835_s3 + $0xc0] sm:$0xff]  ;;  %v2700_v8 = vadd.f32 %v2460_v17, %v2459_v51  ;;  %v2463_v51 = vmul.f32 %v6722_v0, %v6722_v0 }
 0x2cc   :  { %v4268_v17 = vld [vmem:[#allocation2 + $0x5e0] sm:$0xff] }
 0x2cd   :  { %3339 = vperm.xlu1 %4046, %v3218_v45   ;;  %v2763_v45 = vld [vmem:[%s7836_s2] sm:$0xff]  ;;  %v2701_v20 = vadd.f32 %v2700_v8, %v2461_v22 }
 0x2cf   :  { %3314 = vperm.xlu0 %4045, %v3213_v54   ;;  %v2483_v54 = vpop.xlane.xlu0 %2482 }
 0x2d0   :  { %v2737_v8 = vmul.f32 0.0012755102, %v2483_v54 }
 0x2d2   :  { %v2791_v0 = vadd.f32 1e-05, %v2737_v8 }
 0x2d3   :  { %3324 = vperm.xlu0 %4045, %v3215_v38   ;;  %v2844_v38 = vmul.f32 %v4048_v44, %v2763_v45  ;;  %v2501_v60 = vpop.xlane.xlu0 %2500  ;;  %v6726_v44 = vsub.f32 %v4267_v29, %v2087_v5  ;;  %v6730_v45 = vsub.f32 %v4268_v17, %v2087_v5 }
 0x2d5   :  { %8163 = vst [vmem:[#allocation165_spill] sm:$0xff] %v6726_v44  ;;  %v2464_v22 = vmul.f32 %v6726_v44, %v6726_v44  ;;  %v2465_v56 = vmul.f32 %v6730_v45, %v6730_v45 }
 0x2d7   :  { %3334 = vperm.xlu0 %4045, %v3217_v2   ;;  %v6718_v2 = vsub.f32 %v4265_v21, %v2087_v5  ;;  %v2705_v32 = vsel %vm1418_vm1, %v2465_v56, 0.0 }
 0x2d9   :  { %8161 = vst [vmem:[#allocation163_spill] sm:$0xff] %v6718_v2  ;;  %v2462_v57 = vmul.f32 %v6718_v2, %v6718_v2  ;;  %v2492_v2 = vpop.xlane.xlu1 %2491 }
 0x2da   :  { %v2738_v28 = vmul.f32 0.0012755102, %v2492_v2 }
 0x2db   :  { %3344 = vperm.xlu0 %4045, %v3219_v61   ;;  %v2702_v42 = vadd.f32 %v2701_v20, %v2462_v57  ;;  %v2519_v61 = vpop.xlane.xlu0 %2518 }
 0x2dd   :  { %v2703_v21 = vadd.f32 %v2702_v42, %v2463_v51  ;;  %v2739_v42 = vmul.f32 0.0012755102, %v2501_v60  ;;  %v2792_v51 = vadd.f32 1e-05, %v2738_v28  ;;  %v2510_v17 = vpop.xlane.xlu1 %2509  ;;  %v2764_v28 = vld [vmem:[%s7836_s2 + $0x8] sm:$0xff] }
 0x2de   :  { %v2740_v54 = vmul.f32 0.0012755102, %v2510_v17 }
 0x2df   :  { %2873 = vperm.xlu0 %4045, %v2844_v38   ;;  %v2537_v38 = vpop.xlane.xlu0 %2536  ;;  %v2704_v20 = vadd.f32 %v2703_v21, %v2464_v22  ;;  %v2793_v44 = vadd.f32 1e-05, %v2739_v42  ;;  %v2772_v22 = vld [vmem:[%s7836_s2 + $0x48] sm:$0xff] }
 0x2e0   :  { %v2794_v2 = vadd.f32 1e-05, %v2740_v54  ;;  %v2743_v17 = vmul.f32 0.0012755102, %v2537_v38  ;;  %v2774_v54 = vld [vmem:[%s7836_s2 + $0x58] sm:$0xff] }
 0x2e1   :  { %v2706_v5 = vadd.f32 %v2705_v32, %v2704_v20  ;;  %v2741_v32 = vmul.f32 0.0012755102, %v2519_v61  ;;  %v2528_v60 = vpop.xlane.xlu1 %2527 }
 0x2e2   :  { %v2742_v8 = vmul.f32 0.0012755102, %v2528_v60  ;;  %v2797_v60 = vadd.f32 1e-05, %v2743_v17 }
 0x2e5   :  { %v2546_v61 = vpop.xlane.xlu1 %2545 }
 0x2e7   :  { %v2555_v57 = vpop.xlane.xlu0 %2554 }
 0x2e8   :  { %v2745_v29 = vmul.f32 0.0012755102, %v2555_v57 }
 0x2ea   :  { %v2799_v13 = vadd.f32 1e-05, %v2745_v29 }
 0x2ec   :  { %4049 = vrsqrt.f32 %v2799_v13 }
 0x2ed   :  { %4051 = vrsqrt.f32 %v2791_v0 }
 0x2ee   :  { %4053 = vrsqrt.f32 %v2792_v51  ;;  %v2796_v51 = vadd.f32 1e-05, %v2742_v8 }
 0x2ef   :  { %4055 = vrsqrt.f32 %v2793_v44  ;;  %v2765_v44 = vld [vmem:[%s7836_s2 + $0x10] sm:$0xff] }
 0x2f1   :  { %2707 = vadd.xlane.f32.xlu1 %v2706_v5 }
 0x2f3   :  { %v2573_v48 = vpop.xlane.xlu0 %2572 }
 0x2f4   :  { %v2747_v21 = vmul.f32 0.0012755102, %v2573_v48  ;;  %v2795_v48 = vadd.f32 1e-05, %v2741_v32  ;;  %v2564_v32 = vpop.xlane.xlu1 %2563 }
 0x2f6   :  { %v2801_v56 = vadd.f32 1e-05, %v2747_v21  ;;  %v4050_v57 = vpop.eup %4049 }
 0x2f7   :  { %v2853_v13 = vmul.f32 %v4050_v57, %v2772_v22  ;;  %v4052_v0 = vpop.eup %4051 }
 0x2f8   :  { %4057 = vrsqrt.f32 %v2801_v56  ;;  %v2845_v20 = vmul.f32 %v4052_v0, %v2764_v28  ;;  %v4054_v29 = vpop.eup %4053  ;;  %v2744_v0 = vmul.f32 0.0012755102, %v2546_v61 }
 0x2f9   :  { %2918 = vperm.xlu0 %4045, %v2853_v13   ;;  %4059 = vrsqrt.f32 %v2794_v2  ;;  %v4056_v21 = vpop.eup %4055  ;;  %v2846_v22 = vmul.f32 %v4054_v29, %v2765_v44  ;;  %v2766_v2 = vld [vmem:[%s7836_s2 + $0x18] sm:$0xff]  ;;  %v2582_v8 = vpop.xlane.xlu1 %2581  ;;  %v2746_v29 = vmul.f32 0.0012755102, %v2564_v32 }
 0x2fa   :  { %4061 = vrsqrt.f32 %v2795_v48  ;;  %v2847_v38 = vmul.f32 %v4056_v21, %v2766_v2  ;;  %v2767_v48 = vld [vmem:[%s7836_s2 + $0x20] sm:$0xff] }
 0x2fb   :  { %v2800_v21 = vadd.f32 1e-05, %v2746_v29 }
 0x2fe   :  { %v2591_v5 = vpop.xlane.xlu0 %2590 }
 0x2ff   :  { %v2749_v42 = vmul.f32 0.0012755102, %v2591_v5 }
 0x301   :  { %v2803_v56 = vadd.f32 1e-05, %v2749_v42 }
 0x302   :  { %2878 = vperm.xlu1 %4046, %v2845_v20   ;;  %v4058_v57 = vpop.eup %4057  ;;  %v2798_v20 = vadd.f32 1e-05, %v2744_v0 }
 0x303   :  { %4063 = vrsqrt.f32 %v2803_v56  ;;  %v2855_v13 = vmul.f32 %v4058_v57, %v2774_v54  ;;  %v4060_v28 = vpop.eup %4059  ;;  %v2776_v54 = vld [vmem:[%s7836_s2 + $0x68] sm:$0xff] }
 0x304   :  { %4065 = vrsqrt.f32 %v2796_v51  ;;  %v2848_v44 = vmul.f32 %v4060_v28, %v2767_v48  ;;  %v4062_v42 = vpop.eup %4061  ;;  %v2768_v51 = vld [vmem:[%s7836_s2 + $0x28] sm:$0xff]  ;;  %v2600_v17 = vpop.xlane.xlu1 %2599 }
 0x305   :  { %2928 = vperm.xlu0 %4045, %v2855_v13   ;;  %4067 = vrsqrt.f32 %v2797_v60  ;;  %v2849_v2 = vmul.f32 %v4062_v42, %v2768_v51  ;;  %v2769_v13 = vld [vmem:[%s7836_s2 + $0x30] sm:$0xff]  ;;  %v2750_v28 = vmul.f32 0.0012755102, %v2600_v17  ;;  %v2771_v17 = vld [vmem:[%s7836_s2 + $0x40] sm:$0xff] }
 0x306   :  { %2883 = vperm.xlu1 %4046, %v2846_v22   ;;  %4069 = vrsqrt.f32 %v2798_v20  ;;  %v2748_v22 = vmul.f32 0.0012755102, %v2582_v8  ;;  %v2770_v8 = vld [vmem:[%s7836_s2 + $0x38] sm:$0xff] }
 0x30a   :  { %2888 = vperm.xlu1 %4046, %v2847_v38   ;;  %v2609_v5 = vpop.xlane.xlu0 %2608  ;;  %v2802_v38 = vadd.f32 1e-05, %v2748_v22 }
 0x30b   :  { %v2751_v61 = vmul.f32 0.0012755102, %v2609_v5 }
 0x30d   :  { %v2805_v56 = vadd.f32 1e-05, %v2751_v61  ;;  %v4064_v57 = vpop.eup %4063 }
 0x30e   :  { %2893 = vperm.xlu1 %4046, %v2848_v44   ;;  %v4066_v32 = vpop.eup %4065  ;;  %v2857_v60 = vmul.f32 %v4064_v57, %v2776_v54  ;;  %v2804_v44 = vadd.f32 1e-05, %v2750_v28 }
 0x30f   :  { %4071 = vrsqrt.f32 %v2805_v56  ;;  %v2850_v48 = vmul.f32 %v4066_v32, %v2769_v13  ;;  %v4068_v20 = vpop.eup %4067  ;;  %v2773_v13 = vld [vmem:[%s7836_s2 + $0x50] sm:$0xff] }
 0x310   :  { %v2618_v0 = vpop.xlane.xlu1 %2617  ;;  %4073 = vrsqrt.f32 %v2800_v21  ;;  %2938 = vperm.xlu0 %4045, %v2857_v60   ;;  %v2851_v42 = vmul.f32 %v4068_v20, %v2770_v8  ;;  %v4070_v61 = vpop.eup %4069  ;;  %v2778_v21 = vld [vmem:[%s7836_s2 + $0x78] sm:$0xff]  ;;  %v2775_v20 = vld [vmem:[%s7836_s2 + $0x60] sm:$0xff] }
 0x311   :  { %v2752_v29 = vmul.f32 0.0012755102, %v2618_v0  ;;  %4075 = vrsqrt.f32 %v2802_v38  ;;  %v2852_v57 = vmul.f32 %v4070_v61, %v2771_v17  ;;  %v2777_v61 = vld [vmem:[%s7836_s2 + $0x70] sm:$0xff] }
 0x312   :  { %2898 = vperm.xlu1 %4046, %v2849_v2   ;;  %4077 = vrsqrt.f32 %v2804_v44 }
 0x313   :  { %v2806_v54 = vadd.f32 1e-05, %v2752_v29 }
 0x315   :  { %v2627_v5 = vpop.xlane.xlu0 %2626 }
 0x316   :  { %2903 = vperm.xlu1 %4046, %v2850_v48   ;;  %v2753_v51 = vmul.f32 0.0012755102, %v2627_v5  ;;  %v2780_v5 = vld [vmem:[%s7836_s2 + $0x88] sm:$0xff] }
 0x318   :  { %v2807_v22 = vadd.f32 1e-05, %v2753_v51 }
 0x319   :  { %v4072_v56 = vpop.eup %4071 }
 0x31a   :  { %2908 = vperm.xlu1 %4046, %v2851_v42   ;;  %4079 = vrsqrt.f32 %v2807_v22  ;;  %v2859_v2 = vmul.f32 %v4072_v56, %v2778_v21  ;;  %v4074_v32 = vpop.eup %4073  ;;  %v2779_v21 = vld [vmem:[%s7836_s2 + $0x80] sm:$0xff] }
 0x31b   :  { %4081 = vrsqrt.f32 %v2806_v54  ;;  %v2636_v60 = vpop.xlane.xlu1 %2635  ;;  %v2854_v38 = vmul.f32 %v4074_v32, %v2773_v13  ;;  %v4076_v48 = vpop.eup %4075 }
 0x31c   :  { %v2754_v0 = vmul.f32 0.0012755102, %v2636_v60  ;;  %2948 = vperm.xlu0 %4045, %v2859_v2   ;;  %v2856_v44 = vmul.f32 %v4076_v48, %v2775_v20  ;;  %v4078_v42 = vpop.eup %4077  ;;  %v2781_v60 = vld [vmem:[%s7836_s2 + $0x90] sm:$0xff]  ;;  %v2782_v20 = vld [vmem:[%s7836_s2 + $0x98] sm:$0xff] }
 0x31d   :  { %v2858_v56 = vmul.f32 %v4078_v42, %v2777_v61 }
 0x31e   :  { %2913 = vperm.xlu1 %4046, %v2852_v57   ;;  %v2808_v28 = vadd.f32 1e-05, %v2754_v0 }
 0x320   :  { %4083 = vrsqrt.f32 %v2808_v28 }
 0x321   :  { %v2645_v8 = vpop.xlane.xlu0 %2644 }
 0x322   :  { %2923 = vperm.xlu1 %4046, %v2854_v38   ;;  %v2755_v29 = vmul.f32 0.0012755102, %v2645_v8 }
 0x324   :  { %v2809_v51 = vadd.f32 1e-05, %v2755_v29  ;;  %v4080_v54 = vpop.eup %4079 }
 0x325   :  { %v4082_v17 = vpop.eup %4081  ;;  %v2861_v22 = vmul.f32 %v4080_v54, %v2780_v5 }
 0x326   :  { %2933 = vperm.xlu1 %4046, %v2856_v44   ;;  %4085 = vrsqrt.f32 %v2809_v51  ;;  %v2860_v32 = vmul.f32 %v4082_v17, %v2779_v21  ;;  %v2783_v51 = vld [vmem:[%s7836_s2 + $0xa0] sm:$0xff] }
 0x327   :  { %v2654_v57 = vpop.xlane.xlu1 %2653  ;;  %2958 = vperm.xlu0 %4045, %v2861_v22  }
 0x328   :  { %v2756_v2 = vmul.f32 0.0012755102, %v2654_v57 }
 0x32a   :  { %2943 = vperm.xlu1 %4046, %v2858_v56   ;;  %v2810_v13 = vadd.f32 1e-05, %v2756_v2  ;;  %v4084_v0 = vpop.eup %4083  ;;  %v2784_v56 = vld [vmem:[%s7836_s2 + $0xa8] sm:$0xff] }
 0x32b   :  { %v2862_v48 = vmul.f32 %v4084_v0, %v2781_v60 }
 0x32c   :  { %4087 = vrsqrt.f32 %v2810_v13  ;;  %v2663_v38 = vpop.xlane.xlu0 %2662 }
 0x32d   :  { %v2757_v28 = vmul.f32 0.0012755102, %v2663_v38  ;;  %v2785_v38 = vld [vmem:[%s7836_s2 + $0xb0] sm:$0xff] }
 0x32e   :  { %2953 = vperm.xlu1 %4046, %v2860_v32  }
 0x32f   :  { %v2811_v8 = vadd.f32 1e-05, %v2757_v28 }
 0x330   :  { %v4086_v29 = vpop.eup %4085 }
 0x331   :  { %4089 = vrsqrt.f32 %v2811_v8  ;;  %v2863_v44 = vmul.f32 %v4086_v29, %v2782_v20 }
 0x332   :  { %2963 = vperm.xlu1 %4046, %v2862_v48   ;;  %v2672_v5 = vpop.xlane.xlu1 %2671 }
 0x333   :  { %v2758_v42 = vmul.f32 0.0012755102, %v2672_v5  ;;  %2968 = vperm.xlu0 %4045, %v2863_v44   ;;  %v2786_v44 = vld [vmem:[%s7836_s2 + $0xb8] sm:$0xff] }
 0x335   :  { %v2812_v61 = vadd.f32 1e-05, %v2758_v42 }
 0x336   :  { %v4088_v54 = vpop.eup %4087 }
 0x337   :  { %4091 = vrsqrt.f32 %v2812_v61  ;;  %v2864_v21 = vmul.f32 %v4088_v54, %v2783_v51  ;;  %v2787_v61 = vld [vmem:[%s7836_s2 + $0xc0] sm:$0xff] }
 0x338   :  { %v2681_v17 = vpop.xlane.xlu0 %2680 }
 0x339   :  { %v2759_v22 = vmul.f32 0.0012755102, %v2681_v17  ;;  %2973 = vperm.xlu1 %4046, %v2864_v21  }
 0x33b   :  { %v2813_v57 = vadd.f32 1e-05, %v2759_v22  ;;  %v4090_v2 = vpop.eup %4089  ;;  %v2788_v22 = vld [vmem:[%s7836_s2 + $0xc8] sm:$0xff] }
 0x33c   :  { %v2865_v13 = vmul.f32 %v4090_v2, %v2784_v56 }
 0x33d   :  { %4093 = vrsqrt.f32 %v2813_v57  ;;  %v2690_v32 = vpop.xlane.xlu1 %2689 }
 0x33e   :  { %v2760_v60 = vmul.f32 0.0012755102, %v2690_v32  ;;  %2978 = vperm.xlu0 %4045, %v2865_v13   ;;  %v3221_v32 = vld [vmem:[%s7835_s3 + $0xd0] sm:$0xff] }
 0x340   :  { %v2814_v0 = vadd.f32 1e-05, %v2760_v60 }
 0x341   :  { %v4092_v28 = vpop.eup %4091 }
 0x342   :  { %4095 = vrsqrt.f32 %v2814_v0  ;;  %v2699_v48 = vpop.xlane.xlu0 %2698  ;;  %v2866_v8 = vmul.f32 %v4092_v28, %v2785_v38 }
 0x343   :  { %v2761_v20 = vmul.f32 0.0012755102, %v2699_v48 }
 0x344   :  { %2983 = vperm.xlu1 %4046, %v2866_v8  }
 0x345   :  { %v2815_v29 = vadd.f32 1e-05, %v2761_v20 }
 0x347   :  { %v4094_v5 = vpop.eup %4093  ;;  %4097 = vrsqrt.f32 %v2815_v29 }
 0x348   :  { %v2867_v42 = vmul.f32 %v4094_v5, %v2786_v44 }
 0x34a   :  { %v6806_v51 = vpop.permute.xlu0 %3304  ;;  %2988 = vperm.xlu0 %4045, %v2867_v42  }
 0x34c   :  { %v4096_v54 = vpop.eup %4095 }
 0x34d   :  { %v2868_v17 = vmul.f32 %v4096_v54, %v2787_v61 }
 0x34e   :  { %v6811_v21 = vpop.permute.xlu0 %3314 }
 0x34f   :  { %2993 = vperm.xlu1 %4046, %v2868_v17  }
 0x351   :  { %v4098_v56 = vpop.eup %4097 }
 0x352   :  { %v6816_v57 = vpop.permute.xlu0 %3324  ;;  %v2869_v2 = vmul.f32 %v4098_v56, %v2788_v22 }
 0x354   :  { %2998 = vperm.xlu0 %4045, %v2869_v2  }
 0x356   :  { %v6821_v13 = vpop.permute.xlu0 %3334 }
 0x358   :  { %3354 = vperm.xlu0 %4045, %v3221_v32  }
 0x35a   :  { %v6823_v60 = vpop.permute.xlu0 %3344 }
 0x35e   :  { %v2874_v0 = vpop.permute.xlu0 %2873 }
 0x35f   :  { %v3006_v38 = vmul.f32 %v2874_v0, %v5725_v4  ;;  %v3007_v28 = vmul.f32 %v2874_v0, %v5727_v6  ;;  %v3008_v48 = vmul.f32 %v2874_v0, %v5729_v30  ;;  %v3009_v20 = vmul.f32 %v2874_v0, %v5733_v18 }
 0x360   :  { %v3010_v8 = vmul.f32 %v2874_v0, %v5743_v16  ;;  %v3011_v29 = vmul.f32 %v2874_v0, %v5746_v24  ;;  %v3012_v44 = vmul.f32 %v2874_v0, %v5736_v14 }
 0x361   :  { %v3357_v5 = vadd.f32 %v5692_v41, %v3006_v38  ;;  %v3358_v42 = vadd.f32 %v5692_v41, %v3007_v28  ;;  %v3359_v61 = vadd.f32 %v5692_v41, %v3008_v48  ;;  %v3360_v4 = vadd.f32 %v5692_v41, %v3009_v20 }
 0x362   :  { %v3361_v6 = vadd.f32 %v5692_v41, %v3010_v8  ;;  %v3362_v30 = vadd.f32 %v5692_v41, %v3011_v29  ;;  %v3363_v18 = vadd.f32 %v5692_v41, %v3012_v44  ;;  %v6861_v41 = vpop.permute.xlu1 %3309 }
 0x363   :  { %3546 = vst [vmem:[%s7837_s4] sm:$0xff] %v3357_v5  ;;  %3547 = vst [vmem:[%s7837_s4 + $0x8] sm:$0xff] %v3358_v42 }
 0x364   :  { %3548 = vst [vmem:[%s7837_s4 + $0x10] sm:$0xff] %v3359_v61  ;;  %3549 = vst [vmem:[%s7837_s4 + $0x18] sm:$0xff] %v3360_v4 }
 0x365   :  { %3550 = vst [vmem:[%s7837_s4 + $0x20] sm:$0xff] %v3361_v6  ;;  %3551 = vst [vmem:[%s7837_s4 + $0x28] sm:$0xff] %v3362_v30 }
 0x366   :  { %3552 = vst.msk [vmem:[%s7837_s4 + $0x30] sm:$0xff] %vm1418_vm1, %v3363_v18  ;;  %v6863_v14 = vpop.permute.xlu1 %3319 }
 0x36a   :  { %v6865_v16 = vpop.permute.xlu1 %3329 }
 0x36e   :  { %v6867_v24 = vpop.permute.xlu1 %3339 }
 0x378   :  { %v2919_v54 = vpop.permute.xlu0 %2918 }
 0x379   :  { %v3069_v17 = vmul.f32 %v2919_v54, %v6020_v53  ;;  %v3070_v22 = vmul.f32 %v2919_v54, %v6023_v43  ;;  %v3071_v56 = vmul.f32 %v2919_v54, %v6032_v12  ;;  %v3072_v2 = vmul.f32 %v2919_v54, %v6041_v46 }
 0x37a   :  { %v3073_v0 = vmul.f32 %v2919_v54, %v6048_v63  ;;  %v3074_v38 = vmul.f32 %v2919_v54, %v6063_v47  ;;  %v3075_v28 = vmul.f32 %v2919_v54, %v6051_v49 }
 0x37b   :  { %v3420_v20 = vadd.f32 %v5719_v59, %v3069_v17  ;;  %v3421_v8 = vadd.f32 %v5719_v59, %v3070_v22  ;;  %v3422_v53 = vadd.f32 %v5719_v59, %v3071_v56  ;;  %v3423_v43 = vadd.f32 %v5719_v59, %v3072_v2 }
 0x37c   :  { %v3424_v12 = vadd.f32 %v5719_v59, %v3073_v0  ;;  %v3425_v46 = vadd.f32 %v5719_v59, %v3074_v38  ;;  %v3426_v29 = vadd.f32 %v5719_v59, %v3075_v28 }
 0x37d   :  { %3609 = vst [vmem:[%s7837_s4 + $0x1f8] sm:$0xff] %v3420_v20  ;;  %3610 = vst [vmem:[%s7837_s4 + $0x200] sm:$0xff] %v3421_v8  ;;  %v2789_v20 = vld [vmem:[%s7836_s2 + $0xd0] sm:$0xff]  ;;  %v8166_v8 = vld [vmem:[#allocation14_spill] sm:$0xff] }
 0x37e   :  { %v2708_v32 = vpop.xlane.xlu1 %2707  ;;  %3611 = vst [vmem:[%s7837_s4 + $0x208] sm:$0xff] %v3422_v53  ;;  %3612 = vst [vmem:[%s7837_s4 + $0x210] sm:$0xff] %v3423_v43  ;;  %v8167_v43 = vld [vmem:[#allocation58_spill] sm:$0xff] }
 0x37f   :  { %v2762_v48 = vmul.f32 0.0012755102, %v2708_v32  ;;  %3613 = vst [vmem:[%s7837_s4 + $0x218] sm:$0xff] %v3424_v12  ;;  %3614 = vst [vmem:[%s7837_s4 + $0x220] sm:$0xff] %v3425_v46 }
 0x380   :  { %3615 = vst.msk [vmem:[%s7837_s4 + $0x228] sm:$0xff] %vm1418_vm1, %v3426_v29  ;;  %v8168_v29 = vld [vmem:[#allocation4_spill] sm:$0xff] }
 0x381   :  { %v2816_v63 = vadd.f32 1e-05, %v2762_v48 }
 0x382   :  { %v2879_v49 = vpop.permute.xlu1 %2878 }
 0x383   :  { %4099 = vrsqrt.f32 %v2816_v63  ;;  %v3013_v59 = vmul.f32 %v2879_v49, %v5750_v15  ;;  %v3014_v47 = vmul.f32 %v2879_v49, %v5752_v10  ;;  %v3015_v44 = vmul.f32 %v2879_v49, %v5756_v19 }
 0x384   :  { %v3016_v5 = vmul.f32 %v2879_v49, %v5764_v52  ;;  %v3017_v42 = vmul.f32 %v2879_v49, %v5767_v23  ;;  %v3018_v61 = vmul.f32 %v2879_v49, %v5779_v33  ;;  %v3019_v4 = vmul.f32 %v2879_v49, %v5774_v7  ;;  %v6932_v17 = vpop.permute.xlu0 %2928 }
 0x385   :  { %v3364_v6 = vadd.f32 %v5697_v40, %v3013_v59  ;;  %v3365_v30 = vadd.f32 %v5697_v40, %v3014_v47  ;;  %v3366_v18 = vadd.f32 %v5697_v40, %v3015_v44  ;;  %v6999_v12 = vmul.f32 %v6932_v17, %v8167_v43 }
 0x386   :  { %v3367_v15 = vadd.f32 %v5697_v40, %v3016_v5  ;;  %v3368_v10 = vadd.f32 %v5697_v40, %v3017_v42  ;;  %v3369_v19 = vadd.f32 %v5697_v40, %v3018_v61  ;;  %v3370_v52 = vadd.f32 %v5697_v40, %v3019_v4  ;;  %v2884_v54 = vpop.permute.xlu1 %2883  ;;  %v8169_v4 = vld [vmem:[#allocation15_spill] sm:$0xff] }
 0x387   :  { %3553 = vst [vmem:[%s7837_s4 + $0x38] sm:$0xff] %v3364_v6  ;;  %3554 = vst [vmem:[%s7837_s4 + $0x40] sm:$0xff] %v3365_v30  ;;  %v3020_v23 = vmul.f32 %v2884_v54, %v5776_v39  ;;  %v3021_v7 = vmul.f32 %v2884_v54, %v5783_v35  ;;  %v3022_v33 = vmul.f32 %v2884_v54, %v5786_v50  ;;  %v8170_v30 = vld [vmem:[#allocation16_spill] sm:$0xff] }
 0x388   :  { %3555 = vst [vmem:[%s7837_s4 + $0x48] sm:$0xff] %v3366_v18  ;;  %v3023_v40 = vmul.f32 %v2884_v54, %v5796_v9  ;;  %3556 = vst [vmem:[%s7837_s4 + $0x50] sm:$0xff] %v3367_v15  ;;  %v3024_v39 = vmul.f32 %v2884_v54, %v5803_v34  ;;  %v3025_v35 = vmul.f32 %v2884_v54, %v5813_v36  ;;  %v8171_v15 = vld [vmem:[#allocation18_spill] sm:$0xff] }
 0x389   :  { %3557 = vst [vmem:[%s7837_s4 + $0x58] sm:$0xff] %v3368_v10  ;;  %3558 = vst [vmem:[%s7837_s4 + $0x60] sm:$0xff] %v3369_v19  ;;  %v3026_v50 = vmul.f32 %v2884_v54, %v5806_v31  ;;  %v6952_v9 = vmul.f32 %v6932_v17, %v6098_v55  ;;  %v3371_v22 = vadd.f32 %v5695_v26, %v3020_v23  ;;  %v8164_v55 = vld [vmem:[#allocation13_spill] sm:$0xff]  ;;  %v8172_v19 = vld [vmem:[#allocation19_spill] sm:$0xff] }
 0x38a   :  { %3559 = vst.msk [vmem:[%s7837_s4 + $0x68] sm:$0xff] %vm1418_vm1, %v3370_v52  ;;  %v3372_v56 = vadd.f32 %v5695_v26, %v3021_v7  ;;  %v3373_v2 = vadd.f32 %v5695_v26, %v3022_v33  ;;  %v3374_v32 = vadd.f32 %v5695_v26, %v3023_v40  ;;  %v3375_v0 = vadd.f32 %v5695_v26, %v3024_v39  ;;  %v2889_v38 = vpop.permute.xlu1 %2888  ;;  %v8173_v54 = vld [vmem:[#allocation20_spill] sm:$0xff]  ;;  %v8174_v7 = vld [vmem:[#allocation23_spill] sm:$0xff]  ;;  %v8175_v40 = vld [vmem:[#allocation21_spill] sm:$0xff] }
 0x38b   :  { %v3376_v34 = vadd.f32 %v5695_v26, %v3025_v35  ;;  %v3377_v36 = vadd.f32 %v5695_v26, %v3026_v50  ;;  %v6963_v31 = vmul.f32 %v6932_v17, %v6105_v37  ;;  %3560 = vst [vmem:[%s7837_s4 + $0x70] sm:$0xff] %v3371_v22  ;;  %v3027_v26 = vmul.f32 %v2889_v38, %v5810_v58  ;;  %v8176_v35 = vld [vmem:[#allocation59_spill] sm:$0xff] }
 0x38c   :  { %3561 = vst [vmem:[%s7837_s4 + $0x78] sm:$0xff] %v3372_v56  ;;  %3562 = vst [vmem:[%s7837_s4 + $0x80] sm:$0xff] %v3373_v2  ;;  %v3028_v37 = vmul.f32 %v2889_v38, %v8164_v55  ;;  %v3029_v28 = vmul.f32 %v2889_v38, %v5817_v3  ;;  %v3030_v48 = vmul.f32 %v2889_v38, %v5830_v27  ;;  %v8165_v3 = vld [vmem:[#allocation17_spill] sm:$0xff]  ;;  %v8177_v22 = vld [vmem:[#allocation3_spill] sm:$0xff] }
 0x38d   :  { %3563 = vst [vmem:[%s7837_s4 + $0x88] sm:$0xff] %v3374_v32  ;;  %3564 = vst [vmem:[%s7837_s4 + $0x90] sm:$0xff] %v3375_v0  ;;  %v3031_v58 = vmul.f32 %v2889_v38, %v5838_v1  ;;  %v3032_v27 = vmul.f32 %v2889_v38, %v8165_v3  ;;  %v3033_v53 = vmul.f32 %v2889_v38, %v8166_v8  ;;  %v4100_v46 = vpop.eup %4099 }
 0x38e   :  { %3565 = vst [vmem:[%s7837_s4 + $0x98] sm:$0xff] %v3376_v34  ;;  %3566 = vst.msk [vmem:[%s7837_s4 + $0xa0] sm:$0xff] %vm1418_vm1, %v3377_v36  ;;  %v3378_v63 = vadd.f32 %v8168_v29, %v3027_v26  ;;  %v3379_v49 = vadd.f32 %v8168_v29, %v3028_v37  ;;  %v3380_v59 = vadd.f32 %v8168_v29, %v3029_v28  ;;  %v2894_v42 = vpop.permute.xlu1 %2893  ;;  %v3220_v34 = vld [vmem:[%s7835_s3 + $0xc8] sm:$0xff]  ;;  %v8178_v37 = vld [vmem:[#allocation60_spill] sm:$0xff] }
 0x38f   :  { %v3381_v47 = vadd.f32 %v8168_v29, %v3030_v48  ;;  %v3382_v44 = vadd.f32 %v8168_v29, %v3031_v58  ;;  %v3383_v1 = vadd.f32 %v8168_v29, %v3032_v27  ;;  %v3384_v5 = vadd.f32 %v8168_v29, %v3033_v53  ;;  %v8179_v48 = vld [vmem:[#allocation22_spill] sm:$0xff]  ;;  %v8180_v58 = vld [vmem:[#allocation24_spill] sm:$0xff]  ;;  %v8181_v27 = vld [vmem:[#allocation25_spill] sm:$0xff] }
 0x390   :  { %v2870_v61 = vmul.f32 %v4100_v46, %v2789_v20  ;;  %3567 = vst [vmem:[%s7837_s4 + $0xa8] sm:$0xff] %v3378_v63  ;;  %3568 = vst [vmem:[%s7837_s4 + $0xb0] sm:$0xff] %v3379_v49  ;;  %v3034_v6 = vmul.f32 %v2894_v42, %v8169_v4  ;;  %v3035_v18 = vmul.f32 %v2894_v42, %v8170_v30  ;;  %v8182_v53 = vld [vmem:[#allocation26_spill] sm:$0xff]  ;;  %v8183_v46 = vld [vmem:[#allocation27_spill] sm:$0xff] }
 0x391   :  { %3569 = vst [vmem:[%s7837_s4 + $0xb8] sm:$0xff] %v3380_v59  ;;  %3570 = vst [vmem:[%s7837_s4 + $0xc0] sm:$0xff] %v3381_v47  ;;  %v3036_v10 = vmul.f32 %v2894_v42, %v8171_v15  ;;  %v3037_v52 = vmul.f32 %v2894_v42, %v8172_v19  ;;  %v3038_v23 = vmul.f32 %v2894_v42, %v8173_v54  ;;  %v8184_v63 = vld [vmem:[#allocation30_spill] sm:$0xff]  ;;  %v8185_v59 = vld [vmem:[#allocation28_spill] sm:$0xff] }
 0x392   :  { %3571 = vst [vmem:[%s7837_s4 + $0xc8] sm:$0xff] %v3382_v44  ;;  %3572 = vst [vmem:[%s7837_s4 + $0xd0] sm:$0xff] %v3383_v1  ;;  %v3039_v33 = vmul.f32 %v2894_v42, %v8174_v7  ;;  %v3040_v39 = vmul.f32 %v2894_v42, %v8175_v40  ;;  %3003 = vperm.xlu1 %4046, %v2870_v61   ;;  %v7039_v50 = vmul.f32 %v6932_v17, %v8176_v35  ;;  %v2899_v55 = vpop.permute.xlu1 %2898  ;;  %v8186_v44 = vld [vmem:[#allocation62_spill] sm:$0xff]  ;;  %v8188_v19 = vld [vmem:[#allocation61_spill] sm:$0xff] }
 0x393   :  { %3573 = vst.msk [vmem:[%s7837_s4 + $0xd8] sm:$0xff] %vm1418_vm1, %v3384_v5  ;;  %v3385_v56 = vadd.f32 %v8177_v22, %v3034_v6  ;;  %v3386_v2 = vadd.f32 %v8177_v22, %v3035_v18  ;;  %v3387_v32 = vadd.f32 %v8177_v22, %v3036_v10  ;;  %v3388_v0 = vadd.f32 %v8177_v22, %v3037_v52  ;;  %v8187_v5 = vld [vmem:[#allocation6_spill] sm:$0xff]  ;;  %v8189_v54 = vld [vmem:[#allocation29_spill] sm:$0xff]  ;;  %v8190_v7 = vld [vmem:[#allocation31_spill] sm:$0xff] }
 0x394   :  { %v3389_v36 = vadd.f32 %v8177_v22, %v3038_v23  ;;  %v3390_v38 = vadd.f32 %v8177_v22, %v3039_v33  ;;  %v3391_v26 = vadd.f32 %v8177_v22, %v3040_v39  ;;  %v7053_v28 = vmul.f32 %v6932_v17, %v8178_v37  ;;  %v8191_v33 = vld [vmem:[#allocation32_spill] sm:$0xff]  ;;  %v8192_v39 = vld [vmem:[#allocation33_spill] sm:$0xff]  ;;  %v8193_v22 = vld [vmem:[#allocation34_spill] sm:$0xff] }
 0x395   :  { %3574 = vst [vmem:[%s7837_s4 + $0xe0] sm:$0xff] %v3385_v56  ;;  %3575 = vst [vmem:[%s7837_s4 + $0xe8] sm:$0xff] %v3386_v2  ;;  %v3041_v20 = vmul.f32 %v2899_v55, %v8179_v48  ;;  %v3042_v3 = vmul.f32 %v2899_v55, %v8180_v58  ;;  %v3043_v8 = vmul.f32 %v2899_v55, %v8181_v27  ;;  %v8194_v2 = vld [vmem:[#allocation38_spill] sm:$0xff] }
 0x396   :  { %3576 = vst [vmem:[%s7837_s4 + $0xf0] sm:$0xff] %v3387_v32  ;;  %3577 = vst [vmem:[%s7837_s4 + $0xf8] sm:$0xff] %v3388_v0  ;;  %v3044_v43 = vmul.f32 %v2899_v55, %v8182_v53  ;;  %v3045_v29 = vmul.f32 %v2899_v55, %v8183_v46  ;;  %v3046_v49 = vmul.f32 %v2899_v55, %v8184_v63  ;;  %3349 = vperm.xlu1 %4046, %v3220_v34   ;;  %v2904_v10 = vpop.permute.xlu1 %2903  ;;  %v8195_v0 = vld [vmem:[#allocation35_spill] sm:$0xff] }
 0x397   :  { %3578 = vst [vmem:[%s7837_s4 + $0x100] sm:$0xff] %v3389_v36  ;;  %3579 = vst [vmem:[%s7837_s4 + $0x108] sm:$0xff] %v3390_v38  ;;  %v3047_v47 = vmul.f32 %v2899_v55, %v8185_v59  ;;  %v7086_v1 = vmul.f32 %v6932_v17, %v8186_v44  ;;  %v3392_v42 = vadd.f32 %v8187_v5, %v3041_v20  ;;  %v8196_v36 = vld [vmem:[#allocation11_spill] sm:$0xff] }
 0x398   :  { %3580 = vst.msk [vmem:[%s7837_s4 + $0x110] sm:$0xff] %vm1418_vm1, %v3391_v26  ;;  %v3393_v61 = vadd.f32 %v8187_v5, %v3042_v3  ;;  %v3394_v4 = vadd.f32 %v8187_v5, %v3043_v8  ;;  %v3395_v6 = vadd.f32 %v8187_v5, %v3044_v43  ;;  %v3396_v30 = vadd.f32 %v8187_v5, %v3045_v29  ;;  %v8197_v26 = vld [vmem:[#allocation5_spill] sm:$0xff]  ;;  %v8200_v29 = vld [vmem:[#allocation39_spill] sm:$0xff] }
 0x399   :  { %v3397_v18 = vadd.f32 %v8187_v5, %v3046_v49  ;;  %v3398_v15 = vadd.f32 %v8187_v5, %v3047_v47  ;;  %v3089_v52 = vmul.f32 %v6932_v17, %v8188_v19  ;;  %3581 = vst [vmem:[%s7837_s4 + $0x118] sm:$0xff] %v3392_v42  ;;  %v3048_v23 = vmul.f32 %v2904_v10, %v8189_v54  ;;  %v8199_v43 = vld [vmem:[#allocation37_spill] sm:$0xff]  ;;  %v8201_v49 = vld [vmem:[#allocation40_spill] sm:$0xff]  ;;  %v8203_v5 = vld [vmem:[#allocation43_spill] sm:$0xff] }
 0x39a   :  { %3582 = vst [vmem:[%s7837_s4 + $0x120] sm:$0xff] %v3393_v61  ;;  %3583 = vst [vmem:[%s7837_s4 + $0x128] sm:$0xff] %v3394_v4  ;;  %v3049_v17 = vmul.f32 %v2904_v10, %v8190_v7  ;;  %v3050_v40 = vmul.f32 %v2904_v10, %v8191_v33  ;;  %v3051_v35 = vmul.f32 %v2904_v10, %v8192_v39  ;;  %v2909_v8 = vpop.permute.xlu1 %2908  ;;  %v8202_v47 = vld [vmem:[#allocation41_spill] sm:$0xff]  ;;  %v8204_v61 = vld [vmem:[#allocation42_spill] sm:$0xff]  ;;  %v7186_v33 = vpop.permute.xlu0 %2938 }
 0x39b   :  { %3584 = vst [vmem:[%s7837_s4 + $0x130] sm:$0xff] %v3395_v6  ;;  %3585 = vst [vmem:[%s7837_s4 + $0x138] sm:$0xff] %v3396_v30  ;;  %v3052_v56 = vmul.f32 %v2904_v10, %v8193_v22  ;;  %v3053_v32 = vmul.f32 %v2904_v10, %v8194_v2  ;;  %v3054_v34 = vmul.f32 %v2904_v10, %v8195_v0  ;;  %v8205_v30 = vld [vmem:[#allocation8_spill] sm:$0xff]  ;;  %v8209_v2 = vld [vmem:[#allocation47_spill] sm:$0xff] }
 0x39c   :  { %3586 = vst [vmem:[%s7837_s4 + $0x140] sm:$0xff] %v3397_v18  ;;  %3587 = vst.msk [vmem:[%s7837_s4 + $0x148] sm:$0xff] %vm1418_vm1, %v3398_v15  ;;  %v3434_v38 = vadd.f32 %v8196_v36, %v6952_v9  ;;  %v3399_v55 = vadd.f32 %v8197_v26, %v3048_v23  ;;  %v3400_v37 = vadd.f32 %v8197_v26, %v3049_v17  ;;  %v8198_v9 = vld [vmem:[#allocation36_spill] sm:$0xff] }
 0x39d   :  { %v3401_v48 = vadd.f32 %v8197_v26, %v3050_v40  ;;  %v3402_v20 = vadd.f32 %v8197_v26, %v3051_v35  ;;  %v3403_v58 = vadd.f32 %v8197_v26, %v3052_v56  ;;  %v3404_v3 = vadd.f32 %v8197_v26, %v3053_v32  ;;  %v8206_v35 = vld [vmem:[#allocation44_spill] sm:$0xff] }
 0x39e   :  { %v3405_v27 = vadd.f32 %v8197_v26, %v3054_v34  ;;  %v3435_v53 = vadd.f32 %v8196_v36, %v6963_v31  ;;  %3623 = vst [vmem:[%s7837_s4 + $0x268] sm:$0xff] %v3434_v38  ;;  %3588 = vst [vmem:[%s7837_s4 + $0x150] sm:$0xff] %v3399_v55  ;;  %v3055_v31 = vmul.f32 %v2909_v8, %v8198_v9  ;;  %v2914_v17 = vpop.permute.xlu1 %2913  ;;  %v8210_v0 = vld [vmem:[#allocation48_spill] sm:$0xff]  ;;  %v8212_v26 = vld [vmem:[#allocation49_spill] sm:$0xff] }
 0x39f   :  { %3589 = vst [vmem:[%s7837_s4 + $0x158] sm:$0xff] %v3400_v37  ;;  %3590 = vst [vmem:[%s7837_s4 + $0x160] sm:$0xff] %v3401_v48  ;;  %v3056_v46 = vmul.f32 %v2909_v8, %v8199_v43  ;;  %v3057_v63 = vmul.f32 %v2909_v8, %v8200_v29  ;;  %v3058_v59 = vmul.f32 %v2909_v8, %v8201_v49  ;;  %v8213_v37 = vld [vmem:[#allocation7_spill] sm:$0xff] }
 0x3a0   :  { %3591 = vst [vmem:[%s7837_s4 + $0x168] sm:$0xff] %v3402_v20  ;;  %3592 = vst [vmem:[%s7837_s4 + $0x170] sm:$0xff] %v3403_v58  ;;  %v3059_v44 = vmul.f32 %v2909_v8, %v8202_v47  ;;  %v3060_v42 = vmul.f32 %v2909_v8, %v8203_v5  ;;  %v3061_v4 = vmul.f32 %v2909_v8, %v8204_v61  ;;  %v8214_v20 = vld [vmem:[#allocation69_spill] sm:$0xff] }
 0x3a1   :  { %3593 = vst [vmem:[%s7837_s4 + $0x178] sm:$0xff] %v3404_v3  ;;  %3594 = vst.msk [vmem:[%s7837_s4 + $0x180] sm:$0xff] %vm1418_vm1, %v3405_v27  ;;  %v3436_v6 = vadd.f32 %v8196_v36, %v6999_v12  ;;  %v3406_v18 = vadd.f32 %v8205_v30, %v3055_v31  ;;  %v3407_v15 = vadd.f32 %v8205_v30, %v3056_v46  ;;  %v8215_v46 = vld [vmem:[#allocation51_spill] sm:$0xff] }
 0x3a2   :  { %3624 = vst [vmem:[%s7837_s4 + $0x270] sm:$0xff] %v3435_v53  ;;  %v3408_v10 = vadd.f32 %v8205_v30, %v3057_v63  ;;  %v3409_v19 = vadd.f32 %v8205_v30, %v3058_v59  ;;  %v3410_v54 = vadd.f32 %v8205_v30, %v3059_v44  ;;  %v3411_v23 = vadd.f32 %v8205_v30, %v3060_v42  ;;  %v2924_v9 = vpop.permute.xlu1 %2923  ;;  %v8216_v63 = vld [vmem:[#allocation52_spill] sm:$0xff]  ;;  %v8217_v59 = vld [vmem:[#allocation53_spill] sm:$0xff]  ;;  %v8218_v44 = vld [vmem:[#allocation54_spill] sm:$0xff] }
 0x3a3   :  { %v3412_v7 = vadd.f32 %v8205_v30, %v3061_v4  ;;  %v3437_v12 = vadd.f32 %v8196_v36, %v7039_v50  ;;  %3625 = vst [vmem:[%s7837_s4 + $0x278] sm:$0xff] %v3436_v6  ;;  %3595 = vst [vmem:[%s7837_s4 + $0x188] sm:$0xff] %v3406_v18  ;;  %v3438_v50 = vadd.f32 %v8196_v36, %v7053_v28  ;;  %v8207_v28 = vld [vmem:[#allocation45_spill] sm:$0xff]  ;;  %v8219_v42 = vld [vmem:[#allocation55_spill] sm:$0xff] }
 0x3a4   :  { %3596 = vst [vmem:[%s7837_s4 + $0x190] sm:$0xff] %v3407_v15  ;;  %3597 = vst [vmem:[%s7837_s4 + $0x198] sm:$0xff] %v3408_v10  ;;  %v3439_v40 = vadd.f32 %v8196_v36, %v7086_v1  ;;  %v3440_v39 = vadd.f32 %v8196_v36, %v3089_v52  ;;  %v3062_v22 = vmul.f32 %v2914_v17, %v8206_v35  ;;  %v8208_v52 = vld [vmem:[#allocation46_spill] sm:$0xff]  ;;  %v8220_v4 = vld [vmem:[#allocation57_spill] sm:$0xff] }
 0x3a5   :  { %3598 = vst [vmem:[%s7837_s4 + $0x1a0] sm:$0xff] %v3409_v19  ;;  %3599 = vst [vmem:[%s7837_s4 + $0x1a8] sm:$0xff] %v3410_v54  ;;  %v3063_v1 = vmul.f32 %v2914_v17, %v8207_v28  ;;  %v3064_v56 = vmul.f32 %v2914_v17, %v8208_v52  ;;  %v3065_v32 = vmul.f32 %v2914_v17, %v8209_v2  ;;  %v8211_v36 = vld [vmem:[#allocation50_spill] sm:$0xff]  ;;  %v8221_v30 = vld [vmem:[#allocation56_spill] sm:$0xff] }
 0x3a6   :  { %3600 = vst [vmem:[%s7837_s4 + $0x1b0] sm:$0xff] %v3411_v23  ;;  %3601 = vst.msk [vmem:[%s7837_s4 + $0x1b8] sm:$0xff] %vm1418_vm1, %v3412_v7  ;;  %v3066_v34 = vmul.f32 %v2914_v17, %v8210_v0  ;;  %v3067_v38 = vmul.f32 %v2914_v17, %v8211_v36  ;;  %v3068_v55 = vmul.f32 %v2914_v17, %v8212_v26  ;;  %v8222_v15 = vld [vmem:[#allocation9_spill] sm:$0xff]  ;;  %v8223_v54 = vld [vmem:[#allocation71_spill] sm:$0xff] }
 0x3a7   :  { %3626 = vst [vmem:[%s7837_s4 + $0x280] sm:$0xff] %v3437_v12  ;;  %3627 = vst [vmem:[%s7837_s4 + $0x288] sm:$0xff] %v3438_v50  ;;  %v3413_v48 = vadd.f32 %v8213_v37, %v3062_v22  ;;  %v3097_v58 = vmul.f32 %v7186_v33, %v8214_v20  ;;  %v3414_v3 = vadd.f32 %v8213_v37, %v3063_v1  ;;  %v8224_v35 = vld [vmem:[#allocation72_spill] sm:$0xff]  ;;  %v8225_v28 = vld [vmem:[#allocation73_spill] sm:$0xff] }
 0x3a8   :  { %3628 = vst [vmem:[%s7837_s4 + $0x290] sm:$0xff] %v3439_v40  ;;  %3629 = vst.msk [vmem:[%s7837_s4 + $0x298] sm:$0xff] %vm1418_vm1, %v3440_v39  ;;  %v3415_v27 = vadd.f32 %v8213_v37, %v3064_v56  ;;  %v3416_v8 = vadd.f32 %v8213_v37, %v3065_v32  ;;  %v3417_v53 = vadd.f32 %v8213_v37, %v3066_v34  ;;  %v2934_v40 = vpop.permute.xlu1 %2933  ;;  %v8226_v52 = vld [vmem:[#allocation74_spill] sm:$0xff]  ;;  %v8227_v2 = vld [vmem:[#allocation76_spill] sm:$0xff] }
 0x3a9   :  { %v3418_v31 = vadd.f32 %v8213_v37, %v3067_v38  ;;  %v3419_v43 = vadd.f32 %v8213_v37, %v3068_v55  ;;  %3602 = vst [vmem:[%s7837_s4 + $0x1c0] sm:$0xff] %v3413_v48  ;;  %v3076_v29 = vmul.f32 %v2924_v9, %v8215_v46  ;;  %v3077_v49 = vmul.f32 %v2924_v9, %v8216_v63  ;;  %v8228_v0 = vld [vmem:[#allocation75_spill] sm:$0xff]  ;;  %v8229_v36 = vld [vmem:[#allocation12_spill] sm:$0xff] }
 0x3aa   :  { %3603 = vst [vmem:[%s7837_s4 + $0x1c8] sm:$0xff] %v3414_v3  ;;  %3604 = vst [vmem:[%s7837_s4 + $0x1d0] sm:$0xff] %v3415_v27  ;;  %v3078_v47 = vmul.f32 %v2924_v9, %v8217_v59  ;;  %v3079_v5 = vmul.f32 %v2924_v9, %v8218_v44  ;;  %v3080_v61 = vmul.f32 %v2924_v9, %v8219_v42  ;;  %v8230_v20 = vld [vmem:[#allocation63_spill] sm:$0xff] }
 0x3ab   :  { %3605 = vst [vmem:[%s7837_s4 + $0x1d8] sm:$0xff] %v3416_v8  ;;  %3606 = vst [vmem:[%s7837_s4 + $0x1e0] sm:$0xff] %v3417_v53  ;;  %v3081_v6 = vmul.f32 %v2924_v9, %v8220_v4  ;;  %v3082_v18 = vmul.f32 %v2924_v9, %v8221_v30  ;;  %v3427_v10 = vadd.f32 %v8222_v15, %v3076_v29  ;;  %v8232_v53 = vld [vmem:[#allocation65_spill] sm:$0xff]  ;;  %v8234_v29 = vld [vmem:[#allocation67_spill] sm:$0xff] }
 0x3ac   :  { %3607 = vst [vmem:[%s7837_s4 + $0x1e8] sm:$0xff] %v3418_v31  ;;  %3608 = vst.msk [vmem:[%s7837_s4 + $0x1f0] sm:$0xff] %vm1418_vm1, %v3419_v43  ;;  %v3428_v19 = vadd.f32 %v8222_v15, %v3077_v49  ;;  %v3098_v23 = vmul.f32 %v7186_v33, %v8223_v54  ;;  %v3429_v7 = vadd.f32 %v8222_v15, %v3078_v47  ;;  %v2944_v31 = vpop.permute.xlu1 %2943  ;;  %v8233_v43 = vld [vmem:[#allocation66_spill] sm:$0xff]  ;;  %v8236_v47 = vld [vmem:[#allocation68_spill] sm:$0xff] }
 0x3ad   :  { %v3430_v12 = vadd.f32 %v8222_v15, %v3079_v5  ;;  %v3431_v17 = vadd.f32 %v8222_v15, %v3080_v61  ;;  %v3432_v50 = vadd.f32 %v8222_v15, %v3081_v6  ;;  %v3433_v39 = vadd.f32 %v8222_v15, %v3082_v18  ;;  %3616 = vst [vmem:[%s7837_s4 + $0x230] sm:$0xff] %v3427_v10  ;;  %v8235_v49 = vld [vmem:[#allocation70_spill] sm:$0xff]  ;;  %v8238_v6 = vld [vmem:[#allocation77_spill] sm:$0xff]  ;;  %v2949_v18 = vpop.permute.xlu0 %2948 }
 0x3ae   :  { %3617 = vst [vmem:[%s7837_s4 + $0x238] sm:$0xff] %v3428_v19  ;;  %v3099_v22 = vmul.f32 %v7186_v33, %v8224_v35  ;;  %v3100_v1 = vmul.f32 %v7186_v33, %v8225_v28  ;;  %v3101_v56 = vmul.f32 %v7186_v33, %v8226_v52  ;;  %3618 = vst [vmem:[%s7837_s4 + $0x240] sm:$0xff] %v3429_v7  ;;  %v8237_v5 = vld [vmem:[#allocation10_spill] sm:$0xff] }
 0x3af   :  { %3619 = vst [vmem:[%s7837_s4 + $0x248] sm:$0xff] %v3430_v12  ;;  %3620 = vst [vmem:[%s7837_s4 + $0x250] sm:$0xff] %v3431_v17  ;;  %v3102_v32 = vmul.f32 %v7186_v33, %v8227_v2  ;;  %v3103_v34 = vmul.f32 %v7186_v33, %v8228_v0  ;;  %v3448_v38 = vadd.f32 %v8229_v36, %v3097_v58  ;;  %v8231_v58 = vld [vmem:[#allocation64_spill] sm:$0xff]  ;;  %v8240_v12 = vld [vmem:[#allocation79_spill] sm:$0xff] }
 0x3b0   :  { %3621 = vst [vmem:[%s7837_s4 + $0x258] sm:$0xff] %v3432_v50  ;;  %v3449_v26 = vadd.f32 %v8229_v36, %v3098_v23  ;;  %3622 = vst.msk [vmem:[%s7837_s4 + $0x260] sm:$0xff] %vm1418_vm1, %v3433_v39  ;;  %v3450_v55 = vadd.f32 %v8229_v36, %v3099_v22  ;;  %v3451_v37 = vadd.f32 %v8229_v36, %v3100_v1  ;;  %v8239_v23 = vld [vmem:[#allocation78_spill] sm:$0xff]  ;;  %v8241_v50 = vld [vmem:[#allocation80_spill] sm:$0xff] }
 0x3b1   :  { %v3452_v48 = vadd.f32 %v8229_v36, %v3101_v56  ;;  %v3090_v3 = vmul.f32 %v2934_v40, %v8230_v20  ;;  %v3453_v27 = vadd.f32 %v8229_v36, %v3102_v32  ;;  %v3454_v33 = vadd.f32 %v8229_v36, %v3103_v34  ;;  %3637 = vst [vmem:[%s7837_s4 + $0x2d8] sm:$0xff] %v3448_v38  ;;  %v8242_v39 = vld [vmem:[#allocation81_spill] sm:$0xff]  ;;  %v8243_v22 = vld [vmem:[#allocation84_spill] sm:$0xff]  ;;  %v8244_v1 = vld [vmem:[#allocation82_spill] sm:$0xff] }
 0x3b2   :  { %3638 = vst [vmem:[%s7837_s4 + $0x2e0] sm:$0xff] %v3449_v26  ;;  %v3091_v8 = vmul.f32 %v2934_v40, %v8231_v58  ;;  %v3092_v9 = vmul.f32 %v2934_v40, %v8232_v53  ;;  %3639 = vst [vmem:[%s7837_s4 + $0x2e8] sm:$0xff] %v3450_v55  ;;  %v3093_v46 = vmul.f32 %v2934_v40, %v8233_v43  ;;  %v8245_v2 = vld [vmem:[#allocation83_spill] sm:$0xff]  ;;  %v2954_v26 = vpop.permute.xlu1 %2953  ;;  %v8249_v58 = vld [vmem:[#allocation88_spill] sm:$0xff] }
 0x3b3   :  { %3640 = vst [vmem:[%s7837_s4 + $0x2f0] sm:$0xff] %v3451_v37  ;;  %3641 = vst [vmem:[%s7837_s4 + $0x2f8] sm:$0xff] %v3452_v48  ;;  %v3094_v63 = vmul.f32 %v2934_v40, %v8234_v29  ;;  %v3095_v59 = vmul.f32 %v2934_v40, %v8235_v49  ;;  %v3096_v44 = vmul.f32 %v2934_v40, %v8236_v47  ;;  %v8246_v48 = vld [vmem:[#allocation85_spill] sm:$0xff]  ;;  %v8250_v53 = vld [vmem:[#allocation90_spill] sm:$0xff]  ;;  %v2959_v47 = vpop.permute.xlu0 %2958 }
 0x3b4   :  { %3642 = vst [vmem:[%s7837_s4 + $0x300] sm:$0xff] %v3453_v27  ;;  %3643 = vst.msk [vmem:[%s7837_s4 + $0x308] sm:$0xff] %vm1418_vm1, %v3454_v33  ;;  %v3441_v42 = vadd.f32 %v8237_v5, %v3090_v3  ;;  %v3442_v61 = vadd.f32 %v8237_v5, %v3091_v8  ;;  %v3443_v4 = vadd.f32 %v8237_v5, %v3092_v9  ;;  %v8247_v3 = vld [vmem:[#allocation86_spill] sm:$0xff]  ;;  %v8252_v49 = vld [vmem:[#allocation91_spill] sm:$0xff] }
 0x3b5   :  { %v3104_v30 = vmul.f32 %v2944_v31, %v8238_v6  ;;  %v3444_v15 = vadd.f32 %v8237_v5, %v3093_v46  ;;  %v3445_v10 = vadd.f32 %v8237_v5, %v3094_v63  ;;  %v3446_v19 = vadd.f32 %v8237_v5, %v3095_v59 }
 0x3b6   :  { %v3447_v54 = vadd.f32 %v8237_v5, %v3096_v44  ;;  %3630 = vst [vmem:[%s7837_s4 + $0x2a0] sm:$0xff] %v3441_v42  ;;  %3631 = vst [vmem:[%s7837_s4 + $0x2a8] sm:$0xff] %v3442_v61  ;;  %v3105_v7 = vmul.f32 %v2944_v31, %v8239_v23  ;;  %v3106_v17 = vmul.f32 %v2944_v31, %v8240_v12 }
 0x3b7   :  { %3632 = vst [vmem:[%s7837_s4 + $0x2b0] sm:$0xff] %v3443_v4  ;;  %v3107_v40 = vmul.f32 %v2944_v31, %v8241_v50  ;;  %v3108_v35 = vmul.f32 %v2944_v31, %v8242_v39  ;;  %3633 = vst [vmem:[%s7837_s4 + $0x2b8] sm:$0xff] %v3444_v15  ;;  %v3109_v28 = vmul.f32 %v2944_v31, %v8243_v22  ;;  %v8253_v4 = vld [vmem:[#allocation92_spill] sm:$0xff]  ;;  %v8255_v15 = vld [vmem:[#allocation94_spill] sm:$0xff] }
 0x3b8   :  { %3634 = vst [vmem:[%s7837_s4 + $0x2c0] sm:$0xff] %v3445_v10  ;;  %3635 = vst [vmem:[%s7837_s4 + $0x2c8] sm:$0xff] %v3446_v19  ;;  %v3110_v52 = vmul.f32 %v2944_v31, %v8244_v1  ;;  %v3455_v56 = vadd.f32 %v6704_v62, %v3104_v30  ;;  %v3111_v32 = vmul.f32 %v2949_v18, %v8245_v2  ;;  %v8251_v31 = vld [vmem:[#allocation89_spill] sm:$0xff]  ;;  %v8256_v19 = vld [vmem:[#allocation95_spill] sm:$0xff]  ;;  %v2964_v1 = vpop.permute.xlu1 %2963 }
 0x3b9   :  { %3636 = vst.msk [vmem:[%s7837_s4 + $0x2d0] sm:$0xff] %vm1418_vm1, %v3447_v54  ;;  %v3456_v0 = vadd.f32 %v6704_v62, %v3105_v7  ;;  %v3457_v34 = vadd.f32 %v6704_v62, %v3106_v17  ;;  %v3458_v36 = vadd.f32 %v6704_v62, %v3107_v40  ;;  %v3459_v38 = vadd.f32 %v6704_v62, %v3108_v35  ;;  %v8254_v30 = vld [vmem:[#allocation93_spill] sm:$0xff]  ;;  %v8257_v54 = vld [vmem:[#allocation98_spill] sm:$0xff]  ;;  %v8258_v7 = vld [vmem:[#allocation96_spill] sm:$0xff] }
 0x3ba   :  { %v3460_v55 = vadd.f32 %v6704_v62, %v3109_v28  ;;  %v3461_v37 = vadd.f32 %v6704_v62, %v3110_v52  ;;  %3644 = vst [vmem:[%s7837_s4 + $0x310] sm:$0xff] %v3455_v56  ;;  %v3112_v20 = vmul.f32 %v2949_v18, %v8246_v48  ;;  %v3113_v27 = vmul.f32 %v2949_v18, %v8247_v3  ;;  %v8248_v62 = vld [vmem:[#allocation87_spill] sm:$0xff]  ;;  %v8259_v50 = vld [vmem:[#allocation97_spill] sm:$0xff] }
 0x3bb   :  { %3645 = vst [vmem:[%s7837_s4 + $0x318] sm:$0xff] %v3456_v0  ;;  %3646 = vst [vmem:[%s7837_s4 + $0x320] sm:$0xff] %v3457_v34  ;;  %v3114_v33 = vmul.f32 %v2949_v18, %v8248_v62  ;;  %v3115_v8 = vmul.f32 %v2949_v18, %v8249_v58  ;;  %v3116_v9 = vmul.f32 %v2949_v18, %v8250_v53  ;;  %v8260_v2 = vld [vmem:[#allocation99_spill] sm:$0xff]  ;;  %v8261_v0 = vld [vmem:[#allocation100_spill] sm:$0xff] }
 0x3bc   :  { %3647 = vst [vmem:[%s7837_s4 + $0x328] sm:$0xff] %v3458_v36  ;;  %3648 = vst [vmem:[%s7837_s4 + $0x330] sm:$0xff] %v3459_v38  ;;  %v3117_v43 = vmul.f32 %v2949_v18, %v8251_v31  ;;  %v3462_v46 = vadd.f32 %v6677_v11, %v3111_v32  ;;  %v3463_v29 = vadd.f32 %v6677_v11, %v3112_v20  ;;  %v8263_v38 = vld [vmem:[#allocation102_spill] sm:$0xff]  ;;  %v8265_v48 = vld [vmem:[#allocation103_spill] sm:$0xff] }
 0x3bd   :  { %3649 = vst [vmem:[%s7837_s4 + $0x338] sm:$0xff] %v3460_v55  ;;  %3650 = vst.msk [vmem:[%s7837_s4 + $0x340] sm:$0xff] %vm1418_vm1, %v3461_v37  ;;  %v3464_v63 = vadd.f32 %v6677_v11, %v3113_v27  ;;  %v3118_v59 = vmul.f32 %v2954_v26, %v8252_v49  ;;  %v3465_v44 = vadd.f32 %v6677_v11, %v3114_v33  ;;  %v8264_v55 = vld [vmem:[#allocation104_spill] sm:$0xff]  ;;  %v8266_v33 = vld [vmem:[#allocation105_spill] sm:$0xff] }
 0x3be   :  { %v3466_v5 = vadd.f32 %v6677_v11, %v3115_v8  ;;  %v3467_v42 = vadd.f32 %v6677_v11, %v3116_v9  ;;  %v3468_v61 = vadd.f32 %v6677_v11, %v3117_v43  ;;  %3651 = vst [vmem:[%s7837_s4 + $0x348] sm:$0xff] %v3462_v46  ;;  %3652 = vst [vmem:[%s7837_s4 + $0x350] sm:$0xff] %v3463_v29  ;;  %v2969_v8 = vpop.permute.xlu0 %2968  ;;  %v8267_v46 = vld [vmem:[#allocation106_spill] sm:$0xff] }
 0x3bf   :  { %3653 = vst [vmem:[%s7837_s4 + $0x358] sm:$0xff] %v3464_v63  ;;  %v3119_v6 = vmul.f32 %v2954_v26, %v8253_v4  ;;  %v3120_v18 = vmul.f32 %v2954_v26, %v8254_v30  ;;  %v3121_v10 = vmul.f32 %v2954_v26, %v8255_v15  ;;  %v3122_v11 = vmul.f32 %v2954_v26, %v8256_v19  ;;  %v8268_v63 = vld [vmem:[#allocation107_spill] sm:$0xff] }
 0x3c0   :  { %3654 = vst [vmem:[%s7837_s4 + $0x360] sm:$0xff] %v3465_v44  ;;  %3655 = vst [vmem:[%s7837_s4 + $0x368] sm:$0xff] %v3466_v5  ;;  %v3123_v23 = vmul.f32 %v2954_v26, %v8257_v54  ;;  %v3124_v12 = vmul.f32 %v2954_v26, %v8258_v7  ;;  %v3469_v17 = vadd.f32 %v6806_v51, %v3118_v59  ;;  %v8269_v59 = vld [vmem:[#allocation108_spill] sm:$0xff]  ;;  %v8270_v44 = vld [vmem:[#allocation109_spill] sm:$0xff]  ;;  %v2974_v54 = vpop.permute.xlu1 %2973 }
 0x3c1   :  { %3656 = vst [vmem:[%s7837_s4 + $0x370] sm:$0xff] %v3467_v42  ;;  %3657 = vst.msk [vmem:[%s7837_s4 + $0x378] sm:$0xff] %vm1418_vm1, %v3468_v61  ;;  %v3125_v40 = vmul.f32 %v2959_v47, %v8259_v50  ;;  %v3470_v39 = vadd.f32 %v6806_v51, %v3119_v6  ;;  %v3471_v35 = vadd.f32 %v6806_v51, %v3120_v18  ;;  %v8271_v5 = vld [vmem:[#allocation112_spill] sm:$0xff]  ;;  %v8272_v61 = vld [vmem:[#allocation110_spill] sm:$0xff] }
 0x3c2   :  { %v3472_v22 = vadd.f32 %v6806_v51, %v3121_v10  ;;  %v3473_v28 = vadd.f32 %v6806_v51, %v3122_v11  ;;  %v3474_v52 = vadd.f32 %v6806_v51, %v3123_v23  ;;  %v3475_v56 = vadd.f32 %v6806_v51, %v3124_v12  ;;  %3658 = vst [vmem:[%s7837_s4 + $0x380] sm:$0xff] %v3469_v17  ;;  %v8262_v51 = vld [vmem:[#allocation101_spill] sm:$0xff]  ;;  %v8273_v30 = vld [vmem:[#allocation111_spill] sm:$0xff]  ;;  %v8275_v50 = vld [vmem:[#allocation114_spill] sm:$0xff] }
 0x3c3   :  { %v3126_v32 = vmul.f32 %v2959_v47, %v8260_v2  ;;  %v3127_v34 = vmul.f32 %v2959_v47, %v8261_v0  ;;  %3659 = vst [vmem:[%s7837_s4 + $0x388] sm:$0xff] %v3470_v39  ;;  %3660 = vst [vmem:[%s7837_s4 + $0x390] sm:$0xff] %v3471_v35  ;;  %v3128_v36 = vmul.f32 %v2959_v47, %v8262_v51  ;;  %v8274_v12 = vld [vmem:[#allocation113_spill] sm:$0xff]  ;;  %v8277_v35 = vld [vmem:[#allocation116_spill] sm:$0xff] }
 0x3c4   :  { %3661 = vst [vmem:[%s7837_s4 + $0x398] sm:$0xff] %v3472_v22  ;;  %3662 = vst [vmem:[%s7837_s4 + $0x3a0] sm:$0xff] %v3473_v28  ;;  %v3129_v26 = vmul.f32 %v2959_v47, %v8263_v38  ;;  %v3130_v37 = vmul.f32 %v2959_v47, %v8264_v55  ;;  %v3131_v20 = vmul.f32 %v2959_v47, %v8265_v48  ;;  %v8278_v28 = vld [vmem:[#allocation118_spill] sm:$0xff]  ;;  %v8281_v48 = vld [vmem:[#allocation120_spill] sm:$0xff] }
 0x3c5   :  { %3663 = vst [vmem:[%s7837_s4 + $0x3a8] sm:$0xff] %v3474_v52  ;;  %3664 = vst.msk [vmem:[%s7837_s4 + $0x3b0] sm:$0xff] %vm1418_vm1, %v3475_v56  ;;  %v3476_v3 = vadd.f32 %v6861_v41, %v3125_v40  ;;  %v3477_v27 = vadd.f32 %v6861_v41, %v3126_v32  ;;  %v3478_v62 = vadd.f32 %v6861_v41, %v3127_v34  ;;  %v8279_v52 = vld [vmem:[#allocation117_spill] sm:$0xff]  ;;  %v8280_v34 = vld [vmem:[#allocation119_spill] sm:$0xff] }
 0x3c6   :  { %v3132_v58 = vmul.f32 %v2964_v1, %v8266_v33  ;;  %v3479_v53 = vadd.f32 %v6861_v41, %v3128_v36  ;;  %v3480_v9 = vadd.f32 %v6861_v41, %v3129_v26  ;;  %v3481_v31 = vadd.f32 %v6861_v41, %v3130_v37  ;;  %v2979_v36 = vpop.permute.xlu0 %2978 }
 0x3c7   :  { %v3482_v43 = vadd.f32 %v6861_v41, %v3131_v20  ;;  %3665 = vst [vmem:[%s7837_s4 + $0x3b8] sm:$0xff] %v3476_v3  ;;  %3666 = vst [vmem:[%s7837_s4 + $0x3c0] sm:$0xff] %v3477_v27  ;;  %v3133_v29 = vmul.f32 %v2964_v1, %v8267_v46  ;;  %v3134_v49 = vmul.f32 %v2964_v1, %v8268_v63  ;;  %v8282_v3 = vld [vmem:[#allocation121_spill] sm:$0xff] }
 0x3c8   :  { %3667 = vst [vmem:[%s7837_s4 + $0x3c8] sm:$0xff] %v3478_v62  ;;  %v3135_v47 = vmul.f32 %v2964_v1, %v8269_v59  ;;  %v3136_v41 = vmul.f32 %v2964_v1, %v8270_v44  ;;  %3668 = vst [vmem:[%s7837_s4 + $0x3d0] sm:$0xff] %v3479_v53  ;;  %v3137_v42 = vmul.f32 %v2964_v1, %v8271_v5  ;;  %v8283_v62 = vld [vmem:[#allocation122_spill] sm:$0xff]  ;;  %v8287_v46 = vld [vmem:[#allocation125_spill] sm:$0xff]  ;;  %v2984_v44 = vpop.permute.xlu1 %2983 }
 0x3c9   :  { %3669 = vst [vmem:[%s7837_s4 + $0x3d8] sm:$0xff] %v3480_v9  ;;  %3670 = vst [vmem:[%s7837_s4 + $0x3e0] sm:$0xff] %v3481_v31  ;;  %v3138_v4 = vmul.f32 %v2964_v1, %v8272_v61  ;;  %v3483_v6 = vadd.f32 %v6811_v21, %v3132_v58  ;;  %v3139_v18 = vmul.f32 %v2969_v8, %v8273_v30  ;;  %v8284_v58 = vld [vmem:[#allocation123_spill] sm:$0xff]  ;;  %v8286_v9 = vld [vmem:[#allocation124_spill] sm:$0xff] }
 0x3ca   :  { %3671 = vst.msk [vmem:[%s7837_s4 + $0x3e8] sm:$0xff] %vm1418_vm1, %v3482_v43  ;;  %v3484_v15 = vadd.f32 %v6811_v21, %v3133_v29  ;;  %v3485_v10 = vadd.f32 %v6811_v21, %v3134_v49  ;;  %v3486_v19 = vadd.f32 %v6811_v21, %v3135_v47  ;;  %v3487_v11 = vadd.f32 %v6811_v21, %v3136_v41 }
 0x3cb   :  { %v3488_v23 = vadd.f32 %v6811_v21, %v3137_v42  ;;  %v3489_v7 = vadd.f32 %v6811_v21, %v3138_v4  ;;  %3672 = vst [vmem:[%s7837_s4 + $0x3f0] sm:$0xff] %v3483_v6  ;;  %v3140_v17 = vmul.f32 %v2969_v8, %v8274_v12  ;;  %v3141_v40 = vmul.f32 %v2969_v8, %v8275_v50  ;;  %v8276_v21 = vld [vmem:[#allocation115_spill] sm:$0xff]  ;;  %v8289_v4 = vld [vmem:[#allocation128_spill] sm:$0xff] }
 0x3cc   :  { %3673 = vst [vmem:[%s7837_s4 + $0x3f8] sm:$0xff] %v3484_v15  ;;  %3674 = vst [vmem:[%s7837_s4 + $0x400] sm:$0xff] %v3485_v10  ;;  %v3142_v39 = vmul.f32 %v2969_v8, %v8276_v21  ;;  %v3143_v22 = vmul.f32 %v2969_v8, %v8277_v35  ;;  %v3144_v1 = vmul.f32 %v2969_v8, %v8278_v28  ;;  %v8288_v42 = vld [vmem:[#allocation127_spill] sm:$0xff]  ;;  %v8292_v10 = vld [vmem:[#allocation132_spill] sm:$0xff] }
 0x3cd   :  { %3675 = vst [vmem:[%s7837_s4 + $0x408] sm:$0xff] %v3486_v19  ;;  %3676 = vst [vmem:[%s7837_s4 + $0x410] sm:$0xff] %v3487_v11  ;;  %v3145_v56 = vmul.f32 %v2969_v8, %v8279_v52  ;;  %v3490_v2 = vadd.f32 %v6863_v14, %v3139_v18  ;;  %v3491_v32 = vadd.f32 %v6863_v14, %v3140_v17  ;;  %v8285_v8 = vld [vmem:[#allocation126_spill] sm:$0xff]  ;;  %v8293_v11 = vld [vmem:[#allocation131_spill] sm:$0xff] }
 0x3ce   :  { %3677 = vst [vmem:[%s7837_s4 + $0x418] sm:$0xff] %v3488_v23  ;;  %3678 = vst.msk [vmem:[%s7837_s4 + $0x420] sm:$0xff] %vm1418_vm1, %v3489_v7  ;;  %v3492_v0 = vadd.f32 %v6863_v14, %v3141_v40  ;;  %v3146_v51 = vmul.f32 %v2974_v54, %v8280_v34  ;;  %v3493_v38 = vadd.f32 %v6863_v14, %v3142_v39  ;;  %v8291_v18 = vld [vmem:[#allocation130_spill] sm:$0xff]  ;;  %v8294_v17 = vld [vmem:[#allocation133_spill] sm:$0xff] }
 0x3cf   :  { %v3494_v26 = vadd.f32 %v6863_v14, %v3143_v22  ;;  %v3495_v55 = vadd.f32 %v6863_v14, %v3144_v1  ;;  %v3496_v37 = vadd.f32 %v6863_v14, %v3145_v56  ;;  %3679 = vst [vmem:[%s7837_s4 + $0x428] sm:$0xff] %v3490_v2  ;;  %3680 = vst [vmem:[%s7837_s4 + $0x430] sm:$0xff] %v3491_v32  ;;  %v2989_v22 = vpop.permute.xlu0 %2988  ;;  %v8295_v28 = vld [vmem:[#allocation134_spill] sm:$0xff]  ;;  %v8296_v52 = vld [vmem:[#allocation135_spill] sm:$0xff] }
 0x3d0   :  { %3681 = vst [vmem:[%s7837_s4 + $0x438] sm:$0xff] %v3492_v0  ;;  %v3147_v20 = vmul.f32 %v2974_v54, %v8281_v48  ;;  %v3148_v27 = vmul.f32 %v2974_v54, %v8282_v3  ;;  %v3149_v33 = vmul.f32 %v2974_v54, %v8283_v62  ;;  %v3150_v14 = vmul.f32 %v2974_v54, %v8284_v58  ;;  %v8297_v2 = vld [vmem:[#allocation136_spill] sm:$0xff]  ;;  %v8301_v62 = vld [vmem:[#allocation139_spill] sm:$0xff]  ;;  %v8302_v58 = vld [vmem:[#allocation141_spill] sm:$0xff] }
 0x3d1   :  { %3682 = vst [vmem:[%s7837_s4 + $0x440] sm:$0xff] %v3493_v38  ;;  %3683 = vst [vmem:[%s7837_s4 + $0x448] sm:$0xff] %v3494_v26  ;;  %v3151_v53 = vmul.f32 %v2974_v54, %v8285_v8  ;;  %v3152_v31 = vmul.f32 %v2974_v54, %v8286_v9  ;;  %v3497_v43 = vadd.f32 %v6816_v57, %v3146_v51  ;;  %v8298_v0 = vld [vmem:[#allocation140_spill] sm:$0xff]  ;;  %v8300_v38 = vld [vmem:[#allocation138_spill] sm:$0xff] }
 0x3d2   :  { %3684 = vst [vmem:[%s7837_s4 + $0x450] sm:$0xff] %v3495_v55  ;;  %3685 = vst.msk [vmem:[%s7837_s4 + $0x458] sm:$0xff] %vm1418_vm1, %v3496_v37  ;;  %v3153_v29 = vmul.f32 %v2979_v36, %v8287_v46  ;;  %v3498_v63 = vadd.f32 %v6816_v57, %v3147_v20  ;;  %v3499_v49 = vadd.f32 %v6816_v57, %v3148_v27  ;;  %v8306_v46 = vld [vmem:[#allocation144_spill] sm:$0xff] }
 0x3d3   :  { %v3500_v59 = vadd.f32 %v6816_v57, %v3149_v33  ;;  %v3501_v47 = vadd.f32 %v6816_v57, %v3150_v14  ;;  %v3502_v41 = vadd.f32 %v6816_v57, %v3151_v53  ;;  %v3503_v5 = vadd.f32 %v6816_v57, %v3152_v31  ;;  %3686 = vst [vmem:[%s7837_s4 + $0x460] sm:$0xff] %v3497_v43  ;;  %v8290_v57 = vld [vmem:[#allocation129_spill] sm:$0xff]  ;;  %v8304_v53 = vld [vmem:[#allocation143_spill] sm:$0xff]  ;;  %v8305_v31 = vld [vmem:[#allocation148_spill] sm:$0xff] }
 0x3d4   :  { %v3154_v61 = vmul.f32 %v2979_v36, %v8288_v42  ;;  %v3155_v6 = vmul.f32 %v2979_v36, %v8289_v4  ;;  %3687 = vst [vmem:[%s7837_s4 + $0x468] sm:$0xff] %v3498_v63  ;;  %3688 = vst [vmem:[%s7837_s4 + $0x470] sm:$0xff] %v3499_v49  ;;  %v3156_v30 = vmul.f32 %v2979_v36, %v8290_v57  ;;  %v2994_v63 = vpop.permute.xlu1 %2993 }
 0x3d5   :  { %3689 = vst [vmem:[%s7837_s4 + $0x478] sm:$0xff] %v3500_v59  ;;  %3690 = vst [vmem:[%s7837_s4 + $0x480] sm:$0xff] %v3501_v47  ;;  %v3157_v15 = vmul.f32 %v2979_v36, %v8291_v18  ;;  %v3158_v19 = vmul.f32 %v2979_v36, %v8292_v10  ;;  %v3159_v54 = vmul.f32 %v2979_v36, %v8293_v11  ;;  %v8312_v11 = vld [vmem:[#allocation155_spill] sm:$0xff] }
 0x3d6   :  { %3691 = vst [vmem:[%s7837_s4 + $0x488] sm:$0xff] %v3502_v41  ;;  %3692 = vst.msk [vmem:[%s7837_s4 + $0x490] sm:$0xff] %vm1418_vm1, %v3503_v5  ;;  %v3504_v23 = vadd.f32 %v6865_v16, %v3153_v29  ;;  %v3505_v7 = vadd.f32 %v6865_v16, %v3154_v61  ;;  %v3506_v12 = vadd.f32 %v6865_v16, %v3155_v6  ;;  %v8308_v6 = vld [vmem:[#allocation146_spill] sm:$0xff] }
 0x3d7   :  { %v3160_v50 = vmul.f32 %v2984_v44, %v8294_v17  ;;  %v3507_v40 = vadd.f32 %v6865_v16, %v3156_v30  ;;  %v3508_v21 = vadd.f32 %v6865_v16, %v3157_v15  ;;  %v3509_v39 = vadd.f32 %v6865_v16, %v3158_v19  ;;  %v8309_v30 = vld [vmem:[#allocation147_spill] sm:$0xff]  ;;  %v8310_v15 = vld [vmem:[#allocation149_spill] sm:$0xff]  ;;  %v8311_v19 = vld [vmem:[#allocation150_spill] sm:$0xff] }
 0x3d8   :  { %v3510_v35 = vadd.f32 %v6865_v16, %v3159_v54  ;;  %3693 = vst [vmem:[%s7837_s4 + $0x498] sm:$0xff] %v3504_v23  ;;  %3694 = vst [vmem:[%s7837_s4 + $0x4a0] sm:$0xff] %v3505_v7  ;;  %v3161_v1 = vmul.f32 %v2984_v44, %v8295_v28  ;;  %v3162_v56 = vmul.f32 %v2984_v44, %v8296_v52  ;;  %v8313_v23 = vld [vmem:[#allocation151_spill] sm:$0xff]  ;;  %v8315_v52 = vld [vmem:[#allocation153_spill] sm:$0xff] }
 0x3d9   :  { %3695 = vst [vmem:[%s7837_s4 + $0x4a8] sm:$0xff] %v3506_v12  ;;  %v3163_v32 = vmul.f32 %v2984_v44, %v8297_v2  ;;  %v3164_v16 = vmul.f32 %v2984_v44, %v6547_v25  ;;  %3696 = vst [vmem:[%s7837_s4 + $0x4b0] sm:$0xff] %v3507_v40  ;;  %v3165_v34 = vmul.f32 %v2984_v44, %v8298_v0  ;;  %v8299_v25 = vld [vmem:[#allocation137_spill] sm:$0xff]  ;;  %v8316_v2 = vld [vmem:[#allocation154_spill] sm:$0xff] }
 0x3da   :  { %3697 = vst [vmem:[%s7837_s4 + $0x4b8] sm:$0xff] %v3508_v21  ;;  %3698 = vst [vmem:[%s7837_s4 + $0x4c0] sm:$0xff] %v3509_v39  ;;  %v3166_v51 = vmul.f32 %v2984_v44, %v8299_v25  ;;  %v3511_v36 = vadd.f32 %v6821_v13, %v3160_v50  ;;  %v3167_v26 = vmul.f32 %v2989_v22, %v8300_v38  ;;  %v8307_v44 = vld [vmem:[#allocation145_spill] sm:$0xff] }
 0x3db   :  { %3699 = vst.msk [vmem:[%s7837_s4 + $0x4c8] sm:$0xff] %vm1418_vm1, %v3510_v35  ;;  %v3512_v55 = vadd.f32 %v6821_v13, %v3161_v1  ;;  %v3513_v37 = vadd.f32 %v6821_v13, %v3162_v56  ;;  %v3514_v48 = vadd.f32 %v6821_v13, %v3163_v32  ;;  %v3515_v20 = vadd.f32 %v6821_v13, %v3164_v16  ;;  %v8317_v16 = vld [vmem:[#allocation156_spill] sm:$0xff]  ;;  %v8320_v38 = vld [vmem:[#allocation161_spill] sm:$0xff] }
 0x3dc   :  { %v3516_v3 = vadd.f32 %v6821_v13, %v3165_v34  ;;  %v3517_v27 = vadd.f32 %v6821_v13, %v3166_v51  ;;  %3700 = vst [vmem:[%s7837_s4 + $0x4d0] sm:$0xff] %v3511_v36  ;;  %v3168_v33 = vmul.f32 %v2989_v22, %v8301_v62  ;;  %v3169_v14 = vmul.f32 %v2989_v22, %v8302_v58  ;;  %v8303_v13 = vld [vmem:[#allocation142_spill] sm:$0xff]  ;;  %v8318_v34 = vld [vmem:[#allocation157_spill] sm:$0xff]  ;;  %v8319_v51 = vld [vmem:[#allocation160_spill] sm:$0xff] }
 0x3dd   :  { %3701 = vst [vmem:[%s7837_s4 + $0x4d8] sm:$0xff] %v3512_v55  ;;  %3702 = vst [vmem:[%s7837_s4 + $0x4e0] sm:$0xff] %v3513_v37  ;;  %v3170_v8 = vmul.f32 %v2989_v22, %v8303_v13  ;;  %v3171_v9 = vmul.f32 %v2989_v22, %v8304_v53  ;;  %v3172_v43 = vmul.f32 %v2989_v22, %v8305_v31  ;;  %v8321_v55 = vld [vmem:[#allocation162_spill] sm:$0xff]  ;;  %v8325_v13 = vld [vmem:[#allocation159_spill] sm:$0xff] }
 0x3de   :  { %3703 = vst [vmem:[%s7837_s4 + $0x4e8] sm:$0xff] %v3514_v48  ;;  %3704 = vst [vmem:[%s7837_s4 + $0x4f0] sm:$0xff] %v3515_v20  ;;  %v3173_v29 = vmul.f32 %v2989_v22, %v8306_v46  ;;  %v3518_v49 = vadd.f32 %v6867_v24, %v3167_v26  ;;  %v3519_v59 = vadd.f32 %v6867_v24, %v3168_v33  ;;  %v8314_v22 = vld [vmem:[#allocation152_spill] sm:$0xff]  ;;  %v8322_v48 = vld [vmem:[#allocation163_spill] sm:$0xff] }
 0x3df   :  { %3705 = vst [vmem:[%s7837_s4 + $0x4f8] sm:$0xff] %v3516_v3  ;;  %3706 = vst.msk [vmem:[%s7837_s4 + $0x500] sm:$0xff] %vm1418_vm1, %v3517_v27  ;;  %v3520_v47 = vadd.f32 %v6867_v24, %v3169_v14  ;;  %v3174_v41 = vmul.f32 %v2994_v63, %v8307_v44  ;;  %v3521_v5 = vadd.f32 %v6867_v24, %v3170_v8  ;;  %v8323_v27 = vld [vmem:[#allocation164_spill] sm:$0xff]  ;;  %v8324_v33 = vld [vmem:[#allocation165_spill] sm:$0xff] }
 0x3e0   :  { %v3522_v42 = vadd.f32 %v6867_v24, %v3171_v9  ;;  %v3523_v61 = vadd.f32 %v6867_v24, %v3172_v43  ;;  %v3524_v4 = vadd.f32 %v6867_v24, %v3173_v29  ;;  %3707 = vst [vmem:[%s7837_s4 + $0x508] sm:$0xff] %v3518_v49  ;;  %3708 = vst [vmem:[%s7837_s4 + $0x510] sm:$0xff] %v3519_v59  ;;  %v8326_v59 = vld [vmem:[#allocation158_spill] sm:$0xff] }
 0x3e1   :  { %3709 = vst [vmem:[%s7837_s4 + $0x518] sm:$0xff] %v3520_v47  ;;  %v3175_v57 = vmul.f32 %v2994_v63, %v8308_v6  ;;  %v3176_v18 = vmul.f32 %v2994_v63, %v8309_v30  ;;  %v3177_v10 = vmul.f32 %v2994_v63, %v8310_v15  ;;  %v3178_v24 = vmul.f32 %v2994_v63, %v8311_v19 }
 0x3e2   :  { %3710 = vst [vmem:[%s7837_s4 + $0x520] sm:$0xff] %v3521_v5  ;;  %3711 = vst [vmem:[%s7837_s4 + $0x528] sm:$0xff] %v3522_v42  ;;  %v3179_v54 = vmul.f32 %v2994_v63, %v8312_v11  ;;  %v3180_v7 = vmul.f32 %v2994_v63, %v8313_v23  ;;  %v3525_v12 = vadd.f32 %v6823_v60, %v3174_v41 }
 0x3e3   :  { %3712 = vst [vmem:[%s7837_s4 + $0x530] sm:$0xff] %v3523_v61  ;;  %3713 = vst.msk [vmem:[%s7837_s4 + $0x538] sm:$0xff] %vm1418_vm1, %v3524_v4  ;;  %v3526_v17 = vadd.f32 %v6823_v60, %v3175_v57  ;;  %v3527_v50 = vadd.f32 %v6823_v60, %v3176_v18  ;;  %v3528_v40 = vadd.f32 %v6823_v60, %v3177_v10 }
 0x3e4   :  { %v3529_v21 = vadd.f32 %v6823_v60, %v3178_v24  ;;  %v3530_v39 = vadd.f32 %v6823_v60, %v3179_v54  ;;  %v3531_v35 = vadd.f32 %v6823_v60, %v3180_v7  ;;  %3714 = vst [vmem:[%s7837_s4 + $0x540] sm:$0xff] %v3525_v12  ;;  %v2999_v60 = vpop.permute.xlu0 %2998 }
 0x3e5   :  { %3715 = vst [vmem:[%s7837_s4 + $0x548] sm:$0xff] %v3526_v17  ;;  %3716 = vst [vmem:[%s7837_s4 + $0x550] sm:$0xff] %v3527_v50  ;;  %v3181_v28 = vmul.f32 %v2999_v60, %v8314_v22  ;;  %v3182_v56 = vmul.f32 %v2999_v60, %v8315_v52  ;;  %v3183_v32 = vmul.f32 %v2999_v60, %v8316_v2 }
 0x3e6   :  { %3717 = vst [vmem:[%s7837_s4 + $0x558] sm:$0xff] %v3528_v40  ;;  %3718 = vst [vmem:[%s7837_s4 + $0x560] sm:$0xff] %v3529_v21  ;;  %v3184_v0 = vmul.f32 %v2999_v60, %v8317_v16  ;;  %v3185_v25 = vmul.f32 %v2999_v60, %v8318_v34  ;;  %v3186_v8 = vmul.f32 %v2999_v60, %v8325_v13 }
 0x3e7   :  { %3719 = vst [vmem:[%s7837_s4 + $0x568] sm:$0xff] %v3530_v39  ;;  %3720 = vst.msk [vmem:[%s7837_s4 + $0x570] sm:$0xff] %vm1418_vm1, %v3531_v35  ;;  %v3187_v47 = vmul.f32 %v2999_v60, %v8326_v59 }
 0x3e8   :  { %v3355_v3 = vpop.permute.xlu0 %3354 }
 0x411   :  { %v3004_v1 = vpop.permute.xlu1 %3003 }
 0x412   :  { %v3188_v36 = vmul.f32 %v3004_v1, %v8319_v51  ;;  %v3189_v26 = vmul.f32 %v3004_v1, %v8320_v38  ;;  %v3190_v37 = vmul.f32 %v3004_v1, %v8321_v55  ;;  %v3191_v20 = vmul.f32 %v3004_v1, %v8322_v48 }
 0x413   :  { %v3192_v62 = vmul.f32 %v3004_v1, %v8323_v27  ;;  %v3193_v58 = vmul.f32 %v3004_v1, %v8324_v33  ;;  %v3194_v14 = vmul.f32 %v3004_v1, %v6730_v45 }
 0x414   :  { %v3539_v53 = vadd.f32 %v3355_v3, %v3188_v36  ;;  %v3540_v9 = vadd.f32 %v3355_v3, %v3189_v26  ;;  %v3541_v31 = vadd.f32 %v3355_v3, %v3190_v37  ;;  %v3542_v43 = vadd.f32 %v3355_v3, %v3191_v20 }
 0x415   :  { %v3543_v46 = vadd.f32 %v3355_v3, %v3192_v62  ;;  %v3544_v29 = vadd.f32 %v3355_v3, %v3193_v58  ;;  %v3545_v63 = vadd.f32 %v3355_v3, %v3194_v14  ;;  %v3350_v49 = vpop.permute.xlu1 %3349 }
 0x416   :  { %3728 = vst [vmem:[%s7837_s4 + $0x5b0] sm:$0xff] %v3539_v53  ;;  %3729 = vst [vmem:[%s7837_s4 + $0x5b8] sm:$0xff] %v3540_v9  ;;  %v3532_v45 = vadd.f32 %v3350_v49, %v3181_v28  ;;  %v3533_v44 = vadd.f32 %v3350_v49, %v3182_v56  ;;  %v3534_v41 = vadd.f32 %v3350_v49, %v3183_v32 }
 0x417   :  { %3730 = vst [vmem:[%s7837_s4 + $0x5c0] sm:$0xff] %v3541_v31  ;;  %3731 = vst [vmem:[%s7837_s4 + $0x5c8] sm:$0xff] %v3542_v43  ;;  %v3535_v5 = vadd.f32 %v3350_v49, %v3184_v0  ;;  %v3536_v42 = vadd.f32 %v3350_v49, %v3185_v25  ;;  %v3537_v61 = vadd.f32 %v3350_v49, %v3186_v8 }
 0x418   :  { %3732 = vst [vmem:[%s7837_s4 + $0x5d0] sm:$0xff] %v3543_v46  ;;  %3733 = vst [vmem:[%s7837_s4 + $0x5d8] sm:$0xff] %v3544_v29  ;;  %v3538_v4 = vadd.f32 %v3350_v49, %v3187_v47 }
 0x419   :  { %3734 = vst.msk [vmem:[%s7837_s4 + $0x5e0] sm:$0xff] %vm1418_vm1, %v3545_v63  ;;  %3721 = vst [vmem:[%s7837_s4 + $0x578] sm:$0xff] %v3532_v45 }
 0x41a   :  { %3722 = vst [vmem:[%s7837_s4 + $0x580] sm:$0xff] %v3533_v44  ;;  %3723 = vst [vmem:[%s7837_s4 + $0x588] sm:$0xff] %v3534_v41 }
 0x41b   :  { %3724 = vst [vmem:[%s7837_s4 + $0x590] sm:$0xff] %v3535_v5  ;;  %3725 = vst [vmem:[%s7837_s4 + $0x598] sm:$0xff] %v3536_v42 }
 0x41c   :  { %3726 = vst [vmem:[%s7837_s4 + $0x5a0] sm:$0xff] %v3537_v61  ;;  %3727 = vst.msk [vmem:[%s7837_s4 + $0x5a8] sm:$0xff] %vm1418_vm1, %v3538_v4 }

</bundles_post_ra>
